<compile_context>
chip_gen: v7x
topology: tpu7x:2x2x1
jax: 0.10.0
libtpu: 0.0.40
codegen_flags: <defaults>
</compile_context>

<pallas_src>
import functools

import jax
import jax.numpy as jnp
from jax.experimental import pallas as pl
from jax.experimental.pallas import tpu as pltpu

EPS = 1e-5          # nn.GroupNorm default eps
GROUPS = 32


# ---------------------------------------------------------------------------
# Config helpers
# ---------------------------------------------------------------------------
def _use_kconcat(C):
    """Single big-K matmul only when the per-tap channel slot is lane-aligned."""
    return C % 128 == 0


def _pick_cout_tile(cout):
    # 128-lane tiles: lane-dense stores, matches v5e MXU width, bounds per-step
    # VMEM on v7x; cout<=128 uses the full extent.
    if cout > 128 and cout % 128 == 0:
        return 128
    return cout


@functools.lru_cache(maxsize=None)
def _vmem_limit_bytes():
    # Generation-aware: ~96 MiB on 128 MiB parts (v5e/v6e), 48 MiB on v7x's
    # 64 MiB physical VMEM.  Falls back conservatively if the query fails.
    try:
        cap = int(pltpu.get_tpu_info().vmem_capacity_bytes)
    except Exception:
        cap = 64 * 1024 * 1024
    return max(48 * 1024 * 1024, min((cap * 3) // 4, 100 * 1024 * 1024))


def _compiler_params():
    return pltpu.CompilerParams(
        dimension_semantics=("parallel", "arbitrary"),
        vmem_limit_bytes=_vmem_limit_bytes())


# ---------------------------------------------------------------------------
# In-kernel helpers
# ---------------------------------------------------------------------------
def _gn_silu_im2col(xf, gamma, beta, mcg, mgc, pad_sc, col_sc, H, W, C, npg):
    """col_sc <- im2col(SiLU(GroupNorm(xf))) with zero halo, stored in bf16.

    xf:     (H*W, C) f32 pre-norm activation.
    pad_sc: (H+2, W+2, C) f32 scratch (halo buffer).
    col_sc: (H*W, 9*C) bf16  [K-concat layout]  or  (9, H*W, C) bf16.
    Two-pass GroupNorm statistics in f32 (stable under mean shifts).
    """
    s = jnp.sum(xf, axis=0, keepdims=True)                              # (1, C)
    mean_g = jnp.dot(s, mcg, preferred_element_type=jnp.float32) / npg  # (1, G)
    mean_c = jnp.dot(mean_g, mgc, preferred_element_type=jnp.float32)   # (1, C)
    d = xf - mean_c
    ssq = jnp.sum(d * d, axis=0, keepdims=True)                         # (1, C)
    var_g = jnp.dot(ssq, mcg, preferred_element_type=jnp.float32) / npg
    inv_c = jnp.dot(jax.lax.rsqrt(var_g + EPS), mgc,
                    preferred_element_type=jnp.float32)                 # (1, C)
    y = d * inv_c * gamma + beta
    y = y * jax.nn.sigmoid(y)                                           # SiLU

    # Build the zero halo in VMEM (no XLA pad round trip).
    pad_sc[...] = jnp.zeros(pad_sc.shape, pad_sc.dtype)
    pad_sc[1:H + 1, 1:W + 1, :] = y.reshape(H, W, C)
    xp = pad_sc[...]                                                    # (H+2, W+2, C)

    kconcat = len(col_sc.shape) == 2
    for k in range(9):
        dh, dw = k // 3, k % 3
        tap = xp[dh:dh + H, dw:dw + W, :].reshape(H * W, C).astype(col_sc.dtype)
        if kconcat:
            col_sc[:, k * C:(k + 1) * C] = tap
        else:
            col_sc[k] = tap


def _conv_matmul(col_sc, w_ref):
    """3x3 conv from the cached im2col scratch, f32 accumulation."""
    if len(col_sc.shape) == 2:
        # Single K-concat matmul: accumulation over K stays inside the MXU.
        return jnp.dot(col_sc[...], w_ref[...], preferred_element_type=jnp.float32)
    # Fallback (C % 128 != 0): 9 matmuls over the cached bf16 taps.
    acc = jnp.dot(col_sc[0], w_ref[0], preferred_element_type=jnp.float32)
    for k in range(1, 9):
        acc = acc + jnp.dot(col_sc[k], w_ref[k], preferred_element_type=jnp.float32)
    return acc


# ---------------------------------------------------------------------------
# Kernels
# ---------------------------------------------------------------------------
def _gn_conv1_kernel(x_ref, g_ref, b_ref, mcg_ref, mgc_ref, w_ref, bias_ref,
                     o_ref, pad_sc, col_sc, *, H, W, C, npg):
    """out = conv3x3(SiLU(GroupNorm(x)));  x arrives unpadded, out is bf16."""
    @pl.when(pl.program_id(1) == 0)
    def _():
        xf = x_ref[0].reshape(H * W, C)
        _gn_silu_im2col(xf, g_ref[...], b_ref[...], mcg_ref[...], mgc_ref[...],
                        pad_sc, col_sc, H, W, C, npg)
    acc = _conv_matmul(col_sc, w_ref)
    o_ref[0] = (acc + bias_ref[...]).astype(o_ref.dtype)


def _gn_conv2_id_kernel(h_ref, t_ref, lw_ref, lb_ref, g_ref, b_ref,
                        mcg_ref, mgc_ref, w_ref, bias_ref, res_ref,
                        o_ref, pad_sc, col_sc, *, H, W, C, npg):
    """out = conv3x3(SiLU(GN(h + linear(SiLU(t))))) + residue (identity)."""
    @pl.when(pl.program_id(1) == 0)
    def _():
        t = t_ref[0]                                                    # (1, n_time)
        t = t * jax.nn.sigmoid(t)
        temb = jnp.dot(t.astype(jnp.bfloat16), lw_ref[...],
                       preferred_element_type=jnp.float32) + lb_ref[...]  # (1, C)
        xf = h_ref[0].astype(jnp.float32) + temb                        # (HW, C)
        _gn_silu_im2col(xf, g_ref[...], b_ref[...], mcg_ref[...], mgc_ref[...],
                        pad_sc, col_sc, H, W, C, npg)
    acc = _conv_matmul(col_sc, w_ref)
    o_ref[0] = acc + bias_ref[...] + res_ref[0]


def _gn_conv2_proj_kernel(h_ref, t_ref, lw_ref, lb_ref, g_ref, b_ref,
                          mcg_ref, mgc_ref, w_ref, bias_ref, res_ref, rw_ref,
                          rb_ref, o_ref, pad_sc, col_sc, *, H, W, C, npg):
    """Same as above; residue goes through a 1x1 conv (cin != cout)."""
    @pl.when(pl.program_id(1) == 0)
    def _():
        t = t_ref[0]
        t = t * jax.nn.sigmoid(t)
        temb = jnp.dot(t.astype(jnp.bfloat16), lw_ref[...],
                       preferred_element_type=jnp.float32) + lb_ref[...]
        xf = h_ref[0].astype(jnp.float32) + temb
        _gn_silu_im2col(xf, g_ref[...], b_ref[...], mcg_ref[...], mgc_ref[...],
                        pad_sc, col_sc, H, W, C, npg)
    acc = _conv_matmul(col_sc, w_ref)
    res = jnp.dot(res_ref[0].astype(jnp.bfloat16), rw_ref[...],
                  preferred_element_type=jnp.float32) + rb_ref[...]
    o_ref[0] = acc + bias_ref[...] + res


# ---------------------------------------------------------------------------
# pallas_call wrappers
# ---------------------------------------------------------------------------
def _weight_spec_and_col_scratch(C, TC, HW):
    if _use_kconcat(C):
        w_spec = pl.BlockSpec((9 * C, TC), lambda b, c: (0, c))
        col_sc = pltpu.VMEM((HW, 9 * C), jnp.bfloat16)
    else:
        w_spec = pl.BlockSpec((9, C, TC), lambda b, c: (0, 0, c))
        col_sc = pltpu.VMEM((9, HW, C), jnp.bfloat16)
    return w_spec, col_sc


def _fused_gn_silu_conv1(x_nhwc, pp, H, W):
    N, _, _, cin = x_nhwc.shape
    cout = pp["conv1_w"].shape[-1]
    TC = _pick_cout_tile(cout)
    HW = H * W
    w_spec, col_sc = _weight_spec_and_col_scratch(cin, TC, HW)
    kern = functools.partial(_gn_conv1_kernel, H=H, W=W, C=cin,
                             npg=float(HW * (cin // GROUPS)))
    return pl.pallas_call(
        kern,
        out_shape=jax.ShapeDtypeStruct((N, HW, cout), jnp.bfloat16),
        grid=(N, cout // TC),
        in_specs=[
            pl.BlockSpec((1, H, W, cin), lambda b, c: (b, 0, 0, 0)),
            pl.BlockSpec((1, cin), lambda b, c: (0, 0)),
            pl.BlockSpec((1, cin), lambda b, c: (0, 0)),
            pl.BlockSpec((cin, GROUPS), lambda b, c: (0, 0)),
            pl.BlockSpec((GROUPS, cin), lambda b, c: (0, 0)),
            w_spec,
            pl.BlockSpec((1, TC), lambda b, c: (0, c)),
        ],
        out_specs=pl.BlockSpec((1, HW, TC), lambda b, c: (b, 0, c)),
        scratch_shapes=[pltpu.VMEM((H + 2, W + 2, cin), jnp.float32), col_sc],
        compiler_params=_compiler_params(),
    )(x_nhwc, pp["gn1_gamma"], pp["gn1_beta"], pp["mcg1"], pp["mgc1"],
      pp["conv1_w"], pp["conv1_b"])


def _fused_gn_silu_conv2(h, time3, residue, pp, H, W, identity):
    N, HW, C = h.shape                       # C == cout
    cout = C
    n_time = time3.shape[-1]
    TC = _pick_cout_tile(cout)
    npg = float(HW * (C // GROUPS))
    w_spec, col_sc = _weight_spec_and_col_scratch(C, TC, HW)

    specs = [
        pl.BlockSpec((1, HW, C), lambda b, c: (b, 0, 0)),
        pl.BlockSpec((1, 1, n_time), lambda b, c: (b, 0, 0)),
        pl.BlockSpec((n_time, cout), lambda b, c: (0, 0)),
        pl.BlockSpec((1, cout), lambda b, c: (0, 0)),
        pl.BlockSpec((1, cout), lambda b, c: (0, 0)),
        pl.BlockSpec((1, cout), lambda b, c: (0, 0)),
        pl.BlockSpec((cout, GROUPS), lambda b, c: (0, 0)),
        pl.BlockSpec((GROUPS, cout), lambda b, c: (0, 0)),
        w_spec,
        pl.BlockSpec((1, TC), lambda b, c: (0, c)),
    ]
    args = [h, time3, pp["lin_w"], pp["lin_b"],
            pp["gn2_gamma"], pp["gn2_beta"], pp["mcg2"], pp["mgc2"],
            pp["conv2_w"], pp["conv2_b"]]

    if identity:
        kern = functools.partial(_gn_conv2_id_kernel, H=H, W=W, C=C, npg=npg)
        specs.append(pl.BlockSpec((1, HW, TC), lambda b, c: (b, 0, c)))
        args.append(residue)
    else:
        cin = residue.shape[-1]
        kern = functools.partial(_gn_conv2_proj_kernel, H=H, W=W, C=C, npg=npg)
        specs += [pl.BlockSpec((1, HW, cin), lambda b, c: (b, 0, 0)),
                  pl.BlockSpec((cin, TC), lambda b, c: (0, c)),
                  pl.BlockSpec((1, TC), lambda b, c: (0, c))]
        args += [residue, pp["res_w"], pp["res_b"]]

    return pl.pallas_call(
        kern,
        out_shape=jax.ShapeDtypeStruct((N, HW, cout), jnp.float32),
        grid=(N, cout // TC),
        in_specs=specs,
        out_specs=pl.BlockSpec((1, HW, TC), lambda b, c: (b, 0, c)),
        scratch_shapes=[pltpu.VMEM((H + 2, W + 2, C), jnp.float32), col_sc],
        compiler_params=_compiler_params(),
    )(*args)


# ---------------------------------------------------------------------------
# Parameters: PyTorch layout init + one-time Pallas layout preparation
# ---------------------------------------------------------------------------
def init_params(key, cin, cout, n_time):
    ks = jax.random.split(key, 12)
    p = {
        "gn1_gamma": 1.0 + 0.1 * jax.random.normal(ks[0], (cin,), jnp.float32),
        "gn1_beta": 0.1 * jax.random.normal(ks[1], (cin,), jnp.float32),
        "conv1_w": 0.05 * jax.random.normal(ks[2], (cout, cin, 3, 3), jnp.float32),
        "conv1_b": 0.05 * jax.random.normal(ks[3], (cout,), jnp.float32),
        "lin_w": 0.05 * jax.random.normal(ks[4], (cout, n_time), jnp.float32),
        "lin_b": 0.05 * jax.random.normal(ks[5], (cout,), jnp.float32),
        "gn2_gamma": 1.0 + 0.1 * jax.random.normal(ks[6], (cout,), jnp.float32),
        "gn2_beta": 0.1 * jax.random.normal(ks[7], (cout,), jnp.float32),
        "conv2_w": 0.05 * jax.random.normal(ks[8], (cout, cout, 3, 3), jnp.float32),
        "conv2_b": 0.05 * jax.random.normal(ks[9], (cout,), jnp.float32),
    }
    if cin != cout:
        p["res_w"] = 0.05 * jax.random.normal(ks[10], (cout, cin, 1, 1), jnp.float32)
        p["res_b"] = 0.05 * jax.random.normal(ks[11], (cout,), jnp.float32)
    return p


def _group_maps(C, G=GROUPS):
    cg = C // G
    mcg = (jnp.arange(C)[:, None] // cg == jnp.arange(G)[None, :]).astype(jnp.float32)
    return mcg, mcg.T


def _conv_w_layout(w_oihw):
    """OIHW -> im2col-K-matched layout: (9*cin, cout) if cin%128==0 else (9,cin,cout)."""
    O, I, _, _ = w_oihw.shape
    w = jnp.transpose(w_oihw, (2, 3, 1, 0)).reshape(9, I, O)   # (tap, cin, cout)
    if _use_kconcat(I):
        w = w.reshape(9 * I, O)
    return w.astype(jnp.bfloat16)


def prepare_pallas_params(p, cin, cout):
    """One-time layout/dtype conversion (weights -> bf16, kernel-friendly shapes)."""
    mcg1, mgc1 = _group_maps(cin)
    mcg2, mgc2 = _group_maps(cout)
    pp = {
        "gn1_gamma": p["gn1_gamma"].reshape(1, cin),
        "gn1_beta": p["gn1_beta"].reshape(1, cin),
        "gn2_gamma": p["gn2_gamma"].reshape(1, cout),
        "gn2_beta": p["gn2_beta"].reshape(1, cout),
        "mcg1": mcg1, "mgc1": mgc1, "mcg2": mcg2, "mgc2": mgc2,
        "conv1_w": _conv_w_layout(p["conv1_w"]),
        "conv1_b": p["conv1_b"].reshape(1, cout),
        "conv2_w": _conv_w_layout(p["conv2_w"]),
        "conv2_b": p["conv2_b"].reshape(1, cout),
        "lin_w": p["lin_w"].T.astype(jnp.bfloat16),
        "lin_b": p["lin_b"].reshape(1, cout),
    }
    if cin != cout:
        pp["res_w"] = p["res_w"][:, :, 0, 0].T.astype(jnp.bfloat16)
        pp["res_b"] = p["res_b"].reshape(1, cout)
    return pp


# ---------------------------------------------------------------------------
# Forward
# ---------------------------------------------------------------------------
def pallas_forward(pp, feature, time, cin, cout, H, W):
    """feature: (N, cin, H, W) NCHW; time: (N, n_time). Returns NCHW f32."""
    N = feature.shape[0]
    HW = H * W
    x_nhwc = jnp.transpose(feature, (0, 2, 3, 1))          # (N, H, W, cin) f32
    x_flat = x_nhwc.reshape(N, HW, cin)                    # residual source (f32)
    time3 = time.reshape(N, 1, -1)

    # GN1 + SiLU + conv1 fused (bf16 output halves the intermediate HBM trip).
    h = _fused_gn_silu_conv1(x_nhwc, pp, H, W)             # (N, HW, cout) bf16

    # time-emb + GN2 + SiLU + conv2 + residual fused.
    out = _fused_gn_silu_conv2(h, time3, x_flat, pp, H, W,
                               identity=(cin == cout))     # (N, HW, cout) f32
    return jnp.transpose(out.reshape(N, H, W, cout), (0, 3, 1, 2))


# ---------------------------------------------------------------------------
# Pure-JAX f32 reference (mirrors the PyTorch forward)
# ---------------------------------------------------------------------------
def reference_forward(params, feature, time, cin, cout):
    def gn(x, gamma, beta, G=GROUPS, eps=EPS):
        N, C, H, W = x.shape
        xg = x.reshape(N, G, (C // G) * H * W)
        mean = xg.mean(axis=2, keepdims=True)
        var = xg.var(axis=2, keepdims=True)
        xn = ((xg - mean) / jnp.sqrt(var + eps)).reshape(N, C, H, W)
        return xn * gamma.reshape(1, C, 1, 1) + beta.reshape(1, C, 1, 1)

    def conv(x, w, b):
        y = jax.lax.conv_general_dilated(
            x, w, (1, 1), "SAME", dimension_numbers=("NCHW", "OIHW", "NCHW"))
        return y + b.reshape(1, -1, 1, 1)

    residue = feature
    h = jax.nn.silu(gn(feature, params["gn1_gamma"], params["gn1_beta"]))
    h = conv(h, params["conv1_w"], params["conv1_b"])
    t = jax.nn.silu(time) @ params["lin_w"].T + params["lin_b"]
    h = h + t[:, :, None, None]
    h = jax.nn.silu(gn(h, params["gn2_gamma"], params["gn2_beta"]))
    h = conv(h, params["conv2_w"], params["conv2_b"])
    if cin == cout:
        res = residue
    else:
        res = conv(residue, params["res_w"], params["res_b"])
    return h + res


# ---------------------------------------------------------------------------
if __name__ == "__main__":
    def run_case(case_key, cin, cout, N=2, H=16, W=16, n_time=128):
        kf, kt, kp = jax.random.split(case_key, 3)
        feature = jax.random.normal(kf, (N, cin, H, W), jnp.float32)   # NCHW
        time = jax.random.normal(kt, (N, n_time), jnp.float32)
        params = init_params(kp, cin, cout, n_time)
        pp = prepare_pallas_params(params, cin, cout)

        out = pallas_forward(pp, feature, time, cin, cout, H, W)
        out = jax.block_until_ready(out)
        assert out.shape == (N, cout, H, W)

        ref = reference_forward(params, feature, time, cin, cout)
        max_err = float(jnp.max(jnp.abs(out - ref)))
        scale = float(jnp.max(jnp.abs(ref)))
        tol = 3e-2 * max(1.0, scale)      # bf16 matmul operands / bf16 h, f32 acc
        if not max_err < tol:
            raise AssertionError(
                f"mismatch cin={cin} cout={cout}: max abs err {max_err} >= {tol}")

    root = jax.random.PRNGKey(0)
    k1, k2 = jax.random.split(root)
    run_case(k1, cin=128, cout=256)   # 1x1-projection residual, 2 cout tiles
    run_case(k2, cin=128, cout=128)   # identity residual path
    print("KERNEL_OK")
</pallas_src>

<mosaic_0001>
module attributes {stable_mosaic.version = 11 : i64} {
  func.func @_gn_conv1_kernel(%arg0: i32, %arg1: i32, %arg2: memref<1x16x16x128xf32, #tpu.memory_space<vmem>>, %arg3: memref<1x128xf32, #tpu.memory_space<vmem>>, %arg4: memref<1x128xf32, #tpu.memory_space<vmem>>, %arg5: memref<128x32xf32, #tpu.memory_space<vmem>>, %arg6: memref<32x128xf32, #tpu.memory_space<vmem>>, %arg7: memref<1152x128xbf16, #tpu.memory_space<vmem>>, %arg8: memref<1x128xf32, #tpu.memory_space<vmem>>, %arg9: memref<1x256x128xbf16, #tpu.memory_space<vmem>>, %arg10: memref<18x18x128xf32, #tpu.memory_space<vmem>>, %arg11: memref<256x1152xbf16, #tpu.memory_space<vmem>>) attributes {dimension_semantics = [#tpu.dimension_semantics<parallel>, #tpu.dimension_semantics<arbitrary>], iteration_bounds = array<i64: 2, 2>, scalar_prefetch = 0 : i64, scratch_operands = 2 : i64, tpu.core_type = #tpu.core_type<tc>, window_params = [{transform_indices = @transform_0, window_bounds = array<i64: 1, 16, 16, 128>}, {pipeline_mode = #tpu.pipeline_mode<synchronous>, transform_indices = @transform_1, window_bounds = array<i64: 1, 128>}, {pipeline_mode = #tpu.pipeline_mode<synchronous>, transform_indices = @transform_2, window_bounds = array<i64: 1, 128>}, {pipeline_mode = #tpu.pipeline_mode<synchronous>, transform_indices = @transform_3, window_bounds = array<i64: 128, 32>}, {pipeline_mode = #tpu.pipeline_mode<synchronous>, transform_indices = @transform_4, window_bounds = array<i64: 32, 128>}, {transform_indices = @transform_5, window_bounds = array<i64: 1152, 128>}, {transform_indices = @transform_6, window_bounds = array<i64: 1, 128>}, {transform_indices = @transform_7, window_bounds = array<i64: 1, 256, 128>}]} {
    %c0_i32 = arith.constant 0 : i32
    %0 = arith.cmpi eq, %arg1, %c0_i32 : i32
    %1 = arith.extui %0 : i1 to i32
    %c0_i32_0 = arith.constant 0 : i32
    %2 = arith.cmpi ne, %1, %c0_i32_0 : i32
    scf.if %2 {
      %c0_9 = arith.constant 0 : index
      %c0_10 = arith.constant 0 : index
      %c0_11 = arith.constant 0 : index
      %c0_12 = arith.constant 0 : index
      %13 = vector.load %arg2[%c0_9, %c0_10, %c0_11, %c0_12] : memref<1x16x16x128xf32, #tpu.memory_space<vmem>>, vector<1x16x16x128xf32>
      %14 = vector.shape_cast %13 : vector<1x16x16x128xf32> to vector<16x16x128xf32>
      %15 = vector.shape_cast %14 : vector<16x16x128xf32> to vector<256x128xf32>
      %c0_13 = arith.constant 0 : index
      %c0_14 = arith.constant 0 : index
      %16 = vector.load %arg3[%c0_13, %c0_14] : memref<1x128xf32, #tpu.memory_space<vmem>>, vector<1x128xf32>
      %c0_15 = arith.constant 0 : index
      %c0_16 = arith.constant 0 : index
      %17 = vector.load %arg4[%c0_15, %c0_16] : memref<1x128xf32, #tpu.memory_space<vmem>>, vector<1x128xf32>
      %c0_17 = arith.constant 0 : index
      %c0_18 = arith.constant 0 : index
      %18 = vector.load %arg5[%c0_17, %c0_18] : memref<128x32xf32, #tpu.memory_space<vmem>>, vector<128x32xf32>
      %c0_19 = arith.constant 0 : index
      %c0_20 = arith.constant 0 : index
      %19 = vector.load %arg6[%c0_19, %c0_20] : memref<32x128xf32, #tpu.memory_space<vmem>>, vector<32x128xf32>
      %cst_21 = arith.constant dense<0.000000e+00> : vector<128xf32>
      %20 = vector.multi_reduction <add>, %15, %cst_21 [0] : vector<256x128xf32> to vector<128xf32>
      %21 = vector.shape_cast %20 : vector<128xf32> to vector<1x128xf32>
      %cst_22 = arith.constant dense<0.000000e+00> : vector<1x32xf32>
      %22 = tpu.matmul %21, %18, %cst_22 {dimension_numbers = #tpu.dot_dimension_numbers<[1], [0], [0], [1], [0, 0, 1, 1], [], []>} : vector<1x128xf32>, vector<128x32xf32>, vector<1x32xf32> -> vector<1x32xf32>
      %cst_23 = arith.constant 1.024000e+03 : f32
      %23 = vector.broadcast %cst_23 : f32 to vector<1x32xf32>
      %24 = arith.divf %22, %23 : vector<1x32xf32>
      %cst_24 = arith.constant dense<0.000000e+00> : vector<1x128xf32>
      %25 = tpu.matmul %24, %19, %cst_24 {dimension_numbers = #tpu.dot_dimension_numbers<[1], [0], [0], [1], [0, 0, 1, 1], [], []>} : vector<1x32xf32>, vector<32x128xf32>, vector<1x128xf32> -> vector<1x128xf32>
      %26 = vector.broadcast %25 : vector<1x128xf32> to vector<256x128xf32>
      %27 = arith.subf %15, %26 : vector<256x128xf32>
      %28 = arith.mulf %27, %27 : vector<256x128xf32>
      %cst_25 = arith.constant dense<0.000000e+00> : vector<128xf32>
      %29 = vector.multi_reduction <add>, %28, %cst_25 [0] : vector<256x128xf32> to vector<128xf32>
      %30 = vector.shape_cast %29 : vector<128xf32> to vector<1x128xf32>
      %cst_26 = arith.constant dense<0.000000e+00> : vector<1x32xf32>
      %31 = tpu.matmul %30, %18, %cst_26 {dimension_numbers = #tpu.dot_dimension_numbers<[1], [0], [0], [1], [0, 0, 1, 1], [], []>} : vector<1x128xf32>, vector<128x32xf32>, vector<1x32xf32> -> vector<1x32xf32>
      %cst_27 = arith.constant 1.024000e+03 : f32
      %32 = vector.broadcast %cst_27 : f32 to vector<1x32xf32>
      %33 = arith.divf %31, %32 : vector<1x32xf32>
      %cst_28 = arith.constant 9.99999974E-6 : f32
      %34 = vector.broadcast %cst_28 : f32 to vector<1x32xf32>
      %35 = arith.addf %33, %34 : vector<1x32xf32>
      %36 = math.rsqrt %35 : vector<1x32xf32>
      %cst_29 = arith.constant dense<0.000000e+00> : vector<1x128xf32>
      %37 = tpu.matmul %36, %19, %cst_29 {dimension_numbers = #tpu.dot_dimension_numbers<[1], [0], [0], [1], [0, 0, 1, 1], [], []>} : vector<1x32xf32>, vector<32x128xf32>, vector<1x128xf32> -> vector<1x128xf32>
      %38 = vector.broadcast %37 : vector<1x128xf32> to vector<256x128xf32>
      %39 = arith.mulf %27, %38 : vector<256x128xf32>
      %40 = vector.broadcast %16 : vector<1x128xf32> to vector<256x128xf32>
      %41 = arith.mulf %39, %40 : vector<256x128xf32>
      %42 = vector.broadcast %17 : vector<1x128xf32> to vector<256x128xf32>
      %43 = arith.addf %41, %42 : vector<256x128xf32>
      %44 = arith.negf %43 : vector<256x128xf32>
      %45 = math.exp %44 : vector<256x128xf32>
      %cst_30 = arith.constant 1.000000e+00 : f32
      %46 = vector.broadcast %cst_30 : f32 to vector<256x128xf32>
      %47 = arith.addf %46, %45 : vector<256x128xf32>
      %48 = arith.divf %46, %47 : vector<256x128xf32>
      %49 = arith.mulf %43, %48 : vector<256x128xf32>
      %cst_31 = arith.constant 0.000000e+00 : f32
      %50 = vector.broadcast %cst_31 : f32 to vector<18x18x128xf32>
      %c0_32 = arith.constant 0 : index
      %c0_33 = arith.constant 0 : index
      %c0_34 = arith.constant 0 : index
      %51 = vector.load %arg10[%c0_32, %c0_33, %c0_34] : memref<18x18x128xf32, #tpu.memory_space<vmem>>, vector<18x18x128xf32>
      tpu.vector_store %arg10[%c0_32, %c0_33, %c0_34], %50 {strides = array<i32>} : memref<18x18x128xf32, #tpu.memory_space<vmem>>, vector<18x18x128xf32>,
      %52 = vector.shape_cast %49 : vector<256x128xf32> to vector<16x16x128xf32>
      %c1 = arith.constant 1 : index
      %c1_35 = arith.constant 1 : index
      %c0_36 = arith.constant 0 : index
      %53 = vector.load %arg10[%c1, %c1_35, %c0_36] : memref<18x18x128xf32, #tpu.memory_space<vmem>>, vector<16x16x128xf32>
      tpu.vector_store %arg10[%c1, %c1_35, %c0_36], %52 {strides = array<i32>} : memref<18x18x128xf32, #tpu.memory_space<vmem>>, vector<16x16x128xf32>,
      %c0_37 = arith.constant 0 : index
      %c0_38 = arith.constant 0 : index
      %c0_39 = arith.constant 0 : index
      %54 = vector.load %arg10[%c0_37, %c0_38, %c0_39] : memref<18x18x128xf32, #tpu.memory_space<vmem>>, vector<18x18x128xf32>
      %55 = vector.extract_strided_slice %54 {offsets = [0, 0, 0], sizes = [16, 16, 128], strides = [1, 1, 1]} : vector<18x18x128xf32> to vector<16x16x128xf32>
      %56 = vector.shape_cast %55 : vector<16x16x128xf32> to vector<256x128xf32>
      %57 = arith.truncf %56 : vector<256x128xf32> to vector<256x128xbf16>
      %c0_40 = arith.constant 0 : index
      %c0_41 = arith.constant 0 : index
      %58 = vector.load %arg11[%c0_40, %c0_41] : memref<256x1152xbf16, #tpu.memory_space<vmem>>, vector<256x128xbf16>
      tpu.vector_store %arg11[%c0_40, %c0_41], %57 {strides = array<i32>} : memref<256x1152xbf16, #tpu.memory_space<vmem>>, vector<256x128xbf16>,
      %59 = vector.extract_strided_slice %54 {offsets = [0, 1, 0], sizes = [16, 16, 128], strides = [1, 1, 1]} : vector<18x18x128xf32> to vector<16x16x128xf32>
      %60 = vector.shape_cast %59 : vector<16x16x128xf32> to vector<256x128xf32>
      %61 = arith.truncf %60 : vector<256x128xf32> to vector<256x128xbf16>
      %c0_42 = arith.constant 0 : index
      %c128 = arith.constant 128 : index
      %62 = vector.load %arg11[%c0_42, %c128] : memref<256x1152xbf16, #tpu.memory_space<vmem>>, vector<256x128xbf16>
      tpu.vector_store %arg11[%c0_42, %c128], %61 {strides = array<i32>} : memref<256x1152xbf16, #tpu.memory_space<vmem>>, vector<256x128xbf16>,
      %63 = vector.extract_strided_slice %54 {offsets = [0, 2, 0], sizes = [16, 16, 128], strides = [1, 1, 1]} : vector<18x18x128xf32> to vector<16x16x128xf32>
      %64 = vector.shape_cast %63 : vector<16x16x128xf32> to vector<256x128xf32>
      %65 = arith.truncf %64 : vector<256x128xf32> to vector<256x128xbf16>
      %c0_43 = arith.constant 0 : index
      %c256 = arith.constant 256 : index
      %66 = vector.load %arg11[%c0_43, %c256] : memref<256x1152xbf16, #tpu.memory_space<vmem>>, vector<256x128xbf16>
      tpu.vector_store %arg11[%c0_43, %c256], %65 {strides = array<i32>} : memref<256x1152xbf16, #tpu.memory_space<vmem>>, vector<256x128xbf16>,
      %67 = vector.extract_strided_slice %54 {offsets = [1, 0, 0], sizes = [16, 16, 128], strides = [1, 1, 1]} : vector<18x18x128xf32> to vector<16x16x128xf32>
      %68 = vector.shape_cast %67 : vector<16x16x128xf32> to vector<256x128xf32>
      %69 = arith.truncf %68 : vector<256x128xf32> to vector<256x128xbf16>
      %c0_44 = arith.constant 0 : index
      %c384 = arith.constant 384 : index
      %70 = vector.load %arg11[%c0_44, %c384] : memref<256x1152xbf16, #tpu.memory_space<vmem>>, vector<256x128xbf16>
      tpu.vector_store %arg11[%c0_44, %c384], %69 {strides = array<i32>} : memref<256x1152xbf16, #tpu.memory_space<vmem>>, vector<256x128xbf16>,
      %71 = vector.extract_strided_slice %54 {offsets = [1, 1, 0], sizes = [16, 16, 128], strides = [1, 1, 1]} : vector<18x18x128xf32> to vector<16x16x128xf32>
      %72 = vector.shape_cast %71 : vector<16x16x128xf32> to vector<256x128xf32>
      %73 = arith.truncf %72 : vector<256x128xf32> to vector<256x128xbf16>
      %c0_45 = arith.constant 0 : index
      %c512 = arith.constant 512 : index
      %74 = vector.load %arg11[%c0_45, %c512] : memref<256x1152xbf16, #tpu.memory_space<vmem>>, vector<256x128xbf16>
      tpu.vector_store %arg11[%c0_45, %c512], %73 {strides = array<i32>} : memref<256x1152xbf16, #tpu.memory_space<vmem>>, vector<256x128xbf16>,
      %75 = vector.extract_strided_slice %54 {offsets = [1, 2, 0], sizes = [16, 16, 128], strides = [1, 1, 1]} : vector<18x18x128xf32> to vector<16x16x128xf32>
      %76 = vector.shape_cast %75 : vector<16x16x128xf32> to vector<256x128xf32>
      %77 = arith.truncf %76 : vector<256x128xf32> to vector<256x128xbf16>
      %c0_46 = arith.constant 0 : index
      %c640 = arith.constant 640 : index
      %78 = vector.load %arg11[%c0_46, %c640] : memref<256x1152xbf16, #tpu.memory_space<vmem>>, vector<256x128xbf16>
      tpu.vector_store %arg11[%c0_46, %c640], %77 {strides = array<i32>} : memref<256x1152xbf16, #tpu.memory_space<vmem>>, vector<256x128xbf16>,
      %79 = vector.extract_strided_slice %54 {offsets = [2, 0, 0], sizes = [16, 16, 128], strides = [1, 1, 1]} : vector<18x18x128xf32> to vector<16x16x128xf32>
      %80 = vector.shape_cast %79 : vector<16x16x128xf32> to vector<256x128xf32>
      %81 = arith.truncf %80 : vector<256x128xf32> to vector<256x128xbf16>
      %c0_47 = arith.constant 0 : index
      %c768 = arith.constant 768 : index
      %82 = vector.load %arg11[%c0_47, %c768] : memref<256x1152xbf16, #tpu.memory_space<vmem>>, vector<256x128xbf16>
      tpu.vector_store %arg11[%c0_47, %c768], %81 {strides = array<i32>} : memref<256x1152xbf16, #tpu.memory_space<vmem>>, vector<256x128xbf16>,
      %83 = vector.extract_strided_slice %54 {offsets = [2, 1, 0], sizes = [16, 16, 128], strides = [1, 1, 1]} : vector<18x18x128xf32> to vector<16x16x128xf32>
      %84 = vector.shape_cast %83 : vector<16x16x128xf32> to vector<256x128xf32>
      %85 = arith.truncf %84 : vector<256x128xf32> to vector<256x128xbf16>
      %c0_48 = arith.constant 0 : index
      %c896 = arith.constant 896 : index
      %86 = vector.load %arg11[%c0_48, %c896] : memref<256x1152xbf16, #tpu.memory_space<vmem>>, vector<256x128xbf16>
      tpu.vector_store %arg11[%c0_48, %c896], %85 {strides = array<i32>} : memref<256x1152xbf16, #tpu.memory_space<vmem>>, vector<256x128xbf16>,
      %87 = vector.extract_strided_slice %54 {offsets = [2, 2, 0], sizes = [16, 16, 128], strides = [1, 1, 1]} : vector<18x18x128xf32> to vector<16x16x128xf32>
      %88 = vector.shape_cast %87 : vector<16x16x128xf32> to vector<256x128xf32>
      %89 = arith.truncf %88 : vector<256x128xf32> to vector<256x128xbf16>
      %c0_49 = arith.constant 0 : index
      %c1024 = arith.constant 1024 : index
      %90 = vector.load %arg11[%c0_49, %c1024] : memref<256x1152xbf16, #tpu.memory_space<vmem>>, vector<256x128xbf16>
      tpu.vector_store %arg11[%c0_49, %c1024], %89 {strides = array<i32>} : memref<256x1152xbf16, #tpu.memory_space<vmem>>, vector<256x128xbf16>,
    } else {
    }
    %c0 = arith.constant 0 : index
    %c0_1 = arith.constant 0 : index
    %3 = vector.load %arg11[%c0, %c0_1] : memref<256x1152xbf16, #tpu.memory_space<vmem>>, vector<256x1152xbf16>
    %c0_2 = arith.constant 0 : index
    %c0_3 = arith.constant 0 : index
    %4 = vector.load %arg7[%c0_2, %c0_3] : memref<1152x128xbf16, #tpu.memory_space<vmem>>, vector<1152x128xbf16>
    %cst = arith.constant dense<0.000000e+00> : vector<256x128xf32>
    %5 = tpu.matmul %3, %4, %cst {dimension_numbers = #tpu.dot_dimension_numbers<[1], [0], [0], [1], [0, 0, 1, 1], [], []>} : vector<256x1152xbf16>, vector<1152x128xbf16>, vector<256x128xf32> -> vector<256x128xf32>
    %c0_4 = arith.constant 0 : index
    %c0_5 = arith.constant 0 : index
    %6 = vector.load %arg8[%c0_4, %c0_5] : memref<1x128xf32, #tpu.memory_space<vmem>>, vector<1x128xf32>
    %7 = vector.broadcast %6 : vector<1x128xf32> to vector<256x128xf32>
    %8 = arith.addf %5, %7 : vector<256x128xf32>
    %9 = arith.truncf %8 : vector<256x128xf32> to vector<256x128xbf16>
    %c0_6 = arith.constant 0 : index
    %c0_7 = arith.constant 0 : index
    %c0_8 = arith.constant 0 : index
    %10 = vector.load %arg9[%c0_6, %c0_7, %c0_8] : memref<1x256x128xbf16, #tpu.memory_space<vmem>>, vector<1x256x128xbf16>
    %11 = vector.shape_cast %10 : vector<1x256x128xbf16> to vector<256x128xbf16>
    %12 = vector.shape_cast %9 : vector<256x128xbf16> to vector<1x256x128xbf16>
    tpu.vector_store %arg9[%c0_6, %c0_7, %c0_8], %12 {strides = array<i32>} : memref<1x256x128xbf16, #tpu.memory_space<vmem>>, vector<1x256x128xbf16>,
    return
  }
  func.func @transform_0(%arg0: i32, %arg1: i32) -> (i32, i32, i32, i32) {
    %c0_i32 = arith.constant 0 : i32
    %c0_i32_0 = arith.constant 0 : i32
    %c0_i32_1 = arith.constant 0 : i32
    %c0_i32_2 = arith.constant 0 : i32
    return %arg0, %c0_i32, %c0_i32_0, %c0_i32_1 : i32, i32, i32, i32
  }
  func.func @transform_1(%arg0: i32, %arg1: i32) -> (i32, i32) {
    %c0_i32 = arith.constant 0 : i32
    %c0_i32_0 = arith.constant 0 : i32
    %c0_i32_1 = arith.constant 0 : i32
    return %c0_i32, %c0_i32_0 : i32, i32
  }
  func.func @transform_2(%arg0: i32, %arg1: i32) -> (i32, i32) {
    %c0_i32 = arith.constant 0 : i32
    %c0_i32_0 = arith.constant 0 : i32
    %c0_i32_1 = arith.constant 0 : i32
    return %c0_i32, %c0_i32_0 : i32, i32
  }
  func.func @transform_3(%arg0: i32, %arg1: i32) -> (i32, i32) {
    %c0_i32 = arith.constant 0 : i32
    %c0_i32_0 = arith.constant 0 : i32
    %c0_i32_1 = arith.constant 0 : i32
    return %c0_i32, %c0_i32_0 : i32, i32
  }
  func.func @transform_4(%arg0: i32, %arg1: i32) -> (i32, i32) {
    %c0_i32 = arith.constant 0 : i32
    %c0_i32_0 = arith.constant 0 : i32
    %c0_i32_1 = arith.constant 0 : i32
    return %c0_i32, %c0_i32_0 : i32, i32
  }
  func.func @transform_5(%arg0: i32, %arg1: i32) -> (i32, i32) {
    %c0_i32 = arith.constant 0 : i32
    %c0_i32_0 = arith.constant 0 : i32
    return %c0_i32, %arg1 : i32, i32
  }
  func.func @transform_6(%arg0: i32, %arg1: i32) -> (i32, i32) {
    %c0_i32 = arith.constant 0 : i32
    %c0_i32_0 = arith.constant 0 : i32
    return %c0_i32, %arg1 : i32, i32
  }
  func.func @transform_7(%arg0: i32, %arg1: i32) -> (i32, i32, i32) {
    %c0_i32 = arith.constant 0 : i32
    %c0_i32_0 = arith.constant 0 : i32
    return %arg0, %c0_i32, %arg1 : i32, i32, i32
  }
}

</mosaic_0001>

<bundles_post_ra>
// kernel: tpu_custom_call.1
= control target key start
LH: loop header
LB: loop body
LE: loop exit
PB: predicated region body
PF: predicated region fallthrough
CT: control target
= control target key end

     0   :  { %s7277_s0 = inlined_call_operand.hbm [shape: f32[2,16,16,128], index: 0, kind: input, shape index: {}]   ;;  %s7278_s1 = inlined_call_operand.vmem [shape: f32[1,128], index: 1, kind: input, shape index: {}]   ;;  %s7279_s2 = inlined_call_operand.vmem [shape: f32[1,128], index: 2, kind: input, shape index: {}]   ;;  %s7280_s3 = inlined_call_operand.vmem [shape: f32[128,32], index: 3, kind: input, shape index: {}]   ;;  %s7281_s4 = inlined_call_operand.vmem [shape: f32[32,128], index: 4, kind: input, shape index: {}]   ;;  %s7282_s5 = inlined_call_operand.hbm [shape: bf16[1152,256], index: 5, kind: input, shape index: {}]   ;;  %s7283_s6 = inlined_call_operand.vmem [shape: f32[1,256], index: 6, kind: input, shape index: {}]   ;;  %s7284_s7 = inlined_call_operand.hbm [shape: bf16[2,256,256], index: 7, kind: output, shape index: {}]  }
   0x1   :  { %7326 = sst [smem:[#allocation41_spill]] %s7277_s0 }
   0x2   :  { %7327 = sst [smem:[#allocation42_spill]] %s7278_s1 }
   0x3   :  { %7328 = sst [smem:[#allocation43_spill]] %s7279_s2 }
   0x4   :  { %7329 = sst [smem:[#allocation44_spill]] %s7280_s3 }
   0x5   :  { %7330 = sst [smem:[#allocation45_spill]] %s7281_s4 }
   0x6   :  { %7331 = sst [smem:[#allocation46_spill]] %s7284_s7 }
   0x7   :  { %12 = vsyncpa [#allocation5], 0 }
   0x8   :  { %14 = vsyncpa [#allocation5 + $0x1], 0 }
   0x9   :  { %15 = vsyncpa [#allocation8], 0 }
   0xa   :  { %17 = vsyncpa [#allocation8 + $0x1], 0 }
   0xb   :  { %18 = vsyncpa [#allocation6], 0 }
   0xc   :  { %20 = vsyncpa [#allocation6 + $0x1], 0  ;;  %s5293_s24 = smov 0   ;;  %s5295_s25 = smov 0  }
   0xd   :  { %s5297_s26 = smov 0   ;;  %s5299_s27 = smov 0  }
   0xe   :  { %s5301_s28 = smov 0   ;;  %s5303_s29 = smov 0  }
   0xf   :  { %s5305_s30 = smov 0   ;;  %s5307_s8 = smov 0  }
  0x10   :  { %s5309_s9 = smov 0   ;;  %s5311_s10 = smov 0  }
  0x11   :  { %s5313_s11 = smov 0   ;;  %s5315_s12 = smov 0  }
  0x12   :  { %s5317_s13 = smov 0   ;;  %s5319_s14 = smov 0  }
  0x13 LB: > { %7332 = sst [smem:[#allocation13_spill]] %s5226_s11  ;;  %s3665_s15 = sadd.s32 4294967295, %s5238_s14   ;;  %s5238_s14 = sphi %s5319_s14, %s26_s14   ;;  %s5234_s13 = sphi %s5317_s13, %s7426_s13   ;;  %s5230_s12 = sphi %s5315_s12, %s7438_s12   ;;  %s5226_s11 = sphi %s5313_s11, %s7424_s11   ;;  %s5222_s10 = sphi %s5311_s10, %s7437_s10   ;;  %s5218_s9 = sphi %s5309_s9, %s7436_s9   ;;  %s5214_s8 = sphi %s5307_s8, %s7435_s8   ;;  %s5210_s30 = sphi %s5305_s30, %s7434_s30   ;;  %s5206_s29 = sphi %s5303_s29, %s7433_s29   ;;  %s5202_s28 = sphi %s5301_s28, %s7432_s28   ;;  %s5198_s27 = sphi %s5299_s27, %s7431_s27   ;;  %s5194_s26 = sphi %s5297_s26, %s7430_s26   ;;  %s5190_s25 = sphi %s5295_s25, %s7429_s25   ;;  %s5186_s24 = sphi %s5293_s24, %s7428_s24  }
  0x14   : > { %7333 = sst [smem:[#allocation14_spill]] %s5234_s13  ;;  %p52_p0 = scmp.ne.s32.totalorder %s5218_s9, %s5214_s8 }
  0x15   : > { %p7287_p1 = scmp.eq.s32.totalorder %s5238_s14, 0  ;;  %p58_p2 = scmp.ne.s32.totalorder %s5214_s8, %s5210_s30 }
  0x16   : > { %p5368_p3 = scmp.eq.s32.totalorder %s3665_s15, 0  ;;  %p5372_p4 = scmp.eq.s32.totalorder %s3665_s15, 3 }
  0x17   : > { %p54_p5 = por %p7287_p1, %p52_p0  ;;  %p7286_p7 = scmp.lt.s32.totalorder %s5238_s14, 4 }
  0x18   : > { %s7335_s19 = scalar_select %p5372_p4, 1, 0 }
  0x19   : > { %p5380_p6 = por %p5368_p3, %p58_p2  ;;  %s258_s21 = sand.u32 1, %s5218_s9  }
  0x1a   : > { %s3823_s22 = sshll.u32 %s5234_s13, 12  ;;  %s3669_s23 = sshll.u32 %s258_s21, 8 }
  0x1b   : > { %s7336_s20 = scalar_select %p5380_p6, 1, 0 }
  0x1c   : > { %s7337_s0 = sld [smem:[#allocation41_spill]]  ;;  %s262_s15 = scalar_lea.vmem [#allocation4], %s3669_s23 }
  0x1d   : > { %s269_s7 = sshll.u32 %s262_s15, 4  ;;  %p5394_p8 = pnand %p7286_p7, %p54_p5  ;;  %s5398_s7 = int_to_ptr.vmem [resolvable:$true] %s269_s7 }
  0x1e   : > { %s5400_s2 = scalar_lea.sflag [#allocation5], %s258_s21 }
  0x1f   : > { %p5030_p10 = pneg %p5394_p8 }
  0x22   : > { %s5390_s16 = scalar_lea.hbm %s7337_s0, %s3823_s22  ;;  %s5033_s30 = scalar_lea.hbm %s7337_s0, 8192 }
  0x23   : > { %s5028_s17 = scalar_lea.hbm %s5390_s16, 4096  ;;  %p5034_p13 = scmp.lt.u32.totalorder %s5390_s16, %s7337_s0 }
  0x24   : > { %p5029_p9 = scmp.ne.s32.totalorder %s5390_s16, %s5028_s17  ;;  %p5035_p0 = scmp.lt.u32.totalorder %s5033_s30, %s5028_s17 }
  0x25   : > { %p5037_p5 = scmp.lt.u32.totalorder %s5028_s17, %s5390_s16 }
  0x26   : > { %p5031_p11 = pnand %p5030_p10, %p5029_p9  ;;  %p5036_p2 = por %p5035_p0, %p5034_p13 }
  0x28   : > { %p5032_p12 = pneg %p5031_p11  ;;  %p5038_p7 = por %p5037_p5, %p5036_p2 }
  0x2a   : > { %p5039_p1 = pnand %p5038_p7, %p5032_p12 }
  0x2c   : > { %5042 = shalt.err (!%p5039_p1)
}
  0x2d   : > { %s5043_s21 = scalar_lea.vmem %s5398_s7, 4096  ;;  %s5240_s22 = smov [#allocation4]  }
  0x2e   : > { %p5044_p9 = scmp.ne.s32.totalorder %s5398_s7, %s5043_s21  ;;  %s5048_s23 = sshll.u32 %s5240_s22, 4  ;;  %s5049_s23 = int_to_ptr.vmem [resolvable:$false] %s5048_s23 }
  0x2f   : > { %s5050_s1 = scalar_lea.vmem %s5049_s23, 8192  ;;  %p5051_p4 = scmp.lt.s32.totalorder %s5398_s7, %s5049_s23 }
  0x30   : > { %p5046_p11 = pnand %p5044_p9, %p5030_p10  ;;  %p5052_p13 = scmp.lt.s32.totalorder %s5050_s1, %s5043_s21 }
  0x32   : > { %p5047_p6 = pneg %p5046_p11  ;;  %p5053_p0 = por %p5052_p13, %p5051_p4 }
  0x34   : > { %p5054_p2 = pnand %p5053_p0, %p5047_p6 }
  0x36   : > { %5057 = shalt.err (!%p5054_p2)
}
  0x37   : > { %s7289_s17 = smov 128   ;;  %s5242_s30 = smov 8  }
  0x38   : > { %4694 = dma.hbm_to_vmem [thread:$0]  (!%p5394_p8), %s5390_s16, 4096, %s5398_s7, %s5400_s2, %s7289_s17, %s7289_s17, %s5242_s30  }
  0x39   : > { %p3673_p1 = scmp.ge.s32.totalorder %s5238_s14, 1  ;;  %p303_p4 = scmp.lt.s32.totalorder %s5238_s14, 5 }
  0x3a   : > { %s3666_s21 = sadd.s32 4294967294, %s5238_s14   ;;  %s35_s22 = sadd.s32 1, %s5230_s12 }
  0x3b   : > { %p5432_p6 = pnand %p3673_p1, %p303_p4  ;;  %s155_s23 = sadd.s32 1, %s5206_s29 }
  0x3c   : > { %p36_p7 = scmp.ge.s32.totalorder %s35_s22, 2  ;;  %p162_p10 = scmp.ne.s32.totalorder %s5206_s29, %s5202_s28 }
  0x3d   : > { %p168_p12 = scmp.ne.s32.totalorder %s5202_s28, %s5198_s27  ;;  %s209_s11 = sadd.s32 1, %s5194_s26 }
  0x3e   : > { %s7440_s22 = smov (%p36_p7, %s35_s22), 0  ;;  %s7341_s2 = sadd.s32 1, %s5234_s13 }
  0x3f   : > { %7340 = sst [smem:[#allocation15_spill]] %s7440_s22  ;;  %s7442_s2 = smov (!%p36_p7, %s7341_s2), %s5234_s13 }
  0x40   : > { %s152_s7 = ssub.s32 %s5230_s12, %s7440_s22  ;;  %p7342_p8 = scmp.eq.s32.totalorder %s5238_s14, 0 }
  0x41   : > { %p40_p9 = scmp.ge.s32.totalorder %s7442_s2, 2  ;;  %p153_p11 = scmp.eq.s32.totalorder %s152_s7, 0 }
  0x42   : > { %p5453_p5 = por %p162_p10, %p7342_p8  ;;  %p5459_p13 = por %p168_p12, %p5368_p3 }
  0x43   : > { %p219_p0 = scmp.ne.s32.totalorder %s5194_s26, %s5190_s25  ;;  %s7444_s2 = smov (%p40_p9, %s7442_s2), 0 }
  0x44   : > { %s7344_s27 = scalar_select %p5459_p13, 1, 0 }
  0x45   : > { %7345 = sst [smem:[#allocation16_spill]] %s7444_s2  ;;  %s42_s30 = ssub.s32 %s5234_s13, %s7444_s2 }
  0x46   : > { %s5468_s1 = scalar_select %p153_p11, %s5206_s29, %s155_s23  }
  0x47   : > { %p7347_p2 = scmp.ne.s32.totalorder %s7335_s19, 0  ;;  %p43_p4 = scmp.eq.s32.totalorder %s42_s30, 0 }
  0x48   : > { %7346 = sst [smem:[#allocation17_spill]] %s5468_s1  ;;  %s206_s18 = sor.u32 %s152_s7, %s42_s30 }
  0x49   : > { %p5474_p1 = por %p7347_p2, %p219_p0  ;;  %p207_p3 = scmp.eq.s32.totalorder %s206_s18, 0 }
  0x4a   : > { %p225_p7 = scmp.ne.s32.totalorder %s5190_s25, %s5186_s24  ;;  %s7350_s0 = sadd.s32 1, %s5218_s9 }
  0x4b   : > { %s7348_s17 = scalar_select %p5474_p1, 1, 0 }
  0x4c   : > { %s5483_s22 = scalar_select %p43_p4, %s5218_s9, %s7350_s0  }
  0x4d   : > { %7349 = sst [smem:[#allocation18_spill]] %s7348_s17  ;;  %p226_p10 = scmp.eq.s32.totalorder %s3666_s21, 3 }
  0x4e   : > { %s5486_s4 = scalar_select %p207_p3, %s5194_s26, %s209_s11  }
  0x4f   : > { %s279_s23 = sand.u32 1, %s5206_s29   ;;  %p5489_p12 = por %p226_p10, %p225_p7 }
  0x50   : > { %s4683_s1 = smul.u32 576, %s279_s23  ;;  %s3672_s2 = sshll.u32 %s5230_s12, 6 }
  0x51   : > { %s7351_s19 = scalar_select %p5489_p12, 1, 0 }
  0x52   : > { %s5497_s17 = scalar_lea.hbm %s7282_s5, %s3672_s2  ;;  %s283_s0 = scalar_lea.vmem [#allocation7], %s4683_s1 }
  0x53   : > { %s289_s11 = sshll.u32 %s283_s0, 4  ;;  %p7352_p8 = scmp.lt.s32.totalorder %s5238_s14, 4  ;;  %s5507_s11 = int_to_ptr.vmem [resolvable:$true] %s289_s11 }
  0x54   : > { %s5509_s7 = scalar_lea.sflag [#allocation8], %s279_s23  ;;  %s5058_s3 = scalar_lea.hbm %s5497_s17, 9216 }
  0x55   : > { %p5503_p9 = pnand %p7352_p8, %p5453_p5  ;;  %p5059_p11 = scmp.ne.s32.totalorder %s5497_s17, %s5058_s3 }
  0x56   : > { %s5063_s16 = scalar_lea.hbm %s7282_s5, 18432  ;;  %p5064_p5 = scmp.lt.u32.totalorder %s5497_s17, %s7282_s5 }
  0x57   : > { %p5060_p0 = pneg %p5503_p9  ;;  %p5065_p3 = scmp.lt.u32.totalorder %s5063_s16, %s5058_s3 }
  0x58   : > { %p5067_p10 = scmp.lt.u32.totalorder %s5058_s3, %s5497_s17 }
  0x59   : > { %p5061_p2 = pnand %p5060_p0, %p5059_p11  ;;  %p5066_p7 = por %p5065_p3, %p5064_p5 }
  0x5b   : > { %p5062_p4 = pneg %p5061_p2  ;;  %p5068_p8 = por %p5067_p10, %p5066_p7 }
  0x5d   : > { %p5069_p12 = pnand %p5068_p8, %p5062_p4 }
  0x5f   : > { %5072 = shalt.err (!%p5069_p12)
}
  0x60   : > { %s5073_s18 = scalar_lea.vmem %s5507_s11, 9216  ;;  %s5243_s23 = smov [#allocation7]  }
  0x61   : > { %p5074_p11 = scmp.ne.s32.totalorder %s5507_s11, %s5073_s18  ;;  %s5078_s0 = sshll.u32 %s5243_s23, 4  ;;  %s5079_s0 = int_to_ptr.vmem [resolvable:$false] %s5078_s0 }
  0x62   : > { %s5080_s13 = scalar_lea.vmem %s5079_s0, 18432  ;;  %p5081_p13 = scmp.lt.s32.totalorder %s5507_s11, %s5079_s0 }
  0x63   : > { %p5076_p2 = pnand %p5074_p11, %p5060_p0  ;;  %p5082_p5 = scmp.lt.s32.totalorder %s5080_s13, %s5073_s18 }
  0x65   : > { %p5077_p1 = pneg %p5076_p2  ;;  %p5083_p3 = por %p5082_p5, %p5081_p13 }
  0x67   : > { %p5084_p7 = pnand %p5083_p3, %p5077_p1 }
  0x69   : > { %5087 = shalt.err (!%p5084_p7)
}
  0x6a   : > { %s5244_s3 = smov 64   ;;  %s5245_s2 = smov 4  }
  0x6b   : > { %s7354_s16 = smov 128   ;;  %307 = sbr.rel (%p5432_p6) target bundleno = 1869 (0x74d), region = 48 }
  0x6c   : > { %4697 = dma.hbm_to_vmem [thread:$0]  (!%p5503_p9), %s5497_s17, 9216, %s5507_s11, %s5509_s7, %s7354_s16, %s5244_s3, %s5245_s2  }
  0x6d   : > { %s309_s1 = sand.u32 (!%p5432_p6), 1, %s5214_s8   ;;  %p7355_p13 = scmp.ne.s32.totalorder (!%p5432_p6), %s7336_s20, 0 }
  0x6e   : > { %s3674_s30 = sshll.u32 (!%p5432_p6), %s309_s1, 8  ;;  %s310_s18 = scalar_lea.sflag (!%p5432_p6), [#allocation5], %s309_s1 }
  0x6f   : > { %s5541_s23 = scalar_lea.vmem (!%p5432_p6), [#allocation4], %s3674_s30 }
  0x72   : > { %5173 = dma.done.wait (%p7355_p13), %s310_s18, 4096  }
  0x73   : > { %5175 = vsyncadd (%p7355_p13), %s310_s18, 4294963200  ;;  %s318_s21 = sand.u32 1, %s5202_s28   ;;  %p7356_p6 = scmp.ne.s32.totalorder %s7344_s27, 0 }
  0x74   : > { %s4684_s0 = smul.u32 576, %s318_s21  ;;  %s319_s17 = scalar_lea.sflag [#allocation8], %s318_s21 }
  0x76   : > { %s5548_s11 = scalar_lea.vmem [#allocation7], %s4684_s0 }
  0x77   : > { %5177 = dma.done.wait (%p7356_p6), %s319_s17, 9216  }
  0x78   : > { %5179 = vsyncadd (%p7356_p6), %s319_s17, 4294958080  ;;  %s7299_s15 = sand.u32 1, %s5190_s25   ;;  %p361_p1 = scmp.lt.s32.totalorder %s5222_s10, 1 }
  0x79   : > { %s3675_s20 = sshll.u32 %s7299_s15, 7  ;;  %p3676_p12 = scmp.ne.s32.totalorder %s5222_s10, 0 }
  0x7a   : > { %s5559_s7 = scalar_select %p361_p1, %s5222_s10, 1 }
  0x7b   : > { %s5565_s16 = scalar_lea.vmem [#allocation9], %s3675_s20  ;;  %368 = sbr.rel (%p3676_p12) target bundleno = 1317 (0x525), region = 60 }
  0x7c   : > { %s363_s2 = scalar_lea.vmem %s7283_s6, %s5559_s7 }
  0x82   : > { %s7357_s30 = sld [smem:[#allocation44_spill]]  ;;  %v5246_v3 = vmov 0.0|0.0   ;;  %vm5247_vm0 = vmmov 0   ;;  %v5248_v6 = vmov 0.0   ;;  %v5649_v10 = vld [vmem:[%s5541_s23] sm:$0xff]  ;;  %v5652_v11 = vld [vmem:[%s5541_s23 + $0x8] sm:$0xff] }
  0x83   : > { %4607 = vmatprep.subr.bf16.mxu0 %v5246_v3  ;;  %4499 = vmatprep.mubr.msk.f32.mxu0 %vm5247_vm0, %v5248_v6  ;;  %1195 = vst [vmem:[#allocation2 + $0x10] sm:$0x3] %v5248_v6  ;;  %1196 = vst [vmem:[#allocation2 + $0x18] sm:$0xff] %v5248_v6  ;;  %v5655_v12 = vld [vmem:[%s5541_s23 + $0x10] sm:$0xff]  ;;  %v423_v13 = vadd.f32 %v5652_v11, %v5649_v10  ;;  %v5663_v15 = vld [vmem:[%s5541_s23 + $0x18] sm:$0xff]  ;;  %s7359_s20 = sld [smem:[#allocation45_spill]] }
  0x84   : > { %1197 = vst [vmem:[#allocation2 + $0x20] sm:$0xff] %v5248_v6  ;;  %1198 = vst [vmem:[#allocation2 + $0x28] sm:$0x3] %v5248_v6  ;;  %4631 = vmatprep.subr.bf16.mxu1 %v5246_v3  ;;  %4510 = vmatprep.mubr.msk.f32.mxu1 %vm5247_vm0, %v5248_v6  ;;  %v5674_v19 = vld [vmem:[%s5541_s23 + $0x20] sm:$0xff]  ;;  %v5681_v22 = vld [vmem:[%s5541_s23 + $0x28] sm:$0xff]  ;;  %vm532_vm1 = vcmask 261120  }
  0x85   : > { %1199 = vst [vmem:[#allocation2 + $0x30] sm:$0xff] %v5248_v6  ;;  %1200 = vst [vmem:[#allocation2 + $0x38] sm:$0xff] %v5248_v6  ;;  %v424_v18 = vadd.f32 %v423_v13, %v5655_v12  ;;  %v5692_v26 = vld [vmem:[%s5541_s23 + $0x30] sm:$0xff]  ;;  %v5702_v30 = vld [vmem:[%s5541_s23 + $0x38] sm:$0xff]  ;;  %s7360_s21 = sld [smem:[#allocation42_spill]]  ;;  %s7361_s13 = sld [smem:[#allocation43_spill]] }
  0x86   : > { %1201 = vst [vmem:[#allocation2 + $0x40] sm:$0x3] %v5248_v6  ;;  %1202 = vst [vmem:[#allocation2 + $0x48] sm:$0xff] %v5248_v6  ;;  %v5716_v35 = vld [vmem:[%s5541_s23 + $0x40] sm:$0xff]  ;;  %v5725_v39 = vld [vmem:[%s5541_s23 + $0x48] sm:$0xff]  ;;  %vm1414_vm2 = vcmask 1046528  }
  0x87   : > { %1203 = vst [vmem:[#allocation2 + $0x50] sm:$0xff] %v5248_v6  ;;  %1204 = vst [vmem:[#allocation2 + $0x58] sm:$0x3] %v5248_v6  ;;  %v425_v20 = vadd.f32 %v424_v18, %v5663_v15  ;;  %v5738_v43 = vld [vmem:[%s5541_s23 + $0x50] sm:$0xff]  ;;  %v5745_v46 = vld [vmem:[%s5541_s23 + $0x58] sm:$0xff]  ;;  %vm1559_vm3 = vcmask 1045504  }
  0x88   : > { %s7358_s18 = smov %s7357_s30  ;;  %v403_v0 = vld [vmem:[%s7357_s30] sm:$0xff]  ;;  %1205 = vst [vmem:[#allocation2 + $0x60] sm:$0xff] %v5248_v6  ;;  %1206 = vst [vmem:[#allocation2 + $0x68] sm:$0xff] %v5248_v6  ;;  %v5756_v50 = vld [vmem:[%s5541_s23 + $0x60] sm:$0xff] }
  0x89   : > { %v404_v1 = vld [vmem:[%s7358_s18 + $0x8] sm:$0xff]  ;;  %v405_v2 = vld [vmem:[%s7358_s18 + $0x10] sm:$0xff]  ;;  %v406_v5 = vld [vmem:[%s7358_s18 + $0x18] sm:$0xff]  ;;  %1207 = vst [vmem:[#allocation2 + $0x70] sm:$0x3] %v5248_v6  ;;  %v426_v25 = vadd.f32 %v425_v20, %v5674_v19 }
  0x8a   : > { %v5578_v4 = vpack.c.bf16 %v404_v1, %v403_v0  ;;  %1208 = vst [vmem:[#allocation2 + $0x78] sm:$0xff] %v5248_v6  ;;  %1209 = vst [vmem:[#allocation2 + $0x80] sm:$0xff] %v5248_v6  ;;  %v5639_v7 = vpack.c.bf16 %v406_v5, %v405_v2  ;;  %v407_v8 = vld [vmem:[%s7358_s18 + $0x20] sm:$0xff]  ;;  %v408_v9 = vld [vmem:[%s7358_s18 + $0x28] sm:$0xff] }
  0x8b   : > { %1210 = vst [vmem:[#allocation2 + $0x88] sm:$0x3] %v5248_v6  ;;  %1211 = vst [vmem:[#allocation2 + $0x90] sm:$0xff] %v5248_v6  ;;  %v5660_v14 = vpack.c.bf16 %v408_v9, %v407_v8  ;;  %v409_v16 = vld [vmem:[%s7358_s18 + $0x30] sm:$0xff]  ;;  %v410_v17 = vld [vmem:[%s7358_s18 + $0x38] sm:$0xff]  ;;  %v427_v27 = vadd.f32 %v426_v25, %v5681_v22 }
  0x8c   : > { %1212 = vst [vmem:[#allocation2 + $0x98] sm:$0xff] %v5248_v6  ;;  %1213 = vst [vmem:[#allocation2 + $0xa0] sm:$0x3] %v5248_v6  ;;  %4609 = vmatpush3.bf16.msra.mxu0 %v5578_v4  ;;  %v5678_v21 = vpack.c.bf16 %v410_v17, %v409_v16  ;;  %v411_v23 = vld [vmem:[%s7358_s18 + $0x40] sm:$0xff]  ;;  %v412_v24 = vld [vmem:[%s7358_s18 + $0x48] sm:$0xff] }
  0x8d   : > { %1214 = vst [vmem:[#allocation2 + $0xa8] sm:$0xff] %v5248_v6  ;;  %1215 = vst [vmem:[#allocation2 + $0xb0] sm:$0xff] %v5248_v6  ;;  %4610 = vmatprep.subr.bf16.mxu0 %v5246_v3  ;;  %v5696_v28 = vpack.c.bf16 %v412_v24, %v411_v23  ;;  %v413_v29 = vld [vmem:[%s7358_s18 + $0x50] sm:$0xff]  ;;  %v414_v31 = vld [vmem:[%s7358_s18 + $0x58] sm:$0xff]  ;;  %v428_v32 = vadd.f32 %v427_v27, %v5692_v26 }
  0x8e   : > { %1216 = vst [vmem:[#allocation2 + $0xb8] sm:$0x3] %v5248_v6  ;;  %1217 = vst [vmem:[#allocation2 + $0xc0] sm:$0xff] %v5248_v6  ;;  %v419_v33 = vld [vmem:[%s7359_s20] sm:$0xff]  ;;  %v420_v34 = vld [vmem:[%s7359_s20 + $0x8] sm:$0xff]  ;;  %v5722_v38 = vpack.c.bf16 %v414_v31, %v413_v29 }
  0x8f   : > { %1218 = vst [vmem:[#allocation2 + $0xc8] sm:$0xff] %v5248_v6  ;;  %1219 = vst [vmem:[#allocation2 + $0xd0] sm:$0x3] %v5248_v6  ;;  %v5718_v36 = vpack.c.bf16 %v420_v34, %v419_v33  ;;  %v429_v37 = vadd.f32 %v428_v32, %v5702_v30  ;;  %v415_v40 = vld [vmem:[%s7358_s18 + $0x60] sm:$0xff]  ;;  %v416_v41 = vld [vmem:[%s7358_s18 + $0x68] sm:$0xff] }
  0x90   : > { %1220 = vst [vmem:[#allocation2 + $0xd8] sm:$0xff] %v5248_v6  ;;  %1221 = vst [vmem:[#allocation2 + $0xe0] sm:$0xff] %v5248_v6  ;;  %4612 = vmatpush3.bf16.msra.mxu0 %v5639_v7  ;;  %v5742_v45 = vpack.c.bf16 %v416_v41, %v415_v40  ;;  %v417_v47 = vld [vmem:[%s7358_s18 + $0x70] sm:$0xff]  ;;  %v418_v48 = vld [vmem:[%s7358_s18 + $0x78] sm:$0xff] }
  0x91   : > { %1222 = vst [vmem:[#allocation2 + $0xe8] sm:$0x3] %v5248_v6  ;;  %1223 = vst [vmem:[#allocation2 + $0xf0] sm:$0xff] %v5248_v6  ;;  %4613 = vmatprep.subr.bf16.mxu0 %v5246_v3  ;;  %4633 = vmatpush3.bf16.msra.mxu1 %v5718_v36  ;;  %v430_v42 = vadd.f32 %v429_v37, %v5716_v35  ;;  %v5760_v52 = vpack.c.bf16 %v418_v48, %v417_v47  ;;  %v5763_v53 = vld [vmem:[%s5541_s23 + $0x68] sm:$0xff]  ;;  %v5768_v55 = vld [vmem:[%s5541_s23 + $0x70] sm:$0xff] }
  0x92   : > { %1224 = vst [vmem:[#allocation2 + $0xf8] sm:$0xff] %v5248_v6  ;;  %1225 = vst [vmem:[#allocation2 + $0x100] sm:$0x3] %v5248_v6  ;;  %4634 = vmatprep.subr.bf16.mxu1 %v5246_v3  ;;  %v5773_v57 = vld [vmem:[%s5541_s23 + $0x78] sm:$0xff]  ;;  %v5778_v59 = vld [vmem:[%s5541_s23 + $0x80] sm:$0xff] }
  0x93   : > { %1226 = vst [vmem:[#allocation2 + $0x108] sm:$0xff] %v5248_v6  ;;  %1227 = vst [vmem:[#allocation2 + $0x110] sm:$0xff] %v5248_v6  ;;  %v431_v44 = vadd.f32 %v430_v42, %v5725_v39  ;;  %v5782_v61 = vld [vmem:[%s5541_s23 + $0x88] sm:$0xff]  ;;  %v5786_v63 = vld [vmem:[%s5541_s23 + $0x90] sm:$0xff] }
  0x94   : > { %1228 = vst [vmem:[#allocation2 + $0x118] sm:$0x3] %v5248_v6  ;;  %1229 = vst [vmem:[#allocation2 + $0x120] sm:$0xff] %v5248_v6  ;;  %4615 = vmatpush3.bf16.msra.mxu0 %v5660_v14  ;;  %v5790_v1 = vld [vmem:[%s5541_s23 + $0x98] sm:$0xff]  ;;  %v5794_v5 = vld [vmem:[%s5541_s23 + $0xa0] sm:$0xff] }
  0x95   : > { %1230 = vst [vmem:[#allocation2 + $0x128] sm:$0xff] %v5248_v6  ;;  %1231 = vst [vmem:[#allocation2 + $0x130] sm:$0x3] %v5248_v6  ;;  %4616 = vmatprep.subr.bf16.mxu0 %v5246_v3  ;;  %v432_v49 = vadd.f32 %v431_v44, %v5738_v43  ;;  %v5798_v9 = vld [vmem:[%s5541_s23 + $0xa8] sm:$0xff]  ;;  %v5802_v16 = vld [vmem:[%s5541_s23 + $0xb0] sm:$0xff] }
  0x96   : > { %1232 = vst [vmem:[#allocation2 + $0x138] sm:$0xff] %v5248_v6  ;;  %1233 = vst [vmem:[#allocation2 + $0x140] sm:$0xff] %v5248_v6  ;;  %v5806_v18 = vld [vmem:[%s5541_s23 + $0xb8] sm:$0xff]  ;;  %v5810_v23 = vld [vmem:[%s5541_s23 + $0xc0] sm:$0xff] }
  0x97   : > { %1234 = vst [vmem:[#allocation2 + $0x148] sm:$0x3] %v5248_v6  ;;  %1235 = vst [vmem:[#allocation2 + $0x150] sm:$0xff] %v5248_v6  ;;  %v433_v51 = vadd.f32 %v432_v49, %v5745_v46  ;;  %v5814_v25 = vld [vmem:[%s5541_s23 + $0xc8] sm:$0xff]  ;;  %v5818_v29 = vld [vmem:[%s5541_s23 + $0xd0] sm:$0xff] }
  0x98   : > { %1236 = vst [vmem:[#allocation2 + $0x158] sm:$0xff] %v5248_v6  ;;  %1237 = vst [vmem:[#allocation2 + $0x160] sm:$0x3] %v5248_v6  ;;  %4618 = vmatpush3.bf16.msra.mxu0 %v5678_v21  ;;  %v5822_v32 = vld [vmem:[%s5541_s23 + $0xd8] sm:$0xff]  ;;  %v5826_v34 = vld [vmem:[%s5541_s23 + $0xe0] sm:$0xff] }
  0x99   : > { %1238 = vst [vmem:[#allocation2 + $0x168] sm:$0xff] %v5248_v6  ;;  %1239 = vst [vmem:[#allocation2 + $0x170] sm:$0xff] %v5248_v6  ;;  %4619 = vmatprep.subr.bf16.mxu0 %v5246_v3  ;;  %v434_v54 = vadd.f32 %v433_v51, %v5756_v50  ;;  %v5830_v40 = vld [vmem:[%s5541_s23 + $0xe8] sm:$0xff]  ;;  %v5834_v42 = vld [vmem:[%s5541_s23 + $0xf0] sm:$0xff] }
  0x9a   : > { %1240 = vst [vmem:[#allocation2 + $0x178] sm:$0x3] %v5248_v6  ;;  %1241 = vst [vmem:[#allocation2 + $0x180] sm:$0xff] %v5248_v6  ;;  %v5838_v47 = vld [vmem:[%s5541_s23 + $0xf8] sm:$0xff] }
  0x9b   : > { %1242 = vst [vmem:[#allocation2 + $0x188] sm:$0xff] %v5248_v6  ;;  %1243 = vst [vmem:[#allocation2 + $0x190] sm:$0x3] %v5248_v6  ;;  %v435_v56 = vadd.f32 %v434_v54, %v5763_v53 }
  0x9c   : > { %1246 = vst [vmem:[#allocation2 + $0x1a8] sm:$0x3] %v5248_v6  ;;  %4621 = vmatpush3.bf16.msra.mxu0 %v5696_v28  ;;  %1350 = vst [vmem:[#allocation3] sm:$0xff] %v5246_v3 }
  0x9d   : > { %4622 = vmatprep.subr.bf16.mxu0 %v5246_v3  ;;  %v436_v58 = vadd.f32 %v435_v56, %v5768_v55  ;;  %1788 = vst [vmem:[#allocation3 + $0x468] sm:$0xff] %v5246_v3 }
  0x9f   : > { %v437_v60 = vadd.f32 %v436_v58, %v5773_v57 }
  0xa0   : > { %4624 = vmatpush3.bf16.msra.mxu0 %v5722_v38 }
  0xa1   : > { %4625 = vmatprep.subr.bf16.mxu0 %v5246_v3  ;;  %v438_v62 = vadd.f32 %v437_v60, %v5778_v59 }
  0xa3   : > { %v439_v0 = vadd.f32 %v438_v62, %v5782_v61 }
  0xa4   : > { %4627 = vmatpush3.bf16.msra.mxu0 %v5742_v45 }
  0xa5   : > { %4628 = vmatprep.subr.bf16.mxu0 %v5246_v3  ;;  %v440_v2 = vadd.f32 %v439_v0, %v5786_v63  ;;  %v421_v0 = vld [vmem:[%s7359_s20 + $0x10] sm:$0xff] }
  0xa7   : > { %v441_v8 = vadd.f32 %v440_v2, %v5790_v1  ;;  %v422_v2 = vld [vmem:[%s7359_s20 + $0x18] sm:$0xff] }
  0xa8   : > { %4630 = vmatpush3.bf16.msra.mxu0 %v5760_v52 }
  0xa9   : > { %4661 = vmatprep.subr.bf16.mxu0 %v5246_v3  ;;  %v442_v13 = vadd.f32 %v441_v8, %v5794_v5  ;;  %v4635_v8 = vpack.c.bf16 %v422_v2, %v421_v0 }
  0xab   : > { %v443_v17 = vadd.f32 %v442_v13, %v5798_v9  ;;  %4636 = vmatpush3.bf16.msra.mxu1 %v4635_v8 }
  0xac   : > { %4637 = vmatprep.subr.bf16.mxu1 %v5246_v3 }
  0xad   : > { %v444_v20 = vadd.f32 %v443_v17, %v5802_v16 }
  0xaf   : > { %v445_v24 = vadd.f32 %v444_v20, %v5806_v18 }
  0xb1   : > { %v446_v27 = vadd.f32 %v445_v24, %v5810_v23 }
  0xb3   : > { %v447_v31 = vadd.f32 %v446_v27, %v5814_v25 }
  0xb5   : > { %v448_v33 = vadd.f32 %v447_v31, %v5818_v29 }
  0xb7   : > { %v449_v37 = vadd.f32 %v448_v33, %v5822_v32 }
  0xb9   : > { %v450_v41 = vadd.f32 %v449_v37, %v5826_v34 }
  0xbb   : > { %v451_v44 = vadd.f32 %v450_v41, %v5830_v40 }
  0xbd   : > { %v452_v48 = vadd.f32 %v451_v44, %v5834_v42 }
  0xbf   : > { %v453_v49 = vadd.f32 %v452_v48, %v5838_v47 }
  0xc1   : > { %v454_v51 = vrot.slane %v453_v49, 4 }
  0xc3   : > { %v455_v54 = vadd.f32 %v454_v51, %v453_v49 }
  0xc5   : > { %v456_v56 = vrot.slane %v455_v54, 2 }
  0xc7   : > { %v457_v58 = vadd.f32 %v456_v56, %v455_v54 }
  0xc9   : > { %v458_v60 = vrot.slane %v457_v58, 1 }
  0xcb   : > { %v459_v62 = vadd.f32 %v458_v60, %v457_v58 }
  0xcd   : > { %4500 = vmatmul.mubr.f32.vlgmr.msra.gmra.mrb[0].mxu0 %v459_v62 }
  0xce   : > { %4663 = vmatpush3.bf16.msra.mxu0 %v5718_v36  ;;  %4556 = vmatprep.mubr.msk.f32.mxu0 %vm5247_vm0, %v5248_v6 }
  0xcf   : > { %4664 = vmatprep.subr.bf16.mxu0 %v5246_v3 }
  0xd2   : > { %4666 = vmatpush3.bf16.msra.mxu0 %v4635_v8 }
 0x1a0   : > { %v526_v13 = vpop.f32.mrb[0].mxu0 }
 0x1a1   : > { %v531_v36 = vmul.f32 0.0009765625, %v526_v13  ;;  %v4501_v17 = vpop.f32.mrb[1].mxu0 }
 0x1a3   : > { %4511 = vmatmul.mubr.msk.f32.vlgmr.msra.gmra.mrb[0].mxu1 %vm532_vm1, %v531_v36 }
 0x1a4   : > { %4639 = vmatpush3.bf16.msra.mxu1 %v5578_v4  ;;  %4545 = vmatprep.mubr.msk.f32.mxu1 %vm5247_vm0, %v5248_v6  ;;  %v606_v4 = vlaneseq }
 0x1a5   : > { %4640 = vmatprep.subr.bf16.mxu1 %v5246_v3 }
 0x1a8   : > { %4642 = vmatpush3.bf16.msra.mxu1 %v5639_v7  ;;  %v5871_v7 = vshrl.u32 %v606_v4, 7 }
 0x1a9   : > { %4643 = vmatprep.subr.bf16.mxu1 %v5246_v3 }
 0x1aa   : > { %v608_v20 = vsub.s32 0, %v5871_v7 }
 0x1ac   : > { %4645 = vmatpush3.bf16.msra.mxu1 %v5660_v14 }
 0x1ad   : > { %4646 = vmatprep.subr.bf16.mxu1 %v5246_v3 }
 0x1b0   : > { %4648 = vmatpush3.bf16.msra.mxu1 %v5678_v21 }
 0x1b1   : > { %4649 = vmatprep.subr.bf16.mxu1 %v5246_v3 }
 0x1b4   : > { %4651 = vmatpush3.bf16.msra.mxu1 %v5696_v28 }
 0x1b5   : > { %4652 = vmatprep.subr.bf16.mxu1 %v5246_v3 }
 0x1b8   : > { %4654 = vmatpush3.bf16.msra.mxu1 %v5722_v38 }
 0x1b9   : > { %4655 = vmatprep.subr.bf16.mxu1 %v5246_v3 }
 0x1bc   : > { %4657 = vmatpush3.bf16.msra.mxu1 %v5742_v45 }
 0x1bd   : > { %4658 = vmatprep.subr.bf16.mxu1 %v5246_v3 }
 0x1c0   : > { %4660 = vmatpush3.bf16.msra.mxu1 %v5760_v52 }
 0x276   : > { %v602_v14 = vpop.f32.mrb[0].mxu1 }
 0x277   : > { %v4512_v21 = vpop.f32.mrb[1].mxu1  ;;  %v5876_v28 = vrot.slane %v602_v14, %v608_v20 }
 0x279   : > { %v5880_v38 = vsub.f32 %v5649_v10, %v5876_v28  ;;  %v5884_v45 = vsub.f32 %v5652_v11, %v5876_v28  ;;  %v5888_v52 = vsub.f32 %v5655_v12, %v5876_v28  ;;  %v5896_v31 = vsub.f32 %v5663_v15, %v5876_v28 }
 0x27a   : > { %v5900_v10 = vsub.f32 %v5674_v19, %v5876_v28  ;;  %v5906_v12 = vsub.f32 %v5681_v22, %v5876_v28  ;;  %v5912_v15 = vsub.f32 %v5692_v26, %v5876_v28  ;;  %v5918_v48 = vsub.f32 %v5702_v30, %v5876_v28 }
 0x27b   : > { %v642_v24 = vmul.f32 %v5880_v38, %v5880_v38  ;;  %v643_v27 = vmul.f32 %v5884_v45, %v5884_v45  ;;  %v644_v11 = vmul.f32 %v5888_v52, %v5888_v52  ;;  %v645_v37 = vmul.f32 %v5896_v31, %v5896_v31 }
 0x27c   : > { %v646_v19 = vmul.f32 %v5900_v10, %v5900_v10  ;;  %v647_v22 = vmul.f32 %v5906_v12, %v5906_v12  ;;  %v5924_v51 = vsub.f32 %v5716_v35, %v5876_v28  ;;  %v648_v26 = vmul.f32 %v5912_v15, %v5912_v15 }
 0x27d   : > { %v674_v33 = vadd.f32 %v643_v27, %v642_v24  ;;  %v5930_v56 = vsub.f32 %v5725_v39, %v5876_v28  ;;  %v649_v30 = vmul.f32 %v5918_v48, %v5918_v48  ;;  %v5936_v60 = vsub.f32 %v5738_v43, %v5876_v28 }
 0x27e   : > { %v650_v35 = vmul.f32 %v5924_v51, %v5924_v51  ;;  %v5942_v0 = vsub.f32 %v5745_v46, %v5876_v28  ;;  %v5948_v8 = vsub.f32 %v5756_v50, %v5876_v28  ;;  %v5954_v36 = vsub.f32 %v5763_v53, %v5876_v28 }
 0x27f   : > { %v675_v41 = vadd.f32 %v674_v33, %v644_v11  ;;  %v651_v39 = vmul.f32 %v5930_v56, %v5930_v56  ;;  %v652_v43 = vmul.f32 %v5936_v60, %v5936_v60  ;;  %v5960_v4 = vsub.f32 %v5768_v55, %v5876_v28 }
 0x280   : > { %v653_v46 = vmul.f32 %v5942_v0, %v5942_v0  ;;  %v654_v50 = vmul.f32 %v5948_v8, %v5948_v8  ;;  %v5966_v21 = vsub.f32 %v5773_v57, %v5876_v28  ;;  %v655_v53 = vmul.f32 %v5954_v36, %v5954_v36 }
 0x281   : > { %v676_v44 = vadd.f32 %v675_v41, %v645_v37  ;;  %v5972_v27 = vsub.f32 %v5778_v59, %v5876_v28  ;;  %v656_v55 = vmul.f32 %v5960_v4, %v5960_v4  ;;  %v5978_v33 = vsub.f32 %v5782_v61, %v5876_v28 }
 0x282   : > { %v657_v57 = vmul.f32 %v5966_v21, %v5966_v21  ;;  %v5984_v41 = vsub.f32 %v5786_v63, %v5876_v28 }
 0x283   : > { %v677_v49 = vadd.f32 %v676_v44, %v646_v19  ;;  %v658_v59 = vmul.f32 %v5972_v27, %v5972_v27  ;;  %v5990_v44 = vsub.f32 %v5790_v1, %v5876_v28  ;;  %v659_v61 = vmul.f32 %v5978_v33, %v5978_v33 }
 0x284   : > { %v660_v63 = vmul.f32 %v5984_v41, %v5984_v41 }
 0x285   : > { %v678_v54 = vadd.f32 %v677_v49, %v647_v22  ;;  %v5996_v49 = vsub.f32 %v5794_v5, %v5876_v28  ;;  %v661_v1 = vmul.f32 %v5990_v44, %v5990_v44 }
 0x287   : > { %v679_v58 = vadd.f32 %v678_v54, %v648_v26  ;;  %v6002_v54 = vsub.f32 %v5798_v9, %v5876_v28  ;;  %v662_v5 = vmul.f32 %v5996_v49, %v5996_v49 }
 0x289   : > { %v680_v62 = vadd.f32 %v679_v58, %v649_v30  ;;  %v6008_v58 = vsub.f32 %v5802_v16, %v5876_v28  ;;  %v663_v9 = vmul.f32 %v6002_v54, %v6002_v54 }
 0x28b   : > { %v681_v2 = vadd.f32 %v680_v62, %v650_v35  ;;  %v6014_v62 = vsub.f32 %v5806_v18, %v5876_v28  ;;  %v664_v16 = vmul.f32 %v6008_v58, %v6008_v58 }
 0x28d   : > { %v682_v13 = vadd.f32 %v681_v2, %v651_v39  ;;  %v6020_v2 = vsub.f32 %v5810_v23, %v5876_v28  ;;  %v665_v18 = vmul.f32 %v6014_v62, %v6014_v62 }
 0x28f   : > { %v683_v17 = vadd.f32 %v682_v13, %v652_v43  ;;  %v6026_v13 = vsub.f32 %v5814_v25, %v5876_v28  ;;  %v666_v23 = vmul.f32 %v6020_v2, %v6020_v2 }
 0x291   : > { %v684_v14 = vadd.f32 %v683_v17, %v653_v46  ;;  %v6032_v17 = vsub.f32 %v5818_v29, %v5876_v28  ;;  %v667_v25 = vmul.f32 %v6026_v13, %v6026_v13 }
 0x293   : > { %v685_v24 = vadd.f32 %v684_v14, %v654_v50  ;;  %v6038_v14 = vsub.f32 %v5822_v32, %v5876_v28  ;;  %v668_v29 = vmul.f32 %v6032_v17, %v6032_v17 }
 0x295   : > { %v686_v11 = vadd.f32 %v685_v24, %v655_v53  ;;  %v6044_v24 = vsub.f32 %v5826_v34, %v5876_v28  ;;  %v641_v34 = vsub.f32 %v5838_v47, %v5876_v28 }
 0x297   : > { %v687_v37 = vadd.f32 %v686_v11, %v656_v55  ;;  %v639_v11 = vsub.f32 %v5830_v40, %v5876_v28 }
 0x299   : > { %v688_v19 = vadd.f32 %v687_v37, %v657_v57  ;;  %v669_v57 = vmul.f32 %v6038_v14, %v6038_v14  ;;  %v640_v37 = vsub.f32 %v5834_v42, %v5876_v28 }
 0x29b   : > { %v689_v22 = vadd.f32 %v688_v19, %v658_v59  ;;  %v670_v59 = vmul.f32 %v6044_v24, %v6044_v24 }
 0x29d   : > { %v690_v26 = vadd.f32 %v689_v22, %v659_v61  ;;  %v671_v61 = vmul.f32 %v639_v11, %v639_v11 }
 0x29f   : > { %v691_v30 = vadd.f32 %v690_v26, %v660_v63  ;;  %v672_v63 = vmul.f32 %v640_v37, %v640_v37 }
 0x2a1   : > { %v692_v35 = vadd.f32 %v691_v30, %v661_v1  ;;  %v673_v1 = vmul.f32 %v641_v34, %v641_v34 }
 0x2a3   : > { %v693_v39 = vadd.f32 %v692_v35, %v662_v5 }
 0x2a5   : > { %v694_v43 = vadd.f32 %v693_v39, %v663_v9 }
 0x2a7   : > { %v695_v46 = vadd.f32 %v694_v43, %v664_v16 }
 0x2a9   : > { %v696_v50 = vadd.f32 %v695_v46, %v665_v18 }
 0x2ab   : > { %v697_v53 = vadd.f32 %v696_v50, %v666_v23 }
 0x2ad   : > { %v698_v55 = vadd.f32 %v697_v53, %v667_v25 }
 0x2af   : > { %v699_v32 = vadd.f32 %v698_v55, %v668_v29 }
 0x2b1   : > { %v700_v19 = vadd.f32 %v699_v32, %v669_v57 }
 0x2b3   : > { %v701_v22 = vadd.f32 %v700_v19, %v670_v59 }
 0x2b5   : > { %v702_v26 = vadd.f32 %v701_v22, %v671_v61 }
 0x2b7   : > { %v703_v40 = vadd.f32 %v702_v26, %v672_v63 }
 0x2b9   : > { %v704_v30 = vadd.f32 %v703_v40, %v673_v1 }
 0x2bb   : > { %v705_v5 = vrot.slane %v704_v30, 4 }
 0x2bd   : > { %v706_v35 = vadd.f32 %v705_v5, %v704_v30 }
 0x2bf   : > { %v707_v9 = vrot.slane %v706_v35, 2 }
 0x2c1   : > { %v708_v39 = vadd.f32 %v707_v9, %v706_v35 }
 0x2c3   : > { %v709_v16 = vrot.slane %v708_v39, 1 }
 0x2c5   : > { %v710_v42 = vadd.f32 %v709_v16, %v708_v39 }
 0x2c7   : > { %4546 = vmatmul.mubr.f32.vlgmr.msra.gmra.mrb[2].mxu1 %v710_v42 }
 0x39a   : > { %v777_v43 = vpop.f32.mrb[2].mxu1 }
 0x39b   : > { %v781_v18 = vmul.f32 0.0009765625, %v777_v43  ;;  %v4547_v46 = vpop.f32.mrb[3].mxu1 }
 0x39d   : > { %v782_v23 = vadd.f32 1e-05, %v781_v18 }
 0x39f   : > { %4826 = vrsqrt.f32 %v782_v23 }
 0x3a9   : > { %v4827_v47 = vpop.eup %4826 }
 0x3aa   : > { %4557 = vmatmul.mubr.msk.f32.vlgmr.msra.gmra.mrb[2].mxu0 %vm532_vm1, %v4827_v47 }
 0x47d   : > { %v853_v28 = vpop.f32.mrb[2].mxu0 }
 0x47e   : > { %v4558_v50 = vpop.f32.mrb[3].mxu0  ;;  %v860_v25 = vrot.slane %v853_v28, %v608_v20 }
 0x480   : > { %v861_v53 = vmul.f32 %v860_v25, %v5880_v38  ;;  %v862_v29 = vmul.f32 %v860_v25, %v5884_v45  ;;  %v863_v55 = vmul.f32 %v860_v25, %v5888_v52  ;;  %v864_v57 = vmul.f32 %v860_v25, %v5896_v31 }
 0x481   : > { %v865_v32 = vmul.f32 %v860_v25, %v5900_v10  ;;  %v866_v59 = vmul.f32 %v860_v25, %v5906_v12  ;;  %v867_v19 = vmul.f32 %v860_v25, %v5912_v15  ;;  %v868_v61 = vmul.f32 %v860_v25, %v5918_v48  ;;  %v6081_v15 = vld [vmem:[%s7360_s21] ss:$0 sm:$0xff] }
 0x482   : > { %v869_v22 = vmul.f32 %v860_v25, %v5924_v51  ;;  %v870_v7 = vmul.f32 %v860_v25, %v5930_v56  ;;  %v871_v20 = vmul.f32 %v860_v25, %v5936_v60  ;;  %v872_v38 = vmul.f32 %v860_v25, %v5942_v0 }
 0x483   : > { %v873_v45 = vmul.f32 %v860_v25, %v5948_v8  ;;  %v874_v52 = vmul.f32 %v860_v25, %v5954_v36  ;;  %v875_v31 = vmul.f32 %v860_v25, %v5960_v4  ;;  %v876_v10 = vmul.f32 %v860_v25, %v5966_v21 }
 0x484   : > { %v877_v12 = vmul.f32 %v860_v25, %v5972_v27  ;;  %v878_v48 = vmul.f32 %v860_v25, %v5978_v33  ;;  %v879_v51 = vmul.f32 %v860_v25, %v5984_v41  ;;  %v880_v56 = vmul.f32 %v860_v25, %v5990_v44 }
 0x485   : > { %v881_v60 = vmul.f32 %v860_v25, %v5996_v49  ;;  %v882_v0 = vmul.f32 %v860_v25, %v6002_v54  ;;  %v883_v8 = vmul.f32 %v860_v25, %v6008_v58  ;;  %v884_v36 = vmul.f32 %v860_v25, %v6014_v62 }
 0x486   : > { %v885_v4 = vmul.f32 %v860_v25, %v6020_v2  ;;  %v886_v21 = vmul.f32 %v860_v25, %v6026_v13  ;;  %v887_v27 = vmul.f32 %v860_v25, %v6032_v17  ;;  %v888_v33 = vmul.f32 %v860_v25, %v6038_v14  ;;  %v6111_v14 = vld [vmem:[%s7361_s13] ss:$0 sm:$0xff] }
 0x487   : > { %v6095_v41 = vmul.f32 %v860_v25, %v6044_v24  ;;  %v6097_v44 = vmul.f32 %v860_v25, %v639_v11  ;;  %v6099_v49 = vmul.f32 %v860_v25, %v640_v37  ;;  %v6101_v54 = vmul.f32 %v860_v25, %v641_v34 }
 0x488   : > { %v899_v58 = vmul.f32 %v6081_v15, %v861_v53  ;;  %v900_v62 = vmul.f32 %v6081_v15, %v862_v29  ;;  %v901_v2 = vmul.f32 %v6081_v15, %v863_v55  ;;  %v902_v13 = vmul.f32 %v6081_v15, %v864_v57 }
 0x489   : > { %v903_v17 = vmul.f32 %v6081_v15, %v865_v32  ;;  %v904_v24 = vmul.f32 %v6081_v15, %v866_v59  ;;  %v905_v11 = vmul.f32 %v6081_v15, %v867_v19  ;;  %v906_v37 = vmul.f32 %v6081_v15, %v868_v61 }
 0x48a   : > { %v907_v34 = vmul.f32 %v6081_v15, %v869_v22  ;;  %v908_v63 = vmul.f32 %v6081_v15, %v870_v7  ;;  %v909_v26 = vmul.f32 %v6081_v15, %v871_v20  ;;  %v910_v1 = vmul.f32 %v6081_v15, %v872_v38 }
 0x48b   : > { %v911_v40 = vmul.f32 %v6081_v15, %v873_v45  ;;  %v912_v30 = vmul.f32 %v6081_v15, %v874_v52  ;;  %v913_v5 = vmul.f32 %v6081_v15, %v875_v31  ;;  %v914_v35 = vmul.f32 %v6081_v15, %v876_v10 }
 0x48c   : > { %v915_v9 = vmul.f32 %v6081_v15, %v877_v12  ;;  %v916_v39 = vmul.f32 %v6081_v15, %v878_v48  ;;  %v6127_v16 = vadd.f32 %v6111_v14, %v899_v58  ;;  %v6130_v42 = vadd.f32 %v6111_v14, %v900_v62 }
 0x48d   : > { %v6133_v43 = vadd.f32 %v6111_v14, %v901_v2  ;;  %v917_v18 = vmul.f32 %v6081_v15, %v879_v51  ;;  %v918_v46 = vmul.f32 %v6081_v15, %v880_v56  ;;  %v919_v23 = vmul.f32 %v6081_v15, %v881_v60 }
 0x48e   : > { %v6139_v47 = vadd.f32 %v6111_v14, %v902_v13  ;;  %v920_v28 = vmul.f32 %v6081_v15, %v882_v0  ;;  %v921_v50 = vmul.f32 %v6081_v15, %v883_v8  ;;  %v6144_v25 = vmul.f32 %v6081_v15, %v884_v36 }
 0x48f   : > { %v6147_v53 = vadd.f32 %v6111_v14, %v903_v17  ;;  %v6150_v29 = vmul.f32 %v6081_v15, %v885_v4  ;;  %v6153_v55 = vmul.f32 %v6081_v15, %v886_v21  ;;  %v6156_v57 = vadd.f32 %v6111_v14, %v904_v24  ;;  %v1282_v17 = vld [vmem:[#allocation2 + $0x10] sm:$0x3] }
 0x490   : > { %v6159_v32 = vadd.f32 %v6111_v14, %v905_v11  ;;  %v3681_v59 = vmul.f32 -1.442695, %v6127_v16  ;;  %v3682_v19 = vmul.f32 -1.442695, %v6130_v42  ;;  %v3683_v61 = vmul.f32 -1.442695, %v6133_v43 }
 0x491   : > { %v6165_v22 = vmul.f32 %v6081_v15, %v887_v27  ;;  %v6168_v7 = vmul.f32 %v6081_v15, %v888_v33  ;;  %v6171_v20 = vadd.f32 %v6111_v14, %v906_v37  ;;  %v3684_v38 = vmul.f32 -1.442695, %v6139_v47 }
 0x492   : > { %v6175_v45 = vadd.f32 %v6111_v14, %v907_v34  ;;  %v6178_v52 = vadd.f32 %v6111_v14, %v908_v63  ;;  %4828 = vpow2.f32 %v3681_v59  ;;  %v3685_v31 = vmul.f32 -1.442695, %v6147_v53  ;;  %v1333_v34 = vld [vmem:[#allocation2 + $0x1a8] sm:$0x3] }
 0x493   : > { %v6184_v10 = vadd.f32 %v6111_v14, %v909_v26  ;;  %v6187_v12 = vadd.f32 %v6111_v14, %v910_v1  ;;  %4830 = vpow2.f32 %v3682_v19  ;;  %v3686_v48 = vmul.f32 -1.442695, %v6156_v57 }
 0x494   : > { %v6191_v51 = vadd.f32 %v6111_v14, %v911_v40  ;;  %v6194_v56 = vadd.f32 %v6111_v14, %v912_v30  ;;  %4832 = vpow2.f32 %v3683_v61  ;;  %v3687_v60 = vmul.f32 -1.442695, %v6159_v32 }
 0x495   : > { %v6198_v3 = vadd.f32 %v6111_v14, %v913_v5  ;;  %v6201_v0 = vadd.f32 %v6111_v14, %v914_v35  ;;  %4834 = vpow2.f32 %v3684_v38  ;;  %v3688_v8 = vmul.f32 -1.442695, %v6171_v20 }
 0x496   : > { %v6205_v36 = vadd.f32 %v6111_v14, %v915_v9  ;;  %v6208_v4 = vadd.f32 %v6111_v14, %v916_v39  ;;  %4836 = vpow2.f32 %v3685_v31  ;;  %v3689_v21 = vmul.f32 -1.442695, %v6175_v45 }
 0x497   : > { %v6212_v27 = vadd.f32 %v6111_v14, %v917_v18  ;;  %v6215_v33 = vadd.f32 %v6111_v14, %v918_v46  ;;  %4838 = vpow2.f32 %v3686_v48  ;;  %v3690_v58 = vmul.f32 -1.442695, %v6178_v52 }
 0x498   : > { %v6219_v62 = vadd.f32 %v6111_v14, %v919_v23  ;;  %v6222_v2 = vadd.f32 %v6111_v14, %v920_v28  ;;  %4840 = vpow2.f32 %v3687_v60  ;;  %v3691_v13 = vmul.f32 -1.442695, %v6184_v10 }
 0x499   : > { %v6226_v24 = vadd.f32 %v6111_v14, %v921_v50  ;;  %4842 = vpow2.f32 %v3688_v8  ;;  %v3692_v11 = vmul.f32 -1.442695, %v6187_v12  ;;  %v3693_v37 = vmul.f32 -1.442695, %v6191_v51 }
 0x49a   : > { %4844 = vpow2.f32 %v3689_v21  ;;  %v3694_v63 = vmul.f32 -1.442695, %v6194_v56  ;;  %v3695_v26 = vmul.f32 -1.442695, %v6198_v3  ;;  %v1415_v1 = vrot.slane %v5248_v6, 1 }
 0x49b   : > { %4846 = vpow2.f32 %v3690_v58  ;;  %v1418_v40 = vrot.slane %v1282_v17, 1  ;;  %v1560_v30 = vrot.slane %v5248_v6, 2  ;;  %v1563_v5 = vrot.slane %v1282_v17, 2 }
 0x49c   : > { %v6234_v35 = vpop.eup %4828  ;;  %4848 = vpow2.f32 %v3691_v13  ;;  %v1795_v9 = vrot.slane %v1333_v34, 1  ;;  %v1819_v39 = vrot.slane %v1333_v34, 2  ;;  %v3696_v46 = vmul.f32 -1.442695, %v6201_v0 }
 0x49d   : > { %v6236_v18 = vpop.eup %4830  ;;  %4850 = vpow2.f32 %v3692_v11  ;;  %v1419_v23 = vsel %vm1414_vm2, %v1415_v1, %v1418_v40  ;;  %v3697_v50 = vmul.f32 -1.442695, %v6205_v36  ;;  %v1564_v6 = vsel %vm1559_vm3, %v1560_v30, %v1563_v5 }
 0x49e   : > { %v6240_v28 = vpop.eup %4832  ;;  %4852 = vpow2.f32 %v3693_v37  ;;  %v1527_v59 = vpack.c.bf16 %v1419_v23, %v1415_v1  ;;  %v3698_v61 = vmul.f32 -1.442695, %v6208_v4  ;;  %v1672_v38 = vpack.c.bf16 %v1564_v6, %v1560_v30 }
 0x49f   : > { %v6244_v19 = vpop.eup %4834  ;;  %4854 = vpow2.f32 %v3694_v63  ;;  %v1796_v31 = vsel %vm1414_vm2, %v1415_v1, %v1795_v9  ;;  %v3699_v60 = vmul.f32 -1.442695, %v6212_v27  ;;  %v1820_v21 = vsel %vm1559_vm3, %v1560_v30, %v1819_v39 }
 0x4a0   : > { %v6248_v48 = vpop.eup %4836  ;;  %4856 = vpow2.f32 %v3695_v26  ;;  %1543 = vst [vmem:[#allocation3 + $0x8] sm:$0xff] %v1527_v59  ;;  %v1799_v8 = vpack.c.bf16 %v1796_v31, %v1415_v1  ;;  %v6256_v13 = vadd.f32 %v6111_v14, %v6144_v25  ;;  %v3700_v17 = vmul.f32 -1.442695, %v6215_v33  ;;  %1688 = vst [vmem:[#allocation3 + $0x10] sm:$0xff] %v1672_v38 }
 0x4a1   : > { %v6252_v58 = vpop.eup %4838  ;;  %4858 = vpow2.f32 %v3696_v46  ;;  %v1823_v11 = vpack.c.bf16 %v1820_v21, %v1560_v30  ;;  %v927_v34 = vmul.f32 %v6081_v15, %v6095_v41  ;;  %v6265_v63 = vadd.f32 %v6111_v14, %v6150_v29 }
 0x4a2   : > { %v6259_v37 = vpop.eup %4840  ;;  %4860 = vpow2.f32 %v3697_v50  ;;  %v3701_v26 = vmul.f32 -1.442695, %v6219_v62  ;;  %1815 = vst [vmem:[#allocation3 + $0x470] sm:$0xff] %v1799_v8  ;;  %v928_v1 = vmul.f32 %v6081_v15, %v6097_v44  ;;  %v6274_v40 = vadd.f32 %v6111_v14, %v6153_v55 }
 0x4a3   : > { %v6268_v25 = vpop.eup %4842  ;;  %4862 = vpow2.f32 %v3698_v61  ;;  %v3702_v41 = vmul.f32 -1.442695, %v6222_v2  ;;  %1839 = vst [vmem:[#allocation3 + $0x478] sm:$0xff] %v1823_v11  ;;  %v929_v29 = vmul.f32 %v6081_v15, %v6099_v49  ;;  %v6281_v5 = vadd.f32 %v6111_v14, %v6165_v22 }
 0x4a4   : > { %v4845_v30 = vpop.eup %4844  ;;  %4864 = vpow2.f32 %v3699_v60  ;;  %v3703_v9 = vmul.f32 -1.442695, %v6226_v24  ;;  %v930_v55 = vmul.f32 %v6081_v15, %v6101_v54  ;;  %v6288_v39 = vadd.f32 %v6111_v14, %v6168_v7 }
 0x4a5   : > { %v4847_v44 = vpop.eup %4846  ;;  %4866 = vpow2.f32 %v3700_v17  ;;  %v3704_v46 = vmul.f32 -1.442695, %v6256_v13  ;;  %v6292_v49 = vadd.f32 %v6111_v14, %v927_v34  ;;  %v3705_v22 = vmul.f32 -1.442695, %v6265_v63 }
 0x4a6   : > { %v4849_v23 = vpop.eup %4848  ;;  %4868 = vpow2.f32 %v3701_v26  ;;  %v6296_v59 = vadd.f32 %v6111_v14, %v928_v1  ;;  %v3706_v15 = vmul.f32 -1.442695, %v6274_v40  ;;  %v6300_v7 = vadd.f32 %v6111_v14, %v929_v29 }
 0x4a7   : > { %7362 = vst [vmem:[#allocation19_spill] sm:$0xff] %v6292_v49  ;;  %v4851_v50 = vpop.eup %4850  ;;  %4870 = vpow2.f32 %v3702_v41  ;;  %v3707_v6 = vmul.f32 -1.442695, %v6281_v5  ;;  %v6304_v38 = vadd.f32 %v6111_v14, %v930_v55  ;;  %v3708_v31 = vmul.f32 -1.442695, %v6288_v39 }
 0x4a8   : > { %7363 = vst [vmem:[#allocation20_spill] sm:$0xff] %v6296_v59  ;;  %v4853_v54 = vpop.eup %4852  ;;  %7364 = vst [vmem:[#allocation21_spill] sm:$0xff] %v6300_v7  ;;  %4872 = vpow2.f32 %v3703_v9  ;;  %v3709_v8 = vmul.f32 -1.442695, %v6292_v49  ;;  %v3710_v17 = vmul.f32 -1.442695, %v6296_v59 }
 0x4a9   : > { %v4855_v61 = vpop.eup %4854  ;;  %7365 = vst [vmem:[#allocation22_spill] sm:$0xff] %v6304_v38  ;;  %4874 = vpow2.f32 %v3704_v46  ;;  %v3711_v34 = vmul.f32 -1.442695, %v6300_v7  ;;  %v3712_v14 = vmul.f32 -1.442695, %v6304_v38  ;;  %v1065_v41 = vadd.f32 1.0, %v6234_v35 }
 0x4aa   : > { %v4857_v60 = vpop.eup %4856  ;;  %4876 = vpow2.f32 %v3705_v22  ;;  %v1066_v9 = vadd.f32 1.0, %v6236_v18  ;;  %v1067_v46 = vadd.f32 1.0, %v6240_v28  ;;  %v1074_v7 = vadd.f32 1.0, %v4847_v44 }
 0x4ab   : > { %v4859_v21 = vpop.eup %4858  ;;  %4878 = vpow2.f32 %v3706_v15  ;;  %v1068_v15 = vadd.f32 1.0, %v6244_v19  ;;  %v1077_v49 = vadd.f32 1.0, %v4853_v54 }
 0x4ac   : > { %v4861_v11 = vpop.eup %4860  ;;  %4880 = vpow2.f32 %v3707_v6 }
 0x4ad   : > { %v4863_v26 = vpop.eup %4862  ;;  %4882 = vpow2.f32 %v3708_v31  ;;  %v1069_v31 = vadd.f32 1.0, %v6248_v48 }
 0x4ae   : > { %v4865_v1 = vpop.eup %4864  ;;  %4884 = vpow2.f32 %v3709_v8  ;;  %v1070_v8 = vadd.f32 1.0, %v6252_v58  ;;  %v1076_v58 = vadd.f32 1.0, %v4851_v50 }
 0x4af   : > { %v4867_v29 = vpop.eup %4866  ;;  %4886 = vpow2.f32 %v3710_v17  ;;  %v1071_v17 = vadd.f32 1.0, %v6259_v37 }
 0x4b0   : > { %v4869_v55 = vpop.eup %4868  ;;  %4888 = vpow2.f32 %v3711_v34  ;;  %v1072_v34 = vadd.f32 1.0, %v6268_v25 }
 0x4b1   : > { %v4871_v22 = vpop.eup %4870  ;;  %4890 = vpow2.f32 %v3712_v14  ;;  %v1073_v14 = vadd.f32 1.0, %v4845_v30 }
 0x4b2   : > { %v4873_v6 = vpop.eup %4872  ;;  %4892 = vrcp.f32 %v1065_v41  ;;  %v1075_v41 = vadd.f32 1.0, %v4849_v23  ;;  %v1081_v23 = vadd.f32 1.0, %v4861_v11 }
 0x4b3   : > { %v4875_v38 = vpop.eup %4874  ;;  %4894 = vrcp.f32 %v1066_v9  ;;  %v1087_v11 = vadd.f32 1.0, %v4873_v6 }
 0x4b4   : > { %v4877_v35 = vpop.eup %4876  ;;  %4896 = vrcp.f32 %v1067_v46  ;;  %v1078_v46 = vadd.f32 1.0, %v4855_v61  ;;  %v1083_v61 = vadd.f32 1.0, %v4865_v1 }
 0x4b5   : > { %v4879_v18 = vpop.eup %4878  ;;  %4898 = vrcp.f32 %v1068_v15  ;;  %v1079_v15 = vadd.f32 1.0, %v4857_v60  ;;  %v1084_v60 = vadd.f32 1.0, %v4867_v29  ;;  %v1089_v29 = vadd.f32 1.0, %v4877_v35 }
 0x4b6   : > { %v4881_v28 = vpop.eup %4880  ;;  %4900 = vrcp.f32 %v1069_v31  ;;  %v1080_v31 = vadd.f32 1.0, %v4859_v21 }
 0x4b7   : > { %v4883_v19 = vpop.eup %4882  ;;  %4902 = vrcp.f32 %v1070_v8 }
 0x4b8   : > { %v4885_v48 = vpop.eup %4884  ;;  %4904 = vrcp.f32 %v1071_v17 }
 0x4b9   : > { %v4887_v59 = vpop.eup %4886  ;;  %4906 = vrcp.f32 %v1072_v34  ;;  %v1082_v34 = vadd.f32 1.0, %v4863_v26  ;;  %v1088_v26 = vadd.f32 1.0, %v4875_v38  ;;  %v6329_v6 = vadd.f32 1.0, %v4885_v48 }
 0x4ba   : > { %v4889_v9 = vpop.eup %4888  ;;  %4908 = vrcp.f32 %v1073_v14 }
 0x4bb   : > { %v4891_v37 = vpop.eup %4890  ;;  %4910 = vrcp.f32 %v1074_v7 }
 0x4bc   : > { %v4893_v25 = vpop.eup %4892  ;;  %4912 = vrcp.f32 %v1075_v41  ;;  %v1086_v41 = vadd.f32 1.0, %v4871_v22  ;;  %v1091_v22 = vadd.f32 1.0, %v4881_v28 }
 0x4bd   : > { %v4895_v30 = vpop.eup %4894  ;;  %4914 = vrcp.f32 %v1076_v58  ;;  %v1161_v44 = vmul.f32 %v4893_v25, %v6127_v16  ;;  %v1085_v16 = vadd.f32 1.0, %v4869_v55  ;;  %v1090_v58 = vadd.f32 1.0, %v4879_v18 }
 0x4be   : > { %v4897_v8 = vpop.eup %4896  ;;  %4916 = vrcp.f32 %v1077_v49  ;;  %v1162_v50 = vmul.f32 %v4895_v30, %v6130_v42  ;;  %v6336_v25 = vadd.f32 1.0, %v4891_v37 }
 0x4bf   : > { %v4899_v17 = vpop.eup %4898  ;;  %4918 = vrcp.f32 %v1078_v46  ;;  %v1163_v54 = vmul.f32 %v4897_v8, %v6133_v43  ;;  %1248 = vst [vmem:[#allocation2 + $0x19] sm:$0xff] %v1161_v44  ;;  %v6326_v46 = vadd.f32 1.0, %v4883_v19 }
 0x4c0   : > { %v4901_v7 = vpop.eup %4900  ;;  %4920 = vrcp.f32 %v1079_v15  ;;  %v1164_v21 = vmul.f32 %v4899_v17, %v6139_v47  ;;  %1249 = vst [vmem:[#allocation2 + $0x21] sm:$0xff] %v1162_v50 }
 0x4c1   : > { %v4903_v14 = vpop.eup %4902  ;;  %4922 = vrcp.f32 %v1080_v31  ;;  %v1165_v49 = vmul.f32 %v4901_v7, %v6147_v53  ;;  %1250 = vst [vmem:[#allocation2 + $0x31] sm:$0xff] %v1163_v54 }
 0x4c2   : > { %v4905_v42 = vpop.eup %4904  ;;  %4924 = vrcp.f32 %v1081_v23  ;;  %v1166_v43 = vmul.f32 %v4903_v14, %v6156_v57  ;;  %1251 = vst [vmem:[#allocation2 + $0x39] sm:$0xff] %v1164_v21  ;;  %v6331_v57 = vadd.f32 1.0, %v4887_v59 }
 0x4c3   : > { %v4907_v1 = vpop.eup %4906  ;;  %4926 = vrcp.f32 %v1082_v34  ;;  %v1167_v47 = vmul.f32 %v4905_v42, %v6159_v32  ;;  %1252 = vst [vmem:[#allocation2 + $0x49] sm:$0xff] %v1165_v49  ;;  %v6334_v32 = vadd.f32 1.0, %v4889_v9 }
 0x4c4   : > { %v4909_v55 = vpop.eup %4908  ;;  %4928 = vrcp.f32 %v1083_v61  ;;  %v1168_v53 = vmul.f32 %v4907_v1, %v6171_v20  ;;  %1253 = vst [vmem:[#allocation2 + $0x51] sm:$0xff] %v1166_v43 }
 0x4c5   : > { %v4911_v38 = vpop.eup %4910  ;;  %4930 = vrcp.f32 %v1084_v60  ;;  %v1169_v35 = vmul.f32 %v4909_v55, %v6175_v45  ;;  %1254 = vst [vmem:[#allocation2 + $0x61] sm:$0xff] %v1167_v47 }
 0x4c6   : > { %v4913_v18 = vpop.eup %4912  ;;  %4932 = vrcp.f32 %v1085_v16  ;;  %v1170_v28 = vmul.f32 %v4911_v38, %v6178_v52  ;;  %1255 = vst [vmem:[#allocation2 + $0x69] sm:$0xff] %v1168_v53  ;;  %v6339_v20 = vld [vmem:[#allocation2 + $0x18] sm:$0xff] }
 0x4c7   : > { %v4915_v19 = vpop.eup %4914  ;;  %4934 = vrcp.f32 %v1086_v41  ;;  %v1171_v59 = vmul.f32 %v4913_v18, %v6184_v10  ;;  %1256 = vst [vmem:[#allocation2 + $0x79] sm:$0xff] %v1169_v35  ;;  %v6342_v48 = vld [vmem:[#allocation2 + $0x20] sm:$0xff]  ;;  %v6344_v45 = vld [vmem:[#allocation2 + $0x28] sm:$0x3]  ;;  %v1420_v9 = vrot.slane %v6339_v20, 1 }
 0x4c8   : > { %v4917_v15 = vpop.eup %4916  ;;  %4936 = vrcp.f32 %v1087_v11  ;;  %v1172_v52 = vmul.f32 %v4915_v19, %v6187_v12  ;;  %1257 = vst [vmem:[#allocation2 + $0x81] sm:$0xff] %v1170_v28  ;;  %v6349_v30 = vld [vmem:[#allocation2 + $0x30] sm:$0xff]  ;;  %v1335_v31 = vpack.c.bf16 %v6342_v48, %v6339_v20  ;;  %v1421_v10 = vrot.slane %v6342_v48, 1 }
 0x4c9   : > { %v4919_v44 = vpop.eup %4918  ;;  %4938 = vrcp.f32 %v1088_v26  ;;  %v1173_v8 = vmul.f32 %v4917_v15, %v6191_v51  ;;  %1258 = vst [vmem:[#allocation2 + $0x91] sm:$0xff] %v1171_v59  ;;  %v6355_v23 = vld [vmem:[#allocation2 + $0x38] sm:$0xff]  ;;  %v6357_v50 = vld [vmem:[#allocation2 + $0x40] sm:$0x3]  ;;  %v1423_v17 = vrot.slane %v6344_v45, 1  ;;  %v1425_v12 = vrot.slane %v6349_v30, 1 }
 0x4ca   : > { %v4921_v34 = vpop.eup %4920  ;;  %4940 = vrcp.f32 %v1089_v29  ;;  %v1174_v54 = vmul.f32 %v4919_v44, %v6194_v56  ;;  %1259 = vst [vmem:[#allocation2 + $0x99] sm:$0xff] %v1172_v52  ;;  %v6362_v7 = vld [vmem:[#allocation2 + $0x48] sm:$0xff]  ;;  %v1336_v61 = vpack.c.bf16 %v6355_v23, %v6349_v30  ;;  %1351 = vst [vmem:[#allocation3 + $0x48] sm:$0xff] %v1335_v31  ;;  %v6367_v51 = vsel %vm1414_vm2, %v1420_v9, %v1421_v10 }
 0x4cb   : > { %1705 = vst [vmem:[#allocation3 + $0x18] sm:$0xff] %v1335_v31  ;;  %v4923_v60 = vpop.eup %4922  ;;  %4942 = vrcp.f32 %v1090_v58  ;;  %v1175_v21 = vmul.f32 %v4921_v34, %v6198_v3  ;;  %1260 = vst [vmem:[#allocation2 + $0xa9] sm:$0xff] %v1173_v8  ;;  %v6370_v14 = vld [vmem:[#allocation2 + $0x50] sm:$0xff]  ;;  %v6373_v56 = vsel %vm1414_vm2, %v1421_v10, %v1423_v17  ;;  %v1426_v16 = vrot.slane %v6355_v23, 1  ;;  %v6377_v42 = vld [vmem:[#allocation2 + $0x58] sm:$0x3] }
 0x4cc   : > { %v4925_v41 = vpop.eup %4924  ;;  %4944 = vrcp.f32 %v1091_v22  ;;  %v1176_v49 = vmul.f32 %v4923_v60, %v6201_v0  ;;  %1261 = vst [vmem:[#allocation2 + $0xb1] sm:$0xff] %v1174_v54  ;;  %v6379_v11 = vld [vmem:[#allocation2 + $0x60] sm:$0xff]  ;;  %v1337_v3 = vpack.c.bf16 %v6370_v14, %v6362_v7  ;;  %1352 = vst [vmem:[#allocation3 + $0x90] sm:$0xff] %v1336_v61  ;;  %v1428_v26 = vrot.slane %v6357_v50, 1 }
 0x4cd   : > { %1706 = vst [vmem:[#allocation3 + $0x60] sm:$0xff] %v1336_v61  ;;  %1773 = vst [vmem:[#allocation3 + $0x30] sm:$0xff] %v1336_v61  ;;  %v4927_v43 = vpop.eup %4926  ;;  %4946 = vrcp.f32 %v6326_v46  ;;  %v1177_v1 = vmul.f32 %v4925_v41, %v6205_v36  ;;  %v6386_v0 = vld [vmem:[#allocation2 + $0x68] sm:$0xff]  ;;  %v6389_v29 = vsel %vm1414_vm2, %v1425_v12, %v1426_v16  ;;  %v1430_v58 = vrot.slane %v6362_v7, 1 }
 0x4ce   : > { %1262 = vst [vmem:[#allocation2 + $0xc1] sm:$0xff] %v1175_v21  ;;  %v4929_v47 = vpop.eup %4928  ;;  %4948 = vrcp.f32 %v6329_v6  ;;  %v1178_v55 = vmul.f32 %v4927_v43, %v6208_v4  ;;  %1263 = vst [vmem:[#allocation2 + $0xc9] sm:$0xff] %v1176_v49  ;;  %v6394_v22 = vld [vmem:[#allocation2 + $0x78] sm:$0xff]  ;;  %v1338_v46 = vpack.c.bf16 %v6386_v0, %v6379_v11  ;;  %v6399_v36 = vsel %vm1414_vm2, %v1426_v16, %v1428_v26  ;;  %v6403_v6 = vld [vmem:[#allocation2 + $0x70] sm:$0x3] }
 0x4cf   : > { %1353 = vst [vmem:[#allocation3 + $0xd8] sm:$0xff] %v1337_v3  ;;  %1707 = vst [vmem:[#allocation3 + $0xa8] sm:$0xff] %v1337_v3  ;;  %v4931_v53 = vpop.eup %4930  ;;  %4950 = vrcp.f32 %v6331_v57  ;;  %v1179_v38 = vmul.f32 %v4929_v47, %v6212_v27  ;;  %v6405_v4 = vld [vmem:[#allocation2 + $0x80] sm:$0xff]  ;;  %v1431_v35 = vrot.slane %v6370_v14, 1  ;;  %v1433_v18 = vrot.slane %v6377_v42, 1 }
 0x4d0   : > { %1774 = vst [vmem:[#allocation3 + $0x78] sm:$0xff] %v1337_v3  ;;  %1264 = vst [vmem:[#allocation2 + $0xd9] sm:$0xff] %v1177_v1  ;;  %v4933_v28 = vpop.eup %4932  ;;  %4952 = vrcp.f32 %v6334_v32  ;;  %v1180_v19 = vmul.f32 %v4931_v53, %v6215_v33  ;;  %v6411_v59 = vld [vmem:[#allocation2 + $0x88] sm:$0x3]  ;;  %v6413_v57 = vld [vmem:[#allocation2 + $0x90] sm:$0xff]  ;;  %v1339_v27 = vpack.c.bf16 %v6405_v4, %v6394_v22  ;;  %v1435_v9 = vrot.slane %v6379_v11, 1 }
 0x4d1   : > { %1265 = vst [vmem:[#allocation2 + $0xe1] sm:$0xff] %v1178_v55  ;;  %1354 = vst [vmem:[#allocation3 + $0x120] sm:$0xff] %v1338_v46  ;;  %v4935_v15 = vpop.eup %4934  ;;  %4954 = vrcp.f32 %v6336_v25  ;;  %v1181_v32 = vmul.f32 %v4933_v28, %v6219_v62  ;;  %v6420_v33 = vld [vmem:[#allocation2 + $0x98] sm:$0xff]  ;;  %v6423_v52 = vsel %vm1414_vm2, %v1430_v58, %v1431_v35  ;;  %v6426_v31 = vsel %vm1414_vm2, %v1431_v35, %v1433_v18  ;;  %v6436_v54 = vld [vmem:[#allocation2 + $0xa0] sm:$0x3] }
 0x4d2   : > { %1708 = vst [vmem:[#allocation3 + $0xf0] sm:$0xff] %v1338_v46  ;;  %1775 = vst [vmem:[#allocation3 + $0xc0] sm:$0xff] %v1338_v46  ;;  %v4937_v10 = vpop.eup %4936  ;;  %v1182_v44 = vmul.f32 %v4935_v15, %v6222_v2  ;;  %v6429_v8 = vld [vmem:[#allocation2 + $0xa8] sm:$0xff]  ;;  %v1340_v25 = vpack.c.bf16 %v6420_v33, %v6413_v57  ;;  %v1436_v62 = vrot.slane %v6386_v0, 1  ;;  %v1438_v17 = vrot.slane %v6403_v6, 1 }
 0x4d3   : > { %1266 = vst [vmem:[#allocation2 + $0xf1] sm:$0xff] %v1179_v38  ;;  %1267 = vst [vmem:[#allocation2 + $0xf9] sm:$0xff] %v1180_v19  ;;  %v4939_v12 = vpop.eup %4938  ;;  %v1183_v34 = vmul.f32 %v4937_v10, %v6226_v24  ;;  %v6438_v2 = vld [vmem:[#allocation2 + $0xb0] sm:$0xff]  ;;  %v1440_v61 = vrot.slane %v6394_v22, 1  ;;  %v1441_v60 = vrot.slane %v6405_v4, 1  ;;  %v1443_v21 = vrot.slane %v6411_v59, 1 }
 0x4d4   : > { %1355 = vst [vmem:[#allocation3 + $0x168] sm:$0xff] %v1339_v27  ;;  %1709 = vst [vmem:[#allocation3 + $0x138] sm:$0xff] %v1339_v27  ;;  %v4941_v16 = vpop.eup %4940  ;;  %v1184_v41 = vmul.f32 %v4939_v12, %v6256_v13  ;;  %v6444_v49 = vld [vmem:[#allocation2 + $0xb8] sm:$0x3]  ;;  %v1341_v24 = vpack.c.bf16 %v6438_v2, %v6429_v8  ;;  %v6451_v26 = vsel %vm1414_vm2, %v1435_v9, %v1436_v62  ;;  %v1445_v46 = vrot.slane %v6413_v57, 1 }
 0x4d5   : > { %1776 = vst [vmem:[#allocation3 + $0x108] sm:$0xff] %v1339_v27  ;;  %1268 = vst [vmem:[#allocation2 + $0x109] sm:$0xff] %v1181_v32  ;;  %v6446_v3 = vld [vmem:[#allocation2 + $0xc0] sm:$0xff]  ;;  %v6454_v43 = vsel %vm1414_vm2, %v1436_v62, %v1438_v17  ;;  %v4943_v1 = vpop.eup %4942  ;;  %v1185_v13 = vmul.f32 %v4941_v16, %v6265_v63  ;;  %v6457_v58 = vld [vmem:[#allocation2 + $0xc8] sm:$0xff]  ;;  %v6460_v47 = vsel %vm1414_vm2, %v1440_v61, %v1441_v60  ;;  %v1446_v18 = vrot.slane %v6420_v33, 1 }
 0x4d6   : > { %1269 = vst [vmem:[#allocation2 + $0x111] sm:$0xff] %v1182_v44  ;;  %7366 = vst [vmem:[#allocation23_spill] sm:$0xff] %v6446_v3  ;;  %v6463_v55 = vsel %vm1414_vm2, %v1441_v60, %v1443_v21  ;;  %v4945_v53 = vpop.eup %4944  ;;  %v1186_v38 = vmul.f32 %v4943_v1, %v6274_v40  ;;  %v1342_v63 = vpack.c.bf16 %v6457_v58, %v6446_v3  ;;  %v1448_v28 = vrot.slane %v6436_v54, 1  ;;  %v6474_v9 = vld [vmem:[#allocation2 + $0xd0] sm:$0x3] }
 0x4d7   : > { %1356 = vst [vmem:[#allocation3 + $0x1b0] sm:$0xff] %v1340_v25  ;;  %1710 = vst [vmem:[#allocation3 + $0x180] sm:$0xff] %v1340_v25  ;;  %v6467_v35 = vld [vmem:[#allocation2 + $0xd8] sm:$0xff]  ;;  %v4947_v19 = vpop.eup %4946  ;;  %v1187_v27 = vmul.f32 %v4945_v53, %v6281_v5  ;;  %v1450_v15 = vrot.slane %v6429_v8, 1  ;;  %v1451_v32 = vrot.slane %v6438_v2, 1  ;;  %v1453_v10 = vrot.slane %v6444_v49, 1 }
 0x4d8   : > { %1777 = vst [vmem:[#allocation3 + $0x150] sm:$0xff] %v1340_v25  ;;  %1270 = vst [vmem:[#allocation2 + $0x121] sm:$0xff] %v1183_v34  ;;  %v6476_v40 = vld [vmem:[#allocation2 + $0xe0] sm:$0xff]  ;;  %v4949_v44 = vpop.eup %4948  ;;  %v1188_v25 = vmul.f32 %v4947_v19, %v6288_v39  ;;  %v6482_v62 = vld [vmem:[#allocation2 + $0xe8] sm:$0x3]  ;;  %v6489_v12 = vsel %vm1414_vm2, %v1445_v46, %v1446_v18  ;;  %v6492_v34 = vsel %vm1414_vm2, %v1446_v18, %v1448_v28  ;;  %v1458_v18 = vrot.slane %v6474_v9, 1 }
 0x4d9   : > { %7367 = vst [vmem:[#allocation24_spill] sm:$0xff] %v6457_v58  ;;  %1271 = vst [vmem:[#allocation2 + $0x129] sm:$0xff] %v1184_v41  ;;  %v1343_v5 = vpack.c.bf16 %v6476_v40, %v6467_v35  ;;  %v4951_v61 = vpop.eup %4950  ;;  %v7373_v60 = vld [vmem:[#allocation19_spill] sm:$0xff]  ;;  %v6498_v16 = vsel %vm1414_vm2, %v1450_v15, %v1451_v32  ;;  %v6501_v41 = vsel %vm1414_vm2, %v1451_v32, %v1453_v10  ;;  %v7377_v19 = vld [vmem:[#allocation21_spill] sm:$0xff]  ;;  %v1460_v10 = vrot.slane %v6467_v35, 1 }
 0x4da   : > { %7368 = vst [vmem:[#allocation25_spill] sm:$0xff] %v6467_v35  ;;  %1357 = vst [vmem:[#allocation3 + $0x1f8] sm:$0xff] %v1341_v24  ;;  %v6484_v17 = vld [vmem:[#allocation2 + $0xf0] sm:$0xff]  ;;  %v1189_v39 = vmul.f32 %v4949_v44, %v7373_v60  ;;  %v6495_v21 = vld [vmem:[#allocation2 + $0xf8] sm:$0xff]  ;;  %v4953_v1 = vpop.eup %4952  ;;  %v1461_v44 = vrot.slane %v6476_v40, 1 }
 0x4db   : > { %1711 = vst [vmem:[#allocation3 + $0x1c8] sm:$0xff] %v1341_v24  ;;  %1778 = vst [vmem:[#allocation3 + $0x198] sm:$0xff] %v1341_v24  ;;  %v1455_v24 = vrot.slane %v6446_v3, 1  ;;  %v4955_v28 = vpop.eup %4954  ;;  %v6512_v15 = vld [vmem:[#allocation2 + $0x100] sm:$0x3] }
 0x4dc   : > { %1272 = vst [vmem:[#allocation2 + $0x139] sm:$0xff] %v1185_v13  ;;  %7369 = vst [vmem:[#allocation26_spill] sm:$0xff] %v6474_v9  ;;  %v7375_v13 = vld [vmem:[#allocation20_spill] sm:$0xff]  ;;  %v6505_v53 = vld [vmem:[#allocation2 + $0x108] sm:$0xff] }
 0x4dd   : > { %7370 = vst [vmem:[#allocation27_spill] sm:$0xff] %v6476_v40  ;;  %1273 = vst [vmem:[#allocation2 + $0x141] sm:$0xff] %v1186_v38  ;;  %v1190_v46 = vmul.f32 %v4951_v61, %v7375_v13  ;;  %v1344_v38 = vpack.c.bf16 %v6495_v21, %v6484_v17  ;;  %v6514_v32 = vld [vmem:[#allocation2 + $0x110] sm:$0xff]  ;;  %v7380_v61 = vld [vmem:[#allocation22_spill] sm:$0xff] }
 0x4de   : > { %7371 = vst [vmem:[#allocation28_spill] sm:$0xff] %v6482_v62  ;;  %7372 = vst [vmem:[#allocation29_spill] sm:$0xff] %v6484_v17  ;;  %v1192_v60 = vmul.f32 %v4955_v28, %v7380_v61  ;;  %v6520_v13 = vld [vmem:[#allocation2 + $0x118] sm:$0x3]  ;;  %v6537_v28 = vsel %vm1414_vm2, %v1460_v10, %v1461_v44  ;;  %v1471_v10 = vrot.slane %v6514_v32, 1 }
 0x4df   : > { %1358 = vst [vmem:[#allocation3 + $0x240] sm:$0xff] %v1342_v63  ;;  %1712 = vst [vmem:[#allocation3 + $0x210] sm:$0xff] %v1342_v63 }
 0x4e0   : > { %1779 = vst [vmem:[#allocation3 + $0x1e0] sm:$0xff] %v1342_v63  ;;  %1274 = vst [vmem:[#allocation2 + $0x151] sm:$0xff] %v1187_v27  ;;  %v1456_v63 = vrot.slane %v6457_v58, 1  ;;  %v1191_v27 = vmul.f32 %v4953_v1, %v7377_v19  ;;  %v6532_v37 = vld [vmem:[#allocation2 + $0x128] sm:$0xff] }
 0x4e1   : > { %7374 = vst [vmem:[#allocation19_spill] sm:$0xff] %v6495_v21  ;;  %1275 = vst [vmem:[#allocation2 + $0x159] sm:$0xff] %v1188_v25  ;;  %v1463_v25 = vrot.slane %v6482_v62, 1  ;;  %v1465_v62 = vrot.slane %v6484_v17, 1  ;;  %v1476_v40 = vrot.slane %v6532_v37, 1 }
 0x4e2   : > { %7376 = vst [vmem:[#allocation20_spill] sm:$0xff] %v6505_v53  ;;  %1359 = vst [vmem:[#allocation3 + $0x288] sm:$0xff] %v1343_v5  ;;  %v6527_v1 = vsel %vm1414_vm2, %v1455_v24, %v1456_v63  ;;  %v6530_v19 = vsel %vm1414_vm2, %v1456_v63, %v1458_v18  ;;  %v1466_v24 = vrot.slane %v6495_v21, 1  ;;  %v1468_v18 = vrot.slane %v6512_v15, 1 }
 0x4e3   : > { %1713 = vst [vmem:[#allocation3 + $0x258] sm:$0xff] %v1343_v5  ;;  %1780 = vst [vmem:[#allocation3 + $0x228] sm:$0xff] %v1343_v5  ;;  %v6522_v5 = vld [vmem:[#allocation2 + $0x120] sm:$0xff]  ;;  %v6540_v61 = vsel %vm1414_vm2, %v1461_v44, %v1463_v25  ;;  %v6544_v63 = vld [vmem:[#allocation2 + $0x138] sm:$0xff]  ;;  %v1473_v21 = vrot.slane %v6520_v13, 1 }
 0x4e4   : > { %1276 = vst [vmem:[#allocation2 + $0x169] sm:$0xff] %v1189_v39  ;;  %7378 = vst [vmem:[#allocation21_spill] sm:$0xff] %v6512_v15  ;;  %v1345_v39 = vpack.c.bf16 %v6514_v32, %v6505_v53  ;;  %v6551_v44 = vld [vmem:[#allocation2 + $0x140] sm:$0xff]  ;;  %v6553_v25 = vld [vmem:[#allocation2 + $0x148] sm:$0x3]  ;;  %v1475_v17 = vrot.slane %v6522_v5, 1 }
 0x4e5   : > { %7379 = vst [vmem:[#allocation30_spill] sm:$0xff] %v6514_v32  ;;  %1277 = vst [vmem:[#allocation2 + $0x171] sm:$0xff] %v1190_v46  ;;  %v6534_v46 = vld [vmem:[#allocation2 + $0x130] sm:$0x3]  ;;  %v1480_v9 = vrot.slane %v6544_v63, 1  ;;  %v1481_v58 = vrot.slane %v6551_v44, 1 }
 0x4e6   : > { %7381 = vst [vmem:[#allocation22_spill] sm:$0xff] %v6520_v13  ;;  %7382 = vst [vmem:[#allocation31_spill] sm:$0xff] %v6522_v5  ;;  %v1478_v15 = vrot.slane %v6534_v46, 1 }
 0x4e7   : > { %1360 = vst [vmem:[#allocation3 + $0x2d0] sm:$0xff] %v1344_v38  ;;  %1714 = vst [vmem:[#allocation3 + $0x2a0] sm:$0xff] %v1344_v38  ;;  %v6559_v35 = vld [vmem:[#allocation2 + $0x150] sm:$0xff] }
 0x4e8   : > { %1781 = vst [vmem:[#allocation3 + $0x270] sm:$0xff] %v1344_v38  ;;  %1278 = vst [vmem:[#allocation2 + $0x181] sm:$0xff] %v1191_v27  ;;  %v1346_v38 = vpack.c.bf16 %v6532_v37, %v6522_v5  ;;  %v1470_v27 = vrot.slane %v6505_v53, 1  ;;  %v1347_v53 = vpack.c.bf16 %v6551_v44, %v6544_v63  ;;  %v6568_v13 = vld [vmem:[#allocation2 + $0x160] sm:$0x3]  ;;  %v1477_v5 = vsel %vm1414_vm2, %v1475_v17, %v1476_v40 }
 0x4e9   : > { %7383 = vst [vmem:[#allocation32_spill] sm:$0xff] %v6532_v37  ;;  %7384 = vst [vmem:[#allocation33_spill] sm:$0xff] %v6534_v46  ;;  %v1474_v37 = vsel %vm1414_vm2, %v1471_v10, %v1473_v21 }
 0x4ea   : > { %1279 = vst [vmem:[#allocation2 + $0x189] sm:$0xff] %v1192_v60  ;;  %7385 = vst [vmem:[#allocation34_spill] sm:$0xff] %v6544_v63  ;;  %v1467_v60 = vsel %vm1414_vm2, %v1465_v62, %v1466_v24  ;;  %v1472_v32 = vsel %vm1414_vm2, %v1470_v27, %v1471_v10  ;;  %v6566_v62 = vld [vmem:[#allocation2 + $0x158] sm:$0xff]  ;;  %v1485_v27 = vrot.slane %v6559_v35, 1  ;;  %v1482_v10 = vsel %vm1414_vm2, %v1480_v9, %v1481_v58 }
 0x4eb   : > { %1361 = vst [vmem:[#allocation3 + $0x318] sm:$0xff] %v1345_v39  ;;  %1715 = vst [vmem:[#allocation3 + $0x2e8] sm:$0xff] %v1345_v39  ;;  %v6574_v3 = vld [vmem:[#allocation2 + $0x168] sm:$0xff]  ;;  %v1488_v63 = vrot.slane %v6568_v13, 1 }
 0x4ec   : > { %1782 = vst [vmem:[#allocation3 + $0x2b8] sm:$0xff] %v1345_v39  ;;  %7386 = vst [vmem:[#allocation35_spill] sm:$0xff] %v6551_v44  ;;  %v1469_v39 = vsel %vm1414_vm2, %v1466_v24, %v1468_v18  ;;  %v1348_v24 = vpack.c.bf16 %v6566_v62, %v6559_v35  ;;  %v1483_v18 = vrot.slane %v6553_v25, 1  ;;  %v6581_v21 = vld [vmem:[#allocation2 + $0x170] sm:$0xff]  ;;  %v6583_v17 = vld [vmem:[#allocation2 + $0x178] sm:$0x3] }
 0x4ed   : > { %7387 = vst [vmem:[#allocation36_spill] sm:$0xff] %v6553_v25  ;;  %7388 = vst [vmem:[#allocation37_spill] sm:$0xff] %v6559_v35  ;;  %v1486_v44 = vrot.slane %v6566_v62, 1  ;;  %v1490_v46 = vrot.slane %v6574_v3, 1  ;;  %v1493_v35 = vrot.slane %v6583_v17, 1  ;;  %v1529_v25 = vpack.c.bf16 %v6399_v36, %v6389_v29 }
 0x4ee   : > { %1362 = vst [vmem:[#allocation3 + $0x360] sm:$0xff] %v1346_v38  ;;  %1716 = vst [vmem:[#allocation3 + $0x330] sm:$0xff] %v1346_v38  ;;  %v1535_v29 = vpack.c.bf16 %v6530_v19, %v6527_v1  ;;  %v1536_v36 = vpack.c.bf16 %v6540_v61, %v6537_v28  ;;  %v1586_v1 = vrot.slane %v6405_v4, 2  ;;  %v1588_v19 = vrot.slane %v6411_v59, 2 }
 0x4ef   : > { %1783 = vst [vmem:[#allocation3 + $0x300] sm:$0xff] %v1346_v38  ;;  %7389 = vst [vmem:[#allocation38_spill] sm:$0xff] %v6566_v62  ;;  %v1479_v38 = vsel %vm1414_vm2, %v1476_v40, %v1478_v15  ;;  %v1349_v40 = vpack.c.bf16 %v6581_v21, %v6574_v3  ;;  %v1484_v15 = vsel %vm1414_vm2, %v1481_v58, %v1483_v18  ;;  %v1591_v61 = vrot.slane %v6420_v33, 2 }
 0x4f0   : > { %7390 = vst [vmem:[#allocation39_spill] sm:$0xff] %v6568_v13  ;;  %7391 = vst [vmem:[#allocation40_spill] sm:$0xff] %v6574_v3  ;;  %v1487_v9 = vsel %vm1414_vm2, %v1485_v27, %v1486_v44  ;;  %v1489_v62 = vsel %vm1414_vm2, %v1486_v44, %v1488_v63  ;;  %v1528_v13 = vpack.c.bf16 %v6373_v56, %v6367_v51  ;;  %v1593_v44 = vrot.slane %v6436_v54, 2 }
 0x4f1   : > { %1363 = vst [vmem:[#allocation3 + $0x3a8] sm:$0xff] %v1347_v53  ;;  %1717 = vst [vmem:[#allocation3 + $0x378] sm:$0xff] %v1347_v53  ;;  %v1530_v18 = vpack.c.bf16 %v6426_v31, %v6423_v52  ;;  %v1532_v63 = vpack.c.bf16 %v6463_v55, %v6460_v47  ;;  %v1533_v51 = vpack.c.bf16 %v6492_v34, %v6489_v12  ;;  %v1571_v12 = vrot.slane %v6355_v23, 2 }
 0x4f2   : > { %1784 = vst [vmem:[#allocation3 + $0x348] sm:$0xff] %v1347_v53  ;;  %1364 = vst [vmem:[#allocation3 + $0x3f0] sm:$0xff] %v1348_v24  ;;  %v1491_v53 = vrot.slane %v6581_v21, 1  ;;  %v1534_v56 = vpack.c.bf16 %v6501_v41, %v6498_v16  ;;  %v1537_v52 = vpack.c.bf16 %v1469_v39, %v1467_v60  ;;  %v1538_v31 = vpack.c.bf16 %v1474_v37, %v1472_v32  ;;  %v7393_v60 = vld [vmem:[#allocation23_spill] sm:$0xff] }
 0x4f3   : > { %1718 = vst [vmem:[#allocation3 + $0x3c0] sm:$0xff] %v1348_v24  ;;  %1785 = vst [vmem:[#allocation3 + $0x390] sm:$0xff] %v1348_v24  ;;  %v1531_v24 = vpack.c.bf16 %v6454_v43, %v6451_v26  ;;  %v1539_v26 = vpack.c.bf16 %v1479_v38, %v1477_v5  ;;  %v1540_v43 = vpack.c.bf16 %v1484_v15, %v1482_v10  ;;  %v1568_v37 = vrot.slane %v6344_v45, 2  ;;  %v7395_v38 = vld [vmem:[#allocation26_spill] sm:$0xff]  ;;  %v7396_v10 = vld [vmem:[#allocation25_spill] sm:$0xff] }
 0x4f4   : > { %1365 = vst [vmem:[#allocation3 + $0x438] sm:$0xff] %v1349_v40  ;;  %v1492_v3 = vsel %vm1414_vm2, %v1490_v46, %v1491_v53  ;;  %v1494_v58 = vsel %vm1414_vm2, %v1491_v53, %v1493_v35  ;;  %1719 = vst [vmem:[#allocation3 + $0x408] sm:$0xff] %v1349_v40  ;;  %v1541_v47 = vpack.c.bf16 %v1489_v62, %v1487_v9  ;;  %v1566_v35 = vrot.slane %v6342_v48, 2  ;;  %v7394_v62 = vld [vmem:[#allocation24_spill] sm:$0xff]  ;;  %v7397_v15 = vld [vmem:[#allocation27_spill] sm:$0xff] }
 0x4f5   : > { %1786 = vst [vmem:[#allocation3 + $0x3d8] sm:$0xff] %v1349_v40  ;;  %1544 = vst [vmem:[#allocation3 + $0x50] sm:$0xff] %v1528_v13  ;;  %v1542_v55 = vpack.c.bf16 %v1494_v58, %v1492_v3  ;;  %v1570_v3 = vrot.slane %v6349_v30, 2  ;;  %v1573_v48 = vrot.slane %v6357_v50, 2  ;;  %v7392_v34 = vrot.slane %v6339_v20, 2  ;;  %v7398_v53 = vld [vmem:[#allocation28_spill] sm:$0xff] }
 0x4f6   : > { %1545 = vst [vmem:[#allocation3 + $0x98] sm:$0xff] %v1529_v25  ;;  %1732 = vst [vmem:[#allocation3 + $0x20] sm:$0xff] %v1528_v13  ;;  %v1575_v30 = vrot.slane %v6362_v7, 2  ;;  %v1576_v23 = vrot.slane %v6370_v14, 2  ;;  %v1578_v50 = vrot.slane %v6377_v42, 2  ;;  %v6630_v16 = vsel %vm1559_vm3, %v1566_v35, %v1568_v37  ;;  %v7399_v58 = vld [vmem:[#allocation29_spill] sm:$0xff] }
 0x4f7   : > { %1733 = vst [vmem:[#allocation3 + $0x68] sm:$0xff] %v1529_v25  ;;  %1800 = vst [vmem:[#allocation3 + $0x38] sm:$0xff] %v1529_v25  ;;  %v6624_v45 = vsel %vm1559_vm3, %v7392_v34, %v1566_v35  ;;  %v6633_v20 = vsel %vm1559_vm3, %v1570_v3, %v1571_v12  ;;  %v6636_v41 = vsel %vm1559_vm3, %v1571_v12, %v1573_v48  ;;  %v1580_v7 = vrot.slane %v6379_v11, 2  ;;  %v7404_v37 = vld [vmem:[#allocation22_spill] sm:$0xff]  ;;  %v7405_v12 = vld [vmem:[#allocation31_spill] sm:$0xff] }
 0x4f8   : > { %1546 = vst [vmem:[#allocation3 + $0xe0] sm:$0xff] %v1530_v18  ;;  %1547 = vst [vmem:[#allocation3 + $0x128] sm:$0xff] %v1531_v24  ;;  %v1577_v14 = vsel %vm1559_vm3, %v1575_v30, %v1576_v23  ;;  %v1579_v42 = vsel %vm1559_vm3, %v1576_v23, %v1578_v50  ;;  %v1581_v32 = vrot.slane %v6386_v0, 2  ;;  %v1583_v13 = vrot.slane %v6403_v6, 2  ;;  %v7406_v30 = vld [vmem:[#allocation32_spill] sm:$0xff]  ;;  %v7407_v50 = vld [vmem:[#allocation33_spill] sm:$0xff] }
 0x4f9   : > { %1734 = vst [vmem:[#allocation3 + $0xb0] sm:$0xff] %v1530_v18  ;;  %1735 = vst [vmem:[#allocation3 + $0xf8] sm:$0xff] %v1531_v24  ;;  %v1585_v5 = vrot.slane %v6394_v22, 2  ;;  %v1590_v46 = vrot.slane %v6413_v57, 2  ;;  %v1589_v6 = vsel %vm1559_vm3, %v1586_v1, %v1588_v19  ;;  %v1595_v22 = vrot.slane %v6429_v8, 2 }
 0x4fa   : > { %1801 = vst [vmem:[#allocation3 + $0x80] sm:$0xff] %v1530_v18  ;;  %1802 = vst [vmem:[#allocation3 + $0xc8] sm:$0xff] %v1531_v24  ;;  %v1582_v28 = vsel %vm1559_vm3, %v1580_v7, %v1581_v32  ;;  %v1584_v11 = vsel %vm1559_vm3, %v1581_v32, %v1583_v13  ;;  %v1596_v4 = vrot.slane %v6438_v2, 2  ;;  %v1594_v57 = vsel %vm1559_vm3, %v1591_v61, %v1593_v44  ;;  %v7408_v32 = vld [vmem:[#allocation34_spill] sm:$0xff]  ;;  %v7411_v44 = vld [vmem:[#allocation37_spill] sm:$0xff] }
 0x4fb   : > { %1548 = vst [vmem:[#allocation3 + $0x170] sm:$0xff] %v1532_v63  ;;  %1549 = vst [vmem:[#allocation3 + $0x1b8] sm:$0xff] %v1533_v51  ;;  %v1587_v0 = vsel %vm1559_vm3, %v1585_v5, %v1586_v1  ;;  %v1592_v59 = vsel %vm1559_vm3, %v1590_v46, %v1591_v61  ;;  %v1598_v25 = vrot.slane %v6444_v49, 2  ;;  %v1600_v39 = vrot.slane %v7393_v60, 2  ;;  %v7409_v1 = vld [vmem:[#allocation35_spill] sm:$0xff]  ;;  %v7410_v46 = vld [vmem:[#allocation36_spill] sm:$0xff] }
 0x4fc   : > { %1550 = vst [vmem:[#allocation3 + $0x200] sm:$0xff] %v1534_v56  ;;  %1551 = vst [vmem:[#allocation3 + $0x248] sm:$0xff] %v1535_v29  ;;  %v1597_v33 = vsel %vm1559_vm3, %v1595_v22, %v1596_v4  ;;  %v1601_v54 = vrot.slane %v7394_v62, 2  ;;  %v1603_v27 = vrot.slane %v7395_v38, 2  ;;  %v1605_v40 = vrot.slane %v7396_v10, 2  ;;  %v7412_v60 = vld [vmem:[#allocation38_spill] sm:$0xff] }
 0x4fd   : > { %1736 = vst [vmem:[#allocation3 + $0x140] sm:$0xff] %v1532_v63  ;;  %1737 = vst [vmem:[#allocation3 + $0x188] sm:$0xff] %v1533_v51  ;;  %v1599_v8 = vsel %vm1559_vm3, %v1596_v4, %v1598_v25  ;;  %v1606_v2 = vrot.slane %v7397_v15, 2  ;;  %v1608_v9 = vrot.slane %v7398_v53, 2  ;;  %v1610_v18 = vrot.slane %v7399_v58, 2  ;;  %v7413_v62 = vld [vmem:[#allocation39_spill] sm:$0xff] }
 0x4fe   : > { %1738 = vst [vmem:[#allocation3 + $0x1d0] sm:$0xff] %v1534_v56  ;;  %1739 = vst [vmem:[#allocation3 + $0x218] sm:$0xff] %v1535_v29  ;;  %v1602_v49 = vsel %vm1559_vm3, %v1600_v39, %v1601_v54  ;;  %v1604_v24 = vsel %vm1559_vm3, %v1601_v54, %v1603_v27  ;;  %v1618_v3 = vrot.slane %v7404_v37, 2  ;;  %v1620_v48 = vrot.slane %v7405_v12, 2  ;;  %v7414_v10 = vld [vmem:[#allocation40_spill] sm:$0xff] }
 0x4ff   : > { %1803 = vst [vmem:[#allocation3 + $0x110] sm:$0xff] %v1532_v63  ;;  %1804 = vst [vmem:[#allocation3 + $0x158] sm:$0xff] %v1533_v51  ;;  %v7400_v63 = vld [vmem:[#allocation19_spill] sm:$0xff]  ;;  %v1621_v23 = vrot.slane %v7406_v30, 2  ;;  %v1623_v7 = vrot.slane %v7407_v50, 2  ;;  %v1625_v13 = vrot.slane %v7408_v32, 2  ;;  %v1673_v58 = vpack.c.bf16 %v6630_v16, %v6624_v45 }
 0x500   : > { %1805 = vst [vmem:[#allocation3 + $0x1a0] sm:$0xff] %v1534_v56  ;;  %1806 = vst [vmem:[#allocation3 + $0x1e8] sm:$0xff] %v1535_v29  ;;  %v1611_v51 = vrot.slane %v7400_v63, 2  ;;  %v7401_v56 = vld [vmem:[#allocation21_spill] sm:$0xff]  ;;  %v1626_v19 = vrot.slane %v7409_v1, 2  ;;  %v1628_v61 = vrot.slane %v7410_v46, 2  ;;  %v1674_v63 = vpack.c.bf16 %v6636_v41, %v6633_v20 }
 0x501   : > { %1552 = vst [vmem:[#allocation3 + $0x290] sm:$0xff] %v1536_v36  ;;  %1553 = vst [vmem:[#allocation3 + $0x2d8] sm:$0xff] %v1537_v52  ;;  %v1613_v29 = vrot.slane %v7401_v56, 2  ;;  %v1630_v22 = vrot.slane %v7411_v44, 2  ;;  %v1622_v4 = vsel %vm1559_vm3, %v1620_v48, %v1621_v23  ;;  %v1624_v25 = vsel %vm1559_vm3, %v1621_v23, %v1623_v7 }
 0x502   : > { %1554 = vst [vmem:[#allocation3 + $0x320] sm:$0xff] %v1538_v31  ;;  %1555 = vst [vmem:[#allocation3 + $0x368] sm:$0xff] %v1539_v26  ;;  %v1631_v39 = vrot.slane %v7412_v60, 2  ;;  %v1633_v54 = vrot.slane %v7413_v62, 2  ;;  %v1627_v38 = vsel %vm1559_vm3, %v1625_v13, %v1626_v19  ;;  %v1629_v27 = vsel %vm1559_vm3, %v1626_v19, %v1628_v61 }
 0x503   : > { %1740 = vst [vmem:[#allocation3 + $0x260] sm:$0xff] %v1536_v36  ;;  %1741 = vst [vmem:[#allocation3 + $0x2a8] sm:$0xff] %v1537_v52  ;;  %v1614_v35 = vsel %vm1559_vm3, %v1611_v51, %v1613_v29  ;;  %v1636_v15 = vrot.slane %v6581_v21, 2  ;;  %v1676_v56 = vpack.c.bf16 %v1584_v11, %v1582_v28  ;;  %v6703_v29 = vld [vmem:[#allocation2 + $0x180] sm:$0xff]  ;;  %v6707_v21 = vld [vmem:[#allocation2 + $0x190] sm:$0x3]  ;;  %v1680_v45 = vpack.c.bf16 %v1604_v24, %v1602_v49 }
 0x504   : > { %1742 = vst [vmem:[#allocation3 + $0x2f0] sm:$0xff] %v1538_v31  ;;  %1743 = vst [vmem:[#allocation3 + $0x338] sm:$0xff] %v1539_v26  ;;  %v1634_v53 = vsel %vm1559_vm3, %v1631_v39, %v1633_v54  ;;  %v1684_v20 = vpack.c.bf16 %v1624_v25, %v1622_v4  ;;  %v1685_v41 = vpack.c.bf16 %v1629_v27, %v1627_v38  ;;  %v1724_v11 = vrot.slane %v6703_v29, 1 }
 0x505   : > { %1807 = vst [vmem:[#allocation3 + $0x230] sm:$0xff] %v1536_v36  ;;  %1808 = vst [vmem:[#allocation3 + $0x278] sm:$0xff] %v1537_v52  ;;  %v1607_v36 = vsel %vm1559_vm3, %v1605_v40, %v1606_v2  ;;  %v1609_v52 = vsel %vm1559_vm3, %v1606_v2, %v1608_v9  ;;  %v1635_v40 = vrot.slane %v7414_v10, 2  ;;  %v1632_v2 = vsel %vm1559_vm3, %v1630_v22, %v1631_v39 }
 0x506   : > { %1809 = vst [vmem:[#allocation3 + $0x2c0] sm:$0xff] %v1538_v31  ;;  %1810 = vst [vmem:[#allocation3 + $0x308] sm:$0xff] %v1539_v26  ;;  %v7402_v31 = vld [vmem:[#allocation20_spill] sm:$0xff]  ;;  %v1638_v9 = vrot.slane %v6583_v17, 2  ;;  %v1678_v17 = vpack.c.bf16 %v1594_v57, %v1592_v59  ;;  %v1681_v16 = vpack.c.bf16 %v1609_v52, %v1607_v36  ;;  %v1748_v59 = vrot.slane %v6703_v29, 2 }
 0x507   : > { %1556 = vst [vmem:[#allocation3 + $0x3b0] sm:$0xff] %v1540_v43  ;;  %1557 = vst [vmem:[#allocation3 + $0x3f8] sm:$0xff] %v1541_v47  ;;  %v1615_v26 = vrot.slane %v7402_v31, 2  ;;  %v6705_v31 = vld [vmem:[#allocation2 + $0x188] sm:$0xff] }
 0x508   : > { %1558 = vst [vmem:[#allocation3 + $0x440] sm:$0xff] %v1542_v55  ;;  %1744 = vst [vmem:[#allocation3 + $0x380] sm:$0xff] %v1540_v43  ;;  %v1704_v28 = vpack.c.bf16 %v6705_v31, %v6703_v29  ;;  %v1749_v57 = vrot.slane %v6705_v31, 2 }
 0x509   : > { %1745 = vst [vmem:[#allocation3 + $0x3c8] sm:$0xff] %v1541_v47  ;;  %1746 = vst [vmem:[#allocation3 + $0x410] sm:$0xff] %v1542_v55 }
 0x50a   : > { %1811 = vst [vmem:[#allocation3 + $0x350] sm:$0xff] %v1540_v43  ;;  %1812 = vst [vmem:[#allocation3 + $0x398] sm:$0xff] %v1541_v47  ;;  %v7403_v43 = vld [vmem:[#allocation30_spill] sm:$0xff]  ;;  %v1750_v36 = vsel %vm1559_vm3, %v1748_v59, %v1749_v57 }
 0x50b   : > { %1813 = vst [vmem:[#allocation3 + $0x3e0] sm:$0xff] %v1542_v55  ;;  %v1616_v47 = vrot.slane %v7403_v43, 2  ;;  %v1612_v55 = vsel %vm1559_vm3, %v1610_v18, %v1611_v51  ;;  %v1637_v18 = vsel %vm1559_vm3, %v1635_v40, %v1636_v15  ;;  %v1675_v51 = vpack.c.bf16 %v1579_v42, %v1577_v14  ;;  %1689 = vst [vmem:[#allocation3 + $0x58] sm:$0xff] %v1673_v58 }
 0x50c   : > { %v1677_v43 = vpack.c.bf16 %v1589_v6, %v1587_v0  ;;  %1756 = vst [vmem:[#allocation3 + $0x28] sm:$0xff] %v1673_v58  ;;  %v1682_v37 = vpack.c.bf16 %v1614_v35, %v1612_v55  ;;  %1690 = vst [vmem:[#allocation3 + $0xa0] sm:$0xff] %v1674_v63  ;;  %v1686_v14 = vpack.c.bf16 %v1634_v53, %v1632_v2  ;;  %v1725_v0 = vrot.slane %v6705_v31, 1 }
 0x50d   : > { %v1617_v34 = vsel %vm1559_vm3, %v1615_v26, %v1616_v47  ;;  %v1619_v5 = vsel %vm1559_vm3, %v1616_v47, %v1618_v3  ;;  %v1639_v26 = vsel %vm1559_vm3, %v1636_v15, %v1638_v9  ;;  %v1679_v47 = vpack.c.bf16 %v1599_v8, %v1597_v33  ;;  %1691 = vst [vmem:[#allocation3 + $0xe8] sm:$0xff] %v1675_v51 }
 0x50e   : > { %v1683_v3 = vpack.c.bf16 %v1619_v5, %v1617_v34  ;;  %1692 = vst [vmem:[#allocation3 + $0x130] sm:$0xff] %v1676_v56  ;;  %1757 = vst [vmem:[#allocation3 + $0x70] sm:$0xff] %v1674_v63  ;;  %v1687_v42 = vpack.c.bf16 %v1639_v26, %v1637_v18  ;;  %v1727_v6 = vrot.slane %v6707_v21, 1  ;;  %v1751_v33 = vrot.slane %v6707_v21, 2 }
 0x50f   : > { %1758 = vst [vmem:[#allocation3 + $0xb8] sm:$0xff] %v1675_v51  ;;  %1759 = vst [vmem:[#allocation3 + $0x100] sm:$0xff] %v1676_v56  ;;  %v1726_v8 = vsel %vm1414_vm2, %v1724_v11, %v1725_v0 }
 0x510   : > { %1824 = vst [vmem:[#allocation3 + $0x40] sm:$0xff] %v1674_v63  ;;  %1825 = vst [vmem:[#allocation3 + $0x88] sm:$0xff] %v1675_v51  ;;  %v1728_v49 = vsel %vm1414_vm2, %v1725_v0, %v1727_v6  ;;  %v1752_v52 = vsel %vm1559_vm3, %v1749_v57, %v1751_v33 }
 0x511   : > { %1826 = vst [vmem:[#allocation3 + $0xd0] sm:$0xff] %v1676_v56  ;;  %1693 = vst [vmem:[#allocation3 + $0x178] sm:$0xff] %v1677_v43  ;;  %v1731_v24 = vpack.c.bf16 %v1728_v49, %v1726_v8  ;;  %v1755_v55 = vpack.c.bf16 %v1752_v52, %v1750_v36 }
 0x512   : > { %1694 = vst [vmem:[#allocation3 + $0x1c0] sm:$0xff] %v1678_v17  ;;  %1695 = vst [vmem:[#allocation3 + $0x208] sm:$0xff] %v1679_v47 }
 0x513   : > { %1760 = vst [vmem:[#allocation3 + $0x148] sm:$0xff] %v1677_v43  ;;  %1761 = vst [vmem:[#allocation3 + $0x190] sm:$0xff] %v1678_v17 }
 0x514   : > { %1762 = vst [vmem:[#allocation3 + $0x1d8] sm:$0xff] %v1679_v47  ;;  %1827 = vst [vmem:[#allocation3 + $0x118] sm:$0xff] %v1677_v43 }
 0x515   : > { %1828 = vst [vmem:[#allocation3 + $0x160] sm:$0xff] %v1678_v17  ;;  %1829 = vst [vmem:[#allocation3 + $0x1a8] sm:$0xff] %v1679_v47 }
 0x516   : > { %1696 = vst [vmem:[#allocation3 + $0x250] sm:$0xff] %v1680_v45  ;;  %1697 = vst [vmem:[#allocation3 + $0x298] sm:$0xff] %v1681_v16 }
 0x517   : > { %1698 = vst [vmem:[#allocation3 + $0x2e0] sm:$0xff] %v1682_v37  ;;  %1699 = vst [vmem:[#allocation3 + $0x328] sm:$0xff] %v1683_v3 }
 0x518   : > { %1763 = vst [vmem:[#allocation3 + $0x220] sm:$0xff] %v1680_v45  ;;  %1764 = vst [vmem:[#allocation3 + $0x268] sm:$0xff] %v1681_v16 }
 0x519   : > { %1765 = vst [vmem:[#allocation3 + $0x2b0] sm:$0xff] %v1682_v37  ;;  %1766 = vst [vmem:[#allocation3 + $0x2f8] sm:$0xff] %v1683_v3 }
 0x51a   : > { %1830 = vst [vmem:[#allocation3 + $0x1f0] sm:$0xff] %v1680_v45  ;;  %1831 = vst [vmem:[#allocation3 + $0x238] sm:$0xff] %v1681_v16 }
 0x51b   : > { %1832 = vst [vmem:[#allocation3 + $0x280] sm:$0xff] %v1682_v37  ;;  %1833 = vst [vmem:[#allocation3 + $0x2c8] sm:$0xff] %v1683_v3 }
 0x51c   : > { %1700 = vst [vmem:[#allocation3 + $0x370] sm:$0xff] %v1684_v20  ;;  %1701 = vst [vmem:[#allocation3 + $0x3b8] sm:$0xff] %v1685_v41 }
 0x51d   : > { %1702 = vst [vmem:[#allocation3 + $0x400] sm:$0xff] %v1686_v14  ;;  %1703 = vst [vmem:[#allocation3 + $0x448] sm:$0xff] %v1687_v42 }
 0x51e   : > { %1767 = vst [vmem:[#allocation3 + $0x340] sm:$0xff] %v1684_v20  ;;  %1768 = vst [vmem:[#allocation3 + $0x388] sm:$0xff] %v1685_v41 }
 0x51f   : > { %1769 = vst [vmem:[#allocation3 + $0x3d0] sm:$0xff] %v1686_v14  ;;  %1770 = vst [vmem:[#allocation3 + $0x418] sm:$0xff] %v1687_v42 }
 0x520   : > { %1834 = vst [vmem:[#allocation3 + $0x310] sm:$0xff] %v1684_v20  ;;  %1835 = vst [vmem:[#allocation3 + $0x358] sm:$0xff] %v1685_v41 }
 0x521   : > { %1836 = vst [vmem:[#allocation3 + $0x3a0] sm:$0xff] %v1686_v14  ;;  %1837 = vst [vmem:[#allocation3 + $0x3e8] sm:$0xff] %v1687_v42 }
 0x522   : > { %1720 = vst [vmem:[#allocation3 + $0x450] sm:$0xff] %v1704_v28  ;;  %1787 = vst [vmem:[#allocation3 + $0x420] sm:$0xff] %v1704_v28 }
 0x523   : > { %1747 = vst [vmem:[#allocation3 + $0x458] sm:$0xff] %v1731_v24  ;;  %1814 = vst [vmem:[#allocation3 + $0x428] sm:$0xff] %v1731_v24 }
 0x524   : > { %1771 = vst [vmem:[#allocation3 + $0x460] sm:$0xff] %v1755_v55  ;;  %1838 = vst [vmem:[#allocation3 + $0x430] sm:$0xff] %v1755_v55 }
 0x525 PF: > { %v4956_v35 = vld [vmem:[%s5548_s11 + $0x40] sm:$0xff]   ;;  %v4958_v48 = vld [vmem:[%s5548_s11 + $0x48] sm:$0xff]   ;;  %v4960_v30 = vld [vmem:[%s5548_s11 + $0x50] sm:$0xff]   ;;  %s7415_s7 = sld [smem:[#allocation13_spill]]  ;;  %s7416_s3 = sld [smem:[#allocation18_spill]] }
 0x526   : > { %v4957_v12 = vld [vmem:[%s5548_s11] sm:$0xff]   ;;  %3995 = vmatprep.subr.bf16.mxu0 %v4956_v35  ;;  %4667 = vmatprep.subr.bf16.mxu1 %v4956_v35  ;;  %v4959_v34 = vld [vmem:[%s5548_s11 + $0x8] sm:$0xff]   ;;  %v4961_v23 = vld [vmem:[%s5548_s11 + $0x10] sm:$0xff]   ;;  %s3547_s1 = sshll.u32 %s5565_s16, 4  ;;  %s7419_s13 = sand.u32 1, %s5190_s25   ;;  %s7196_s1 = int_to_ptr.vmem [resolvable:$true] %s3547_s1 }
 0x527   : > { %3996 = vmatpush3.bf16.msra.mxu0 %v4957_v12  ;;  %4675 = vmatpush3.bf16.msra.mxu1 %v4957_v12  ;;  %v4962_v50 = vld [vmem:[%s5548_s11 + $0x58] sm:$0xff]   ;;  %v4964_v32 = vld [vmem:[%s5548_s11 + $0x60] sm:$0xff]   ;;  %v4966_v5 = vld [vmem:[%s5548_s11 + $0x68] sm:$0xff]   ;;  %s5088_s23 = scalar_lea.vmem %s7196_s1, 2048 }
 0x528   : > { %3997 = vmatprep.subr.bf16.mxu0 %v4958_v48  ;;  %4668 = vmatprep.subr.bf16.mxu1 %v4958_v48  ;;  %v4963_v7 = vld [vmem:[%s5548_s11 + $0x18] sm:$0xff]   ;;  %v4965_v13 = vld [vmem:[%s5548_s11 + $0x20] sm:$0xff]   ;;  %v1841_v1 = vld [vmem:[#allocation3 + $0x8] sm:$0xff]  ;;  %p5089_p9 = scmp.ne.s32.totalorder %s7196_s1, %s5088_s23 }
 0x529   : > { %v1949_v19 = vld [vmem:[#allocation3 + $0x368] sm:$0xff]  ;;  %2599 = vmatprep.mubr.bf16.mxu0 %v1841_v1  ;;  %v4968_v61 = vld [vmem:[%s5548_s11 + $0x70] sm:$0xff]   ;;  %v4970_v22 = vld [vmem:[%s5548_s11 + $0x78] sm:$0xff]  }
 0x52a   : > { %2695 = vmatprep.mubr.bf16.mxu1 %v1949_v19  ;;  %v4967_v46 = vld [vmem:[%s5548_s11 + $0x28] sm:$0xff]   ;;  %v4969_v44 = vld [vmem:[%s5548_s11 + $0x30] sm:$0xff]   ;;  %v4971_v4 = vld [vmem:[%s5548_s11 + $0x38] sm:$0xff]  }
 0x52b   : > { %3998 = vmatpush3.bf16.msra.mxu0 %v4959_v34  ;;  %4676 = vmatpush3.bf16.msra.mxu1 %v4959_v34  ;;  %v4972_v25 = vld [vmem:[%s5548_s11 + $0xc0] sm:$0xff]   ;;  %v4974_v38 = vld [vmem:[%s5548_s11 + $0xc8] sm:$0xff]   ;;  %v1850_v10 = vld [vmem:[#allocation3 + $0x50] sm:$0xff]  ;;  %p7420_p0 = scmp.ne.s32.totalorder %s7416_s3, 0 }
 0x52c   : > { %3999 = vmatprep.subr.bf16.mxu0 %v4960_v30  ;;  %4669 = vmatprep.subr.bf16.mxu1 %v4960_v30  ;;  %v4975_v60 = vld [vmem:[%s5548_s11 + $0x140] sm:$0xff]   ;;  %v4976_v40 = vld [vmem:[%s5548_s11 + $0x88] sm:$0xff]   ;;  %v1958_v2 = vld [vmem:[#allocation3 + $0x3b0] sm:$0xff] }
 0x52d   : > { %v1840_v39 = vld [vmem:[#allocation3] sm:$0xff]  ;;  %v4983_v15 = vld [vmem:[%s5548_s11 + $0x148] sm:$0xff]   ;;  %v4978_v9 = vld [vmem:[%s5548_s11 + $0xd0] sm:$0xff]   ;;  %p5090_p4 = pnand %p5089_p9, %p7420_p0 }
 0x52e   : > { %v1948_v62 = vld [vmem:[#allocation3 + $0x360] sm:$0xff]  ;;  %v4985_v53 = vld [vmem:[%s5548_s11 + $0x108] sm:$0xff]   ;;  %v4979_v63 = vld [vmem:[%s5548_s11 + $0x90] sm:$0xff]  }
 0x52f   : > { %4000 = vmatpush3.bf16.msra.mxu0 %v4961_v23  ;;  %4677 = vmatpush3.bf16.msra.mxu1 %v4961_v23  ;;  %v4973_v54 = vld [vmem:[%s5548_s11 + $0x80] sm:$0xff]   ;;  %v1849_v58 = vld [vmem:[#allocation3 + $0x48] sm:$0xff]  ;;  %v4980_v51 = vld [vmem:[%s5548_s11 + $0xd8] sm:$0xff]   ;;  %p5091_p10 = pneg %p5090_p4 }
 0x530   : > { %4001 = vmatprep.subr.bf16.mxu0 %v4962_v50  ;;  %4670 = vmatprep.subr.bf16.mxu1 %v4962_v50  ;;  %v4977_v27 = vld [vmem:[%s5548_s11 + $0x100] sm:$0xff]   ;;  %v1957_v18 = vld [vmem:[#allocation3 + $0x3a8] sm:$0xff]  ;;  %v1859_v56 = vld [vmem:[#allocation3 + $0x98] sm:$0xff] }
 0x531   : > { %v1967_v29 = vld [vmem:[#allocation3 + $0x3f8] sm:$0xff]  ;;  %v4991_v31 = vld [vmem:[%s5548_s11 + $0x150] sm:$0xff]   ;;  %v4982_v43 = vld [vmem:[%s5548_s11 + $0xe0] sm:$0xff]  }
 0x532   : > { %v4981_v21 = vld [vmem:[%s5548_s11 + $0x98] sm:$0xff]   ;;  %v4993_v26 = vld [vmem:[%s5548_s11 + $0x110] sm:$0xff]   ;;  %v4984_v45 = vld [vmem:[%s5548_s11 + $0xa0] sm:$0xff]  }
 0x533   : > { %4002 = vmatpush3.bf16.msra.mxu0 %v4963_v7  ;;  %4678 = vmatpush3.bf16.msra.mxu1 %v4963_v7  ;;  %v1858_v17 = vld [vmem:[#allocation3 + $0x90] sm:$0xff]  ;;  %v4986_v16 = vld [vmem:[%s5548_s11 + $0xe8] sm:$0xff]   ;;  %v1868_v37 = vld [vmem:[#allocation3 + $0xe0] sm:$0xff] }
 0x534   : > { %4003 = vmatprep.subr.bf16.mxu0 %v4964_v32  ;;  %4671 = vmatprep.subr.bf16.mxu1 %v4964_v32  ;;  %v1966_v47 = vld [vmem:[#allocation3 + $0x3f0] sm:$0xff]  ;;  %v1976_v3 = vld [vmem:[#allocation3 + $0x440] sm:$0xff]  ;;  %v4996_v20 = vld [vmem:[%s5548_s11 + $0x158] sm:$0xff]  }
 0x535   : > { %v4997_v41 = vld [vmem:[%s5548_s11 + $0x118] sm:$0xff]   ;;  %v4987_v14 = vld [vmem:[%s5548_s11 + $0xa8] sm:$0xff]   ;;  %v4988_v42 = vld [vmem:[%s5548_s11 + $0xf0] sm:$0xff]  }
 0x536   : > { %v5000_v28 = vld [vmem:[%s5548_s11 + $0x160] sm:$0xff]   ;;  %v1867_v11 = vld [vmem:[#allocation3 + $0xd8] sm:$0xff]  ;;  %v4989_v6 = vld [vmem:[%s5548_s11 + $0xb0] sm:$0xff]  }
 0x537   : > { %4004 = vmatpush3.bf16.msra.mxu0 %v4965_v13  ;;  %4679 = vmatpush3.bf16.msra.mxu1 %v4965_v13  ;;  %v1975_v0 = vld [vmem:[#allocation3 + $0x438] sm:$0xff]  ;;  %v1877_v57 = vld [vmem:[#allocation3 + $0x128] sm:$0xff]  ;;  %v5001_v8 = vld [vmem:[%s5548_s11 + $0x120] sm:$0xff]  }
 0x538   : > { %4005 = vmatprep.subr.bf16.mxu0 %v4966_v5  ;;  %4672 = vmatprep.subr.bf16.mxu1 %v4966_v5  ;;  %v4990_v59 = vld [vmem:[%s5548_s11 + $0xf8] sm:$0xff]   ;;  %v5002_v49 = vld [vmem:[%s5548_s11 + $0x168] sm:$0xff]   ;;  %v4994_v36 = vld [vmem:[%s5548_s11 + $0x1c0] sm:$0xff]  }
 0x539   : > { %v1843_v33 = vld [vmem:[#allocation3 + $0x18] sm:$0xff]  ;;  %v5004_v52 = vld [vmem:[%s5548_s11 + $0x128] sm:$0xff]   ;;  %v1876_v55 = vld [vmem:[#allocation3 + $0x120] sm:$0xff] }
 0x53a   : > { %v4992_v24 = vld [vmem:[%s5548_s11 + $0xb8] sm:$0xff]   ;;  %v1842_v35 = vld [vmem:[#allocation3 + $0x10] sm:$0xff]  ;;  %v4995_v12 = vld [vmem:[%s5548_s11 + $0x180] sm:$0xff]  }
 0x53b   : > { %4006 = vmatpush3.bf16.msra.mxu0 %v4967_v46  ;;  %4680 = vmatpush3.bf16.msra.mxu1 %v4967_v46  ;;  %v1886_v48 = vld [vmem:[#allocation3 + $0x170] sm:$0xff]  ;;  %v4998_v34 = vld [vmem:[%s5548_s11 + $0x1c8] sm:$0xff]   ;;  %v1852_v30 = vld [vmem:[#allocation3 + $0x60] sm:$0xff] }
 0x53c   : > { %4007 = vmatprep.subr.bf16.mxu0 %v4968_v61  ;;  %4673 = vmatprep.subr.bf16.mxu1 %v4968_v61  ;;  %v5006_v23 = vld [vmem:[%s5548_s11 + $0x170] sm:$0xff]   ;;  %v4999_v7 = vld [vmem:[%s5548_s11 + $0x188] sm:$0xff]   ;;  %v1851_v5 = vld [vmem:[#allocation3 + $0x58] sm:$0xff] }
 0x53d   : > { %v5007_v50 = vld [vmem:[%s5548_s11 + $0x130] sm:$0xff]   ;;  %v1885_v13 = vld [vmem:[#allocation3 + $0x168] sm:$0xff]  ;;  %v5010_v1 = vld [vmem:[%s5548_s11 + $0x178] sm:$0xff]  }
 0x53e   : > { %v5003_v32 = vld [vmem:[%s5548_s11 + $0x1d0] sm:$0xff]   ;;  %v1895_v19 = vld [vmem:[#allocation3 + $0x1b8] sm:$0xff]  ;;  %v1861_v46 = vld [vmem:[#allocation3 + $0xa8] sm:$0xff] }
 0x53f   : > { %4008 = vmatpush3.bf16.msra.mxu0 %v4969_v44  ;;  %4681 = vmatpush3.bf16.msra.mxu1 %v4969_v44  ;;  %v5005_v61 = vld [vmem:[%s5548_s11 + $0x190] sm:$0xff]   ;;  %v5011_v44 = vld [vmem:[%s5548_s11 + $0x138] sm:$0xff]  }
 0x540   : > { %4009 = vmatprep.subr.bf16.mxu0 %v4970_v22  ;;  %4674 = vmatprep.subr.bf16.mxu1 %v4970_v22  ;;  %v5008_v22 = vld [vmem:[%s5548_s11 + $0x1d8] sm:$0xff]  }
 0x543   : > { %4010 = vmatpush3.bf16.msra.mxu0 %v4971_v4  ;;  %4682 = vmatpush3.bf16.msra.mxu1 %v4971_v4  ;;  %v5009_v4 = vld [vmem:[%s5548_s11 + $0x198] sm:$0xff]  }
 0x544   : > { %4107 = vmatprep.subr.bf16.mxu1 %v4972_v25  ;;  %4219 = vmatprep.subr.bf16.mxu0 %v4975_v60  ;;  %v6779_v25 = vld [vmem:[%s5548_s11 + $0x200] sm:$0xff]  }
 0x545   : > { %v5012_v60 = vld [vmem:[%s5548_s11 + $0x1e0] sm:$0xff]  }
 0x546   : > { %2600 = vmatmul.mubr.bf16.vlgmr.msra.gmra.mrb[0].mxu0 %v1840_v39  ;;  %2696 = vmatmul.mubr.bf16.vlgmr.msra.gmra.mrb[0].mxu1 %v1948_v62  ;;  %v1894_v39 = vld [vmem:[#allocation3 + $0x1b0] sm:$0xff]  ;;  %v1860_v62 = vld [vmem:[#allocation3 + $0xa0] sm:$0xff] }
 0x547   : > { %4108 = vmatpush3.bf16.msra.mxu1 %v4973_v54  ;;  %4220 = vmatpush3.bf16.msra.mxu0 %v4977_v27  ;;  %v1904_v54 = vld [vmem:[#allocation3 + $0x200] sm:$0xff] }
 0x548   : > { %4109 = vmatprep.subr.bf16.mxu1 %v4974_v38  ;;  %2607 = vmatprep.mubr.bf16.mxu0 %v1850_v10  ;;  %v1870_v38 = vld [vmem:[#allocation3 + $0xf0] sm:$0xff]  ;;  %v5013_v27 = vld [vmem:[%s5548_s11 + $0x1a0] sm:$0xff]   ;;  %v5015_v10 = vld [vmem:[%s5548_s11 + $0x1e8] sm:$0xff]  }
 0x549   : > { %2703 = vmatprep.mubr.bf16.mxu1 %v1958_v2  ;;  %4221 = vmatprep.subr.bf16.mxu0 %v4983_v15  ;;  %v5018_v15 = vld [vmem:[%s5548_s11 + $0x1f0] sm:$0xff]   ;;  %v1903_v2 = vld [vmem:[#allocation3 + $0x1f8] sm:$0xff] }
 0x54b   : > { %4110 = vmatpush3.bf16.msra.mxu1 %v4976_v40  ;;  %4222 = vmatpush3.bf16.msra.mxu0 %v4985_v53  ;;  %v5016_v40 = vld [vmem:[%s5548_s11 + $0x1a8] sm:$0xff]  }
 0x54c   : > { %4111 = vmatprep.subr.bf16.mxu1 %v4978_v9  ;;  %4223 = vmatprep.subr.bf16.mxu0 %v4991_v31  ;;  %v1869_v53 = vld [vmem:[#allocation3 + $0xe8] sm:$0xff]  ;;  %v1922_v31 = vld [vmem:[#allocation3 + $0x290] sm:$0xff] }
 0x54d   : > { %v1913_v9 = vld [vmem:[#allocation3 + $0x248] sm:$0xff] }
 0x54e   : > { %2608 = vmatmul.mubr.bf16.gmra.mrb[4].mxu0 %v1849_v58  ;;  %2704 = vmatmul.mubr.bf16.gmra.mrb[4].mxu1 %v1957_v18  ;;  %v1879_v58 = vld [vmem:[#allocation3 + $0x138] sm:$0xff]  ;;  %v5019_v18 = vld [vmem:[%s5548_s11 + $0x1b0] sm:$0xff]  }
 0x54f   : > { %4112 = vmatpush3.bf16.msra.mxu1 %v4979_v63  ;;  %2615 = vmatprep.mubr.bf16.mxu0 %v1859_v56  ;;  %v5021_v63 = vld [vmem:[%s5548_s11 + $0x1f8] sm:$0xff]   ;;  %v1912_v56 = vld [vmem:[#allocation3 + $0x240] sm:$0xff] }
 0x550   : > { %4113 = vmatprep.subr.bf16.mxu1 %v4980_v51  ;;  %2711 = vmatprep.mubr.bf16.mxu1 %v1967_v29  ;;  %v5022_v51 = vld [vmem:[%s5548_s11 + $0x1b8] sm:$0xff]   ;;  %v1878_v29 = vld [vmem:[#allocation3 + $0x130] sm:$0xff] }
 0x551   : > { %4224 = vmatpush3.bf16.msra.mxu0 %v4993_v26  ;;  %v1921_v26 = vld [vmem:[#allocation3 + $0x288] sm:$0xff] }
 0x552   : > { %4225 = vmatprep.subr.bf16.mxu0 %v4996_v20  ;;  %v1939_v20 = vld [vmem:[#allocation3 + $0x318] sm:$0xff] }
 0x553   : > { %4114 = vmatpush3.bf16.msra.mxu1 %v4981_v21  ;;  %v1888_v21 = vld [vmem:[#allocation3 + $0x180] sm:$0xff] }
 0x554   : > { %4115 = vmatprep.subr.bf16.mxu1 %v4982_v43  ;;  %v1887_v43 = vld [vmem:[#allocation3 + $0x178] sm:$0xff] }
 0x555   : > { %4226 = vmatpush3.bf16.msra.mxu0 %v4997_v41  ;;  %v1905_v41 = vld [vmem:[#allocation3 + $0x208] sm:$0xff] }
 0x556   : > { %2616 = vmatmul.mubr.bf16.gmra.mrb[8].mxu0 %v1858_v17  ;;  %2712 = vmatmul.mubr.bf16.gmra.mrb[8].mxu1 %v1966_v47  ;;  %v1931_v17 = vld [vmem:[#allocation3 + $0x2d8] sm:$0xff]  ;;  %v1897_v47 = vld [vmem:[#allocation3 + $0x1c8] sm:$0xff] }
 0x557   : > { %4116 = vmatpush3.bf16.msra.mxu1 %v4984_v45  ;;  %2623 = vmatprep.mubr.bf16.mxu0 %v1868_v37  ;;  %v1930_v45 = vld [vmem:[#allocation3 + $0x2d0] sm:$0xff]  ;;  %v1940_v37 = vld [vmem:[#allocation3 + $0x320] sm:$0xff] }
 0x558   : > { %4117 = vmatprep.subr.bf16.mxu1 %v4986_v16  ;;  %2719 = vmatprep.mubr.bf16.mxu1 %v1976_v3  ;;  %v1896_v16 = vld [vmem:[#allocation3 + $0x1c0] sm:$0xff]  ;;  %v1906_v3 = vld [vmem:[#allocation3 + $0x210] sm:$0xff] }
 0x559   : > { %4227 = vmatprep.subr.bf16.mxu0 %v5000_v28  ;;  %v1914_v28 = vld [vmem:[#allocation3 + $0x250] sm:$0xff] }
 0x55a   : > { %4228 = vmatpush3.bf16.msra.mxu0 %v5001_v8  ;;  %v1853_v8 = vld [vmem:[#allocation3 + $0x68] sm:$0xff] }
 0x55b   : > { %4118 = vmatpush3.bf16.msra.mxu1 %v4987_v14  ;;  %4229 = vmatprep.subr.bf16.mxu0 %v5002_v49  ;;  %v1915_v14 = vld [vmem:[#allocation3 + $0x258] sm:$0xff]  ;;  %v1933_v49 = vld [vmem:[#allocation3 + $0x2e8] sm:$0xff] }
 0x55c   : > { %4119 = vmatprep.subr.bf16.mxu1 %v4988_v42  ;;  %v1845_v42 = vld [vmem:[#allocation3 + $0x28] sm:$0xff] }
 0x55e   : > { %2624 = vmatmul.mubr.bf16.gmra.mrb[12].mxu0 %v1867_v11  ;;  %2720 = vmatmul.mubr.bf16.gmra.mrb[12].mxu1 %v1975_v0  ;;  %v1844_v11 = vld [vmem:[#allocation3 + $0x20] sm:$0xff] }
 0x55f   : > { %4120 = vmatpush3.bf16.msra.mxu1 %v4989_v6  ;;  %2631 = vmatprep.mubr.bf16.mxu0 %v1877_v57  ;;  %v1924_v0 = vld [vmem:[#allocation3 + $0x2a0] sm:$0xff]  ;;  %v5017_v6 = vld [vmem:[%s5548_s11 + $0x208] sm:$0xff]   ;;  %v5020_v57 = vld [vmem:[%s5548_s11 + $0x210] sm:$0xff]  }
 0x560   : > { %4121 = vmatprep.subr.bf16.mxu1 %v4990_v59  ;;  %2760 = vmatprep.mubr.bf16.mxu1 %v1843_v33  ;;  %v1854_v59 = vld [vmem:[#allocation3 + $0x70] sm:$0xff]  ;;  %v1923_v33 = vld [vmem:[#allocation3 + $0x298] sm:$0xff] }
 0x561   : > { %4230 = vmatpush3.bf16.msra.mxu0 %v5004_v52  ;;  %v5024_v52 = vld [vmem:[%s5548_s11 + $0x220] sm:$0xff]  }
 0x562   : > { %4231 = vmatprep.subr.bf16.mxu0 %v5006_v23  ;;  %v1941_v23 = vld [vmem:[#allocation3 + $0x328] sm:$0xff] }
 0x563   : > { %4122 = vmatpush3.bf16.msra.mxu1 %v4992_v24  ;;  %v1863_v24 = vld [vmem:[#allocation3 + $0xb8] sm:$0xff] }
 0x564   : > { %4331 = vmatprep.subr.bf16.mxu1 %v4994_v36  ;;  %v5023_v36 = vld [vmem:[%s5548_s11 + $0x218] sm:$0xff]  }
 0x565   : > { %4232 = vmatpush3.bf16.msra.mxu0 %v5007_v50  ;;  %v1871_v50 = vld [vmem:[#allocation3 + $0xf8] sm:$0xff] }
 0x566   : > { %2632 = vmatmul.mubr.bf16.gmra.mrb[16].mxu0 %v1876_v55  ;;  %2761 = vmatmul.mubr.bf16.vlgmr.msra.gmra.mrb[16].mxu1 %v1842_v35  ;;  %v1932_v55 = vld [vmem:[#allocation3 + $0x2e0] sm:$0xff]  ;;  %v1862_v35 = vld [vmem:[#allocation3 + $0xb0] sm:$0xff] }
 0x567   : > { %4332 = vmatpush3.bf16.msra.mxu1 %v4995_v12  ;;  %2639 = vmatprep.mubr.bf16.mxu0 %v1886_v48  ;;  %v1942_v12 = vld [vmem:[#allocation3 + $0x330] sm:$0xff]  ;;  %v1872_v48 = vld [vmem:[#allocation3 + $0x100] sm:$0xff] }
 0x568   : > { %2768 = vmatprep.mubr.bf16.mxu1 %v1852_v30  ;;  %4333 = vmatprep.subr.bf16.mxu1 %v4998_v34  ;;  %v5025_v34 = vld [vmem:[%s5548_s11 + $0x228] sm:$0xff]   ;;  %v5026_v30 = vld [vmem:[%s5548_s11 + $0x230] sm:$0xff]  }
 0x569   : > { %4233 = vmatprep.subr.bf16.mxu0 %v5010_v1  ;;  %v1880_v1 = vld [vmem:[#allocation3 + $0x140] sm:$0xff] }
 0x56a   : > { %4234 = vmatpush3.bf16.msra.mxu0 %v5011_v44  ;;  %v1889_v44 = vld [vmem:[#allocation3 + $0x188] sm:$0xff] }
 0x56b   : > { %4334 = vmatpush3.bf16.msra.mxu1 %v4999_v7  ;;  %4559 = vmatprep.subr.bf16.mxu0 %v6779_v25  ;;  %v1951_v7 = vld [vmem:[#allocation3 + $0x378] sm:$0xff] }
 0x56c   : > { %4335 = vmatprep.subr.bf16.mxu1 %v5003_v32  ;;  %v1881_v32 = vld [vmem:[#allocation3 + $0x148] sm:$0xff] }
 0x56e   : > { %2640 = vmatmul.mubr.bf16.gmra.mrb[20].mxu0 %v1885_v13  ;;  %2769 = vmatmul.mubr.bf16.gmra.mrb[20].mxu1 %v1851_v5  ;;  %v5027_v13 = vld [vmem:[%s5548_s11 + $0x238] sm:$0xff]   ;;  %v1950_v5 = vld [vmem:[#allocation3 + $0x370] sm:$0xff]  ;;  %s7201_s11 = scalar_lea.sflag [#allocation6], %s7419_s13 }
 0x56f   : > { %2647 = vmatprep.mubr.bf16.mxu0 %v1895_v19  ;;  %2776 = vmatprep.mubr.bf16.mxu1 %v1861_v46  ;;  %v1960_v19 = vld [vmem:[#allocation3 + $0x3c0] sm:$0xff]  ;;  %v1890_v46 = vld [vmem:[#allocation3 + $0x190] sm:$0xff] }
 0x570   : > { %4336 = vmatpush3.bf16.msra.mxu1 %v5005_v61  ;;  %v1959_v61 = vld [vmem:[#allocation3 + $0x3b8] sm:$0xff] }
 0x571   : > { %4337 = vmatprep.subr.bf16.mxu1 %v5008_v22  ;;  %v1969_v22 = vld [vmem:[#allocation3 + $0x408] sm:$0xff] }
 0x574   : > { %4338 = vmatpush3.bf16.msra.mxu1 %v5009_v4  ;;  %v1899_v4 = vld [vmem:[#allocation3 + $0x1d8] sm:$0xff] }
 0x575   : > { %4339 = vmatprep.subr.bf16.mxu1 %v5012_v60  ;;  %v1898_v60 = vld [vmem:[#allocation3 + $0x1d0] sm:$0xff] }
 0x576   : > { %2648 = vmatmul.mubr.bf16.gmra.mrb[24].mxu0 %v1894_v39  ;;  %2777 = vmatmul.mubr.bf16.gmra.mrb[24].mxu1 %v1860_v62  ;;  %v1978_v39 = vld [vmem:[#allocation3 + $0x450] sm:$0xff]  ;;  %v1908_v62 = vld [vmem:[#allocation3 + $0x220] sm:$0xff] }
 0x577   : > { %2655 = vmatprep.mubr.bf16.mxu0 %v1904_v54  ;;  %2784 = vmatprep.mubr.bf16.mxu1 %v1870_v38  ;;  %v1977_v54 = vld [vmem:[#allocation3 + $0x448] sm:$0xff]  ;;  %v1907_v38 = vld [vmem:[#allocation3 + $0x218] sm:$0xff] }
 0x578   : > { %4340 = vmatpush3.bf16.msra.mxu1 %v5013_v27  ;;  %v1917_v27 = vld [vmem:[#allocation3 + $0x268] sm:$0xff] }
 0x579   : > { %4341 = vmatprep.subr.bf16.mxu1 %v5015_v10  ;;  %v1847_v10 = vld [vmem:[#allocation3 + $0x38] sm:$0xff] }
 0x57c   : > { %4342 = vmatpush3.bf16.msra.mxu1 %v5016_v40  ;;  %v1916_v40 = vld [vmem:[#allocation3 + $0x260] sm:$0xff] }
 0x57d   : > { %4343 = vmatprep.subr.bf16.mxu1 %v5018_v15  ;;  %v1846_v15 = vld [vmem:[#allocation3 + $0x30] sm:$0xff] }
 0x57e   : > { %2656 = vmatmul.mubr.bf16.gmra.mrb[28].mxu0 %v1903_v2  ;;  %2785 = vmatmul.mubr.bf16.gmra.mrb[28].mxu1 %v1869_v53  ;;  %v1926_v2 = vld [vmem:[#allocation3 + $0x2b0] sm:$0xff]  ;;  %v1856_v53 = vld [vmem:[#allocation3 + $0x80] sm:$0xff] }
 0x57f   : > { %2663 = vmatprep.mubr.bf16.mxu0 %v1913_v9  ;;  %2792 = vmatprep.mubr.bf16.mxu1 %v1879_v58  ;;  %v1925_v9 = vld [vmem:[#allocation3 + $0x2a8] sm:$0xff]  ;;  %v1855_v58 = vld [vmem:[#allocation3 + $0x78] sm:$0xff] }
 0x580   : > { %4344 = vmatpush3.bf16.msra.mxu1 %v5019_v18  ;;  %v1935_v18 = vld [vmem:[#allocation3 + $0x2f8] sm:$0xff] }
 0x581   : > { %4345 = vmatprep.subr.bf16.mxu1 %v5021_v63  ;;  %v1865_v63 = vld [vmem:[#allocation3 + $0xc8] sm:$0xff] }
 0x584   : > { %4346 = vmatpush3.bf16.msra.mxu1 %v5022_v51  ;;  %v1934_v51 = vld [vmem:[#allocation3 + $0x2f0] sm:$0xff] }
 0x586   : > { %2664 = vmatmul.mubr.bf16.gmra.mrb[32].mxu0 %v1912_v56  ;;  %2793 = vmatmul.mubr.bf16.gmra.mrb[32].mxu1 %v1878_v29  ;;  %v1864_v56 = vld [vmem:[#allocation3 + $0xc0] sm:$0xff] }
 0x587   : > { %2671 = vmatprep.mubr.bf16.mxu0 %v1922_v31  ;;  %2800 = vmatprep.mubr.bf16.mxu1 %v1888_v21  ;;  %v1944_v29 = vld [vmem:[#allocation3 + $0x340] sm:$0xff]  ;;  %v1874_v31 = vld [vmem:[#allocation3 + $0x110] sm:$0xff]  ;;  %v1943_v21 = vld [vmem:[#allocation3 + $0x338] sm:$0xff] }
 0x58e   : > { %2672 = vmatmul.mubr.bf16.gmra.mrb[36].mxu0 %v1921_v26  ;;  %2801 = vmatmul.mubr.bf16.gmra.mrb[36].mxu1 %v1887_v43  ;;  %v1873_v26 = vld [vmem:[#allocation3 + $0x108] sm:$0xff] }
 0x58f   : > { %2679 = vmatprep.mubr.bf16.mxu0 %v1931_v17  ;;  %2808 = vmatprep.mubr.bf16.mxu1 %v1897_v47  ;;  %v1953_v43 = vld [vmem:[#allocation3 + $0x388] sm:$0xff]  ;;  %v1883_v17 = vld [vmem:[#allocation3 + $0x158] sm:$0xff]  ;;  %v1952_v47 = vld [vmem:[#allocation3 + $0x380] sm:$0xff] }
 0x596   : > { %2680 = vmatmul.mubr.bf16.gmra.mrb[40].mxu0 %v1930_v45  ;;  %2809 = vmatmul.mubr.bf16.gmra.mrb[40].mxu1 %v1896_v16  ;;  %v1882_v45 = vld [vmem:[#allocation3 + $0x150] sm:$0xff] }
 0x597   : > { %2687 = vmatprep.mubr.bf16.mxu0 %v1940_v37  ;;  %2816 = vmatprep.mubr.bf16.mxu1 %v1906_v3  ;;  %v1962_v16 = vld [vmem:[#allocation3 + $0x3d0] sm:$0xff]  ;;  %v1892_v37 = vld [vmem:[#allocation3 + $0x1a0] sm:$0xff]  ;;  %v1961_v3 = vld [vmem:[#allocation3 + $0x3c8] sm:$0xff] }
 0x59e   : > { %2688 = vmatmul.mubr.bf16.gmra.mrb[44].mxu0 %v1939_v20  ;;  %2817 = vmatmul.mubr.bf16.gmra.mrb[44].mxu1 %v1905_v41  ;;  %v1891_v20 = vld [vmem:[#allocation3 + $0x198] sm:$0xff] }
 0x59f   : > { %2824 = vmatprep.mubr.bf16.mxu1 %v1915_v14  ;;  %2921 = vmatprep.mubr.bf16.mxu0 %v1845_v42  ;;  %v1971_v41 = vld [vmem:[#allocation3 + $0x418] sm:$0xff]  ;;  %v1901_v14 = vld [vmem:[#allocation3 + $0x1e8] sm:$0xff]  ;;  %v1970_v42 = vld [vmem:[#allocation3 + $0x410] sm:$0xff] }
 0x5a6   : > { %2825 = vmatmul.mubr.bf16.gmra.mrb[48].mxu1 %v1914_v28  ;;  %2922 = vmatmul.mubr.bf16.vlgmr.msra.gmra.mrb[48].mxu0 %v1844_v11  ;;  %v1900_v28 = vld [vmem:[#allocation3 + $0x1e0] sm:$0xff] }
 0x5a7   : > { %4560 = vmatpush3.bf16.msra.mxu0 %v6779_v25  ;;  %2832 = vmatprep.mubr.bf16.mxu1 %v1924_v0  ;;  %v1968_v25 = vld [vmem:[#allocation3 + $0x400] sm:$0xff]  ;;  %v1910_v0 = vld [vmem:[#allocation3 + $0x230] sm:$0xff] }
 0x5a8   : > { %2929 = vmatprep.mubr.bf16.mxu0 %v1854_v59  ;;  %4561 = vmatprep.subr.bf16.mxu0 %v5017_v6  ;;  %v1980_v11 = vld [vmem:[#allocation3 + $0x460] sm:$0xff] }
 0x5ab   : > { %4562 = vmatpush3.bf16.msra.mxu0 %v5017_v6 }
 0x5ac   : > { %4563 = vmatprep.subr.bf16.mxu0 %v5020_v57 }
 0x5ae   : > { %2833 = vmatmul.mubr.bf16.gmra.mrb[52].mxu1 %v1923_v33  ;;  %2930 = vmatmul.mubr.bf16.gmra.mrb[52].mxu0 %v1853_v8 }
 0x5af   : > { %2840 = vmatprep.mubr.bf16.mxu1 %v1933_v49  ;;  %2937 = vmatprep.mubr.bf16.mxu0 %v1863_v24 }
 0x5b0   : > { %4564 = vmatpush3.bf16.msra.mxu0 %v5020_v57 }
 0x5b1   : > { %4565 = vmatprep.subr.bf16.mxu0 %v5023_v36 }
 0x5b4   : > { %4566 = vmatpush3.bf16.msra.mxu0 %v5023_v36 }
 0x5b5   : > { %4567 = vmatprep.subr.bf16.mxu0 %v5024_v52 }
 0x5b6   : > { %2841 = vmatmul.mubr.bf16.gmra.mrb[56].mxu1 %v1932_v55  ;;  %2938 = vmatmul.mubr.bf16.gmra.mrb[56].mxu0 %v1862_v35  ;;  %v1909_v55 = vld [vmem:[#allocation3 + $0x228] sm:$0xff] }
 0x5b7   : > { %2848 = vmatprep.mubr.bf16.mxu1 %v1942_v12  ;;  %2945 = vmatprep.mubr.bf16.mxu0 %v1872_v48  ;;  %v1919_v48 = vld [vmem:[#allocation3 + $0x278] sm:$0xff] }
 0x5b8   : > { %4568 = vmatpush3.bf16.msra.mxu0 %v5024_v52  ;;  %v1979_v52 = vld [vmem:[#allocation3 + $0x458] sm:$0xff] }
 0x5b9   : > { %4569 = vmatprep.subr.bf16.mxu0 %v5025_v34 }
 0x5bc   : > { %4570 = vmatpush3.bf16.msra.mxu0 %v5025_v34  ;;  %v1848_v34 = vld [vmem:[#allocation3 + $0x40] sm:$0xff] }
 0x5bd   : > { %4571 = vmatprep.subr.bf16.mxu0 %v5026_v30 }
 0x5be   : > { %2849 = vmatmul.mubr.bf16.gmra.mrb[60].mxu1 %v1941_v23  ;;  %2946 = vmatmul.mubr.bf16.gmra.mrb[60].mxu0 %v1871_v50 }
 0x5bf   : > { %2856 = vmatprep.mubr.bf16.mxu1 %v1951_v7  ;;  %2953 = vmatprep.mubr.bf16.mxu0 %v1881_v32 }
 0x5c0   : > { %4572 = vmatpush3.bf16.msra.mxu0 %v5026_v30 }
 0x5c1   : > { %4573 = vmatprep.subr.bf16.mxu0 %v5027_v13 }
 0x5c4   : > { %4574 = vmatpush3.bf16.msra.mxu0 %v5027_v13 }
 0x5c6   : > { %2857 = vmatmul.mubr.bf16.gmra.mrb[64].mxu1 %v1950_v5  ;;  %2954 = vmatmul.mubr.bf16.gmra.mrb[64].mxu0 %v1880_v1 }
 0x5c7   : > { %2864 = vmatprep.mubr.bf16.mxu1 %v1960_v19  ;;  %2961 = vmatprep.mubr.bf16.mxu0 %v1890_v46 }
 0x5ce   : > { %2865 = vmatmul.mubr.bf16.gmra.mrb[68].mxu1 %v1959_v61  ;;  %2962 = vmatmul.mubr.bf16.gmra.mrb[68].mxu0 %v1889_v44  ;;  %v1918_v61 = vld [vmem:[#allocation3 + $0x270] sm:$0xff]  ;;  %v1857_v44 = vld [vmem:[#allocation3 + $0x88] sm:$0xff] }
 0x5cf   : > { %2872 = vmatprep.mubr.bf16.mxu1 %v1969_v22  ;;  %2969 = vmatprep.mubr.bf16.mxu0 %v1899_v4 }
 0x5d6   : > { %2873 = vmatmul.mubr.bf16.gmra.mrb[72].mxu1 %v1968_v25  ;;  %2970 = vmatmul.mubr.bf16.gmra.mrb[72].mxu0 %v1898_v60  ;;  %v1928_v25 = vld [vmem:[#allocation3 + $0x2c0] sm:$0xff]  ;;  %v1866_v60 = vld [vmem:[#allocation3 + $0xd0] sm:$0xff] }
 0x5d7   : > { %2880 = vmatprep.mubr.bf16.mxu1 %v1978_v39  ;;  %2977 = vmatprep.mubr.bf16.mxu0 %v1908_v62 }
 0x5de   : > { %2881 = vmatmul.mubr.bf16.gmra.mrb[76].mxu1 %v1977_v54  ;;  %2978 = vmatmul.mubr.bf16.gmra.mrb[76].mxu0 %v1907_v38 }
 0x5df   : > { %2985 = vmatprep.mubr.bf16.mxu0 %v1917_v27  ;;  %3082 = vmatprep.mubr.bf16.mxu1 %v1847_v10 }
 0x5e6   : > { %2986 = vmatmul.mubr.bf16.gmra.mrb[80].mxu0 %v1916_v40  ;;  %3083 = vmatmul.mubr.bf16.vlgmr.msra.gmra.mrb[80].mxu1 %v1846_v15 }
 0x5e7   : > { %2993 = vmatprep.mubr.bf16.mxu0 %v1926_v2  ;;  %3090 = vmatprep.mubr.bf16.mxu1 %v1856_v53 }
 0x5ee   : > { %2994 = vmatmul.mubr.bf16.gmra.mrb[84].mxu0 %v1925_v9  ;;  %3091 = vmatmul.mubr.bf16.gmra.mrb[84].mxu1 %v1855_v58  ;;  %v1927_v9 = vld [vmem:[#allocation3 + $0x2b8] sm:$0xff] }
 0x5ef   : > { %3001 = vmatprep.mubr.bf16.mxu0 %v1935_v18  ;;  %3098 = vmatprep.mubr.bf16.mxu1 %v1865_v63  ;;  %v1875_v58 = vld [vmem:[#allocation3 + $0x118] sm:$0xff] }
 0x5f6   : > { %3002 = vmatmul.mubr.bf16.gmra.mrb[88].mxu0 %v1934_v51  ;;  %3099 = vmatmul.mubr.bf16.gmra.mrb[88].mxu1 %v1864_v56  ;;  %v1937_v51 = vld [vmem:[#allocation3 + $0x308] sm:$0xff]  ;;  %v1884_v56 = vld [vmem:[#allocation3 + $0x160] sm:$0xff] }
 0x5f7   : > { %3009 = vmatprep.mubr.bf16.mxu0 %v1944_v29  ;;  %3106 = vmatprep.mubr.bf16.mxu1 %v1874_v31 }
 0x5fe   : > { %3010 = vmatmul.mubr.bf16.gmra.mrb[92].mxu0 %v1943_v21  ;;  %3107 = vmatmul.mubr.bf16.gmra.mrb[92].mxu1 %v1873_v26 }
 0x5ff   : > { %3017 = vmatprep.mubr.bf16.mxu0 %v1953_v43  ;;  %3114 = vmatprep.mubr.bf16.mxu1 %v1883_v17 }
 0x606   : > { %3018 = vmatmul.mubr.bf16.gmra.mrb[96].mxu0 %v1952_v47  ;;  %3115 = vmatmul.mubr.bf16.gmra.mrb[96].mxu1 %v1882_v45 }
 0x607   : > { %3025 = vmatprep.mubr.bf16.mxu0 %v1962_v16  ;;  %3122 = vmatprep.mubr.bf16.mxu1 %v1892_v37 }
 0x60e   : > { %3026 = vmatmul.mubr.bf16.gmra.mrb[100].mxu0 %v1961_v3  ;;  %3123 = vmatmul.mubr.bf16.gmra.mrb[100].mxu1 %v1891_v20  ;;  %v1936_v3 = vld [vmem:[#allocation3 + $0x300] sm:$0xff]  ;;  %v1893_v20 = vld [vmem:[#allocation3 + $0x1a8] sm:$0xff] }
 0x60f   : > { %3033 = vmatprep.mubr.bf16.mxu0 %v1971_v41  ;;  %3130 = vmatprep.mubr.bf16.mxu1 %v1901_v14 }
 0x616   : > { %3034 = vmatmul.mubr.bf16.gmra.mrb[104].mxu0 %v1970_v42  ;;  %3131 = vmatmul.mubr.bf16.gmra.mrb[104].mxu1 %v1900_v28  ;;  %v1946_v42 = vld [vmem:[#allocation3 + $0x350] sm:$0xff] }
 0x617   : > { %3041 = vmatprep.mubr.bf16.mxu0 %v1980_v11  ;;  %3138 = vmatprep.mubr.bf16.mxu1 %v1910_v0  ;;  %v1902_v28 = vld [vmem:[#allocation3 + $0x1f0] sm:$0xff] }
 0x619   : > { %v4083_v6 = vpop.f32.mrb[0].mxu1  ;;  %v4011_v59 = vpop.f32.mrb[0].mxu0 }
 0x61a   : > { %v4084_v57 = vpop.f32.mrb[1].mxu1  ;;  %v4012_v33 = vpop.f32.mrb[1].mxu0 }
 0x61b   : > { %v6798_v8 = vadd.f32 %v4084_v57, %v4083_v6  ;;  %v4086_v49 = vpop.f32.mrb[2].mxu1  ;;  %v6800_v24 = vadd.f32 %v4012_v33, %v4011_v59  ;;  %v4014_v36 = vpop.f32.mrb[2].mxu0  ;;  %v6835_v57 = vld [vmem:[%s363_s2] ss:$0 sm:$0xff]  ;;  %s3819_s2 = sshll.u32 %s7415_s7, 6  ;;  %s5249_s7 = smov [#allocation9]  }
 0x61c   : > { %v4087_v35 = vpop.f32.mrb[3].mxu1  ;;  %v4015_v12 = vpop.f32.mrb[3].mxu0  ;;  %s3544_s15 = sadd.s32 %s5222_s10, %s3819_s2  ;;  %s7417_s10 = sld [smem:[#allocation46_spill]] }
 0x61d   : > { %v6802_v30 = vadd.f32 %v4087_v35, %v4086_v49  ;;  %v6804_v23 = vadd.f32 %v4015_v12, %v4014_v36  ;;  %v2602_v36 = vadd.f32 %v6800_v24, %v6835_v57  ;;  %s3820_s27 = sshll.u32 %s3544_s15, 6  ;;  %s5092_s2 = sshll.u32 %s5249_s7, 4  ;;  %s5093_s2 = int_to_ptr.vmem [resolvable:$false] %s5092_s2 }
 0x61e   : > { %3042 = vmatmul.mubr.bf16.gmra.mrb[108].mxu0 %v1979_v52  ;;  %3139 = vmatmul.mubr.bf16.gmra.mrb[108].mxu1 %v1909_v55  ;;  %s5094_s15 = scalar_lea.vmem %s5093_s2, 4096  ;;  %p5095_p8 = scmp.lt.s32.totalorder %s7196_s1, %s5093_s2 }
 0x61f   : > { %3146 = vmatprep.mubr.bf16.mxu1 %v1919_v48  ;;  %4575 = vmatprep.mubr.bf16.mxu0 %v1848_v34  ;;  %v1945_v48 = vld [vmem:[#allocation3 + $0x348] sm:$0xff]  ;;  %v1911_v34 = vld [vmem:[#allocation3 + $0x238] sm:$0xff]  ;;  %p5096_p11 = scmp.lt.s32.totalorder %s5094_s15, %s5088_s23 }
 0x621   : > { %v4089_v50 = vpop.f32.mrb[4].mxu1  ;;  %v4017_v7 = vpop.f32.mrb[4].mxu0  ;;  %p5097_p2 = por %p5096_p11, %p5095_p8 }
 0x622   : > { %v4090_v32 = vpop.f32.mrb[5].mxu1  ;;  %v4018_v13 = vpop.f32.mrb[5].mxu0  ;;  %s7418_s0 = smov %s7417_s10  ;;  %s7194_s17 = scalar_lea.hbm %s7417_s10, %s3820_s27 }
 0x623   : > { %v6806_v5 = vadd.f32 %v4090_v32, %v4089_v50  ;;  %v4092_v1 = vpop.f32.mrb[6].mxu1  ;;  %v6808_v19 = vadd.f32 %v4018_v13, %v4017_v7  ;;  %v4020_v46 = vpop.f32.mrb[6].mxu0  ;;  %v1955_v32 = vld [vmem:[#allocation3 + $0x398] sm:$0xff]  ;;  %v1920_v13 = vld [vmem:[#allocation3 + $0x280] sm:$0xff]  ;;  %p5098_p5 = pnand %p5097_p2, %p5091_p10 }
 0x624   : > { %v4093_v22 = vpop.f32.mrb[7].mxu1  ;;  %v4021_v4 = vpop.f32.mrb[7].mxu0 }
 0x625   : > { %v6810_v39 = vadd.f32 %v4093_v22, %v4092_v1  ;;  %v6812_v62 = vadd.f32 %v4021_v4, %v4020_v46  ;;  %v2605_v1 = vadd.f32 %v6804_v23, %v6835_v57 }
 0x626   : > { %3147 = vmatmul.mubr.bf16.gmra.mrb[112].mxu1 %v1918_v61  ;;  %4576 = vmatmul.mubr.bf16.vlgmr.msra.gmra.mrb[112].mxu0 %v1857_v44 }
 0x627   : > { %3154 = vmatprep.mubr.bf16.mxu1 %v1928_v25  ;;  %4579 = vmatprep.mubr.bf16.mxu0 %v1866_v60 }
 0x629   : > { %v4095_v54 = vpop.f32.mrb[8].mxu1  ;;  %v4023_v38 = vpop.f32.mrb[8].mxu0 }
 0x62a   : > { %v4096_v27 = vpop.f32.mrb[9].mxu1  ;;  %v4024_v10 = vpop.f32.mrb[9].mxu0 }
 0x62b   : > { %v6814_v40 = vadd.f32 %v4096_v27, %v4095_v54  ;;  %v4098_v15 = vpop.f32.mrb[10].mxu1  ;;  %v6816_v2 = vadd.f32 %v4024_v10, %v4023_v38  ;;  %v4026_v53 = vpop.f32.mrb[10].mxu0  ;;  %v2610_v54 = vadd.f32 %v6808_v19, %v6835_v57 }
 0x62c   : > { %v4099_v18 = vpop.f32.mrb[11].mxu1  ;;  %v4027_v63 = vpop.f32.mrb[11].mxu0 }
 0x62d   : > { %v6818_v29 = vadd.f32 %v4099_v18, %v4098_v15  ;;  %v6820_v31 = vadd.f32 %v4027_v63, %v4026_v53  ;;  %v1954_v15 = vld [vmem:[#allocation3 + $0x390] sm:$0xff]  ;;  %v1929_v53 = vld [vmem:[#allocation3 + $0x2c8] sm:$0xff]  ;;  %v1964_v18 = vld [vmem:[#allocation3 + $0x3e0] sm:$0xff] }
 0x62e   : > { %3155 = vmatmul.mubr.bf16.gmra.mrb[116].mxu1 %v1927_v9  ;;  %4580 = vmatmul.mubr.bf16.gmra.mrb[116].mxu0 %v1875_v58  ;;  %v1938_v63 = vld [vmem:[#allocation3 + $0x310] sm:$0xff] }
 0x62f   : > { %3162 = vmatprep.mubr.bf16.mxu1 %v1937_v51  ;;  %4583 = vmatprep.mubr.bf16.mxu0 %v1884_v56  ;;  %v2613_v51 = vadd.f32 %v6812_v62, %v6835_v57 }
 0x631   : > { %v4101_v21 = vpop.f32.mrb[12].mxu1  ;;  %v4029_v26 = vpop.f32.mrb[12].mxu0 }
 0x632   : > { %v4102_v43 = vpop.f32.mrb[13].mxu1  ;;  %v4030_v17 = vpop.f32.mrb[13].mxu0 }
 0x633   : > { %v6822_v47 = vadd.f32 %v4102_v43, %v4101_v21  ;;  %v4104_v45 = vpop.f32.mrb[14].mxu1  ;;  %v6824_v16 = vadd.f32 %v4030_v17, %v4029_v26  ;;  %v4032_v37 = vpop.f32.mrb[14].mxu0 }
 0x634   : > { %v4105_v41 = vpop.f32.mrb[15].mxu1  ;;  %v4033_v14 = vpop.f32.mrb[15].mxu0 }
 0x635   : > { %v6826_v11 = vadd.f32 %v4105_v41, %v4104_v45  ;;  %v6828_v0 = vadd.f32 %v4033_v14, %v4032_v37 }
 0x636   : > { %3163 = vmatmul.mubr.bf16.gmra.mrb[120].mxu1 %v1936_v3  ;;  %4584 = vmatmul.mubr.bf16.gmra.mrb[120].mxu0 %v1893_v20  ;;  %v2618_v3 = vadd.f32 %v6816_v2, %v6835_v57 }
 0x637   : > { %3170 = vmatprep.mubr.bf16.mxu1 %v1946_v42  ;;  %4587 = vmatprep.mubr.bf16.mxu0 %v1902_v28  ;;  %v1963_v42 = vld [vmem:[#allocation3 + $0x3d8] sm:$0xff] }
 0x638   : > { %v1947_v28 = vld [vmem:[#allocation3 + $0x358] sm:$0xff] }
 0x639   : > { %v4123_v6 = vpop.f32.mrb[16].mxu1  ;;  %v4035_v59 = vpop.f32.mrb[16].mxu0 }
 0x63a   : > { %v4124_v33 = vpop.f32.mrb[17].mxu1  ;;  %v4036_v49 = vpop.f32.mrb[17].mxu0 }
 0x63b   : > { %v4125_v52 = vadd.f32 %v4124_v33, %v4123_v6  ;;  %v4126_v55 = vpop.f32.mrb[18].mxu1  ;;  %v6839_v35 = vadd.f32 %v4036_v49, %v4035_v59  ;;  %v4038_v12 = vpop.f32.mrb[18].mxu0  ;;  %v1973_v33 = vld [vmem:[#allocation3 + $0x428] sm:$0xff]  ;;  %v1956_v49 = vld [vmem:[#allocation3 + $0x3a0] sm:$0xff] }
 0x63c   : > { %v4127_v50 = vpop.f32.mrb[19].mxu1  ;;  %v4039_v7 = vpop.f32.mrb[19].mxu0 }
 0x63d   : > { %v6843_v46 = vadd.f32 %v4125_v52, %v2602_v36  ;;  %v4128_v61 = vadd.f32 %v4127_v50, %v4126_v55  ;;  %v6845_v44 = vadd.f32 %v4039_v7, %v4038_v12  ;;  %v2621_v36 = vadd.f32 %v6820_v31, %v6835_v57 }
 0x63e   : > { %3171 = vmatmul.mubr.bf16.gmra.mrb[124].mxu1 %v1945_v48  ;;  %4588 = vmatmul.mubr.bf16.gmra.mrb[124].mxu0 %v1911_v34 }
 0x63f   : > { %v6847_v24 = vadd.f32 %v4128_v61, %v2605_v1  ;;  %3178 = vmatprep.mubr.bf16.mxu1 %v1955_v32  ;;  %4591 = vmatprep.mubr.bf16.mxu0 %v1920_v13  ;;  %v2626_v32 = vadd.f32 %v6824_v16, %v6835_v57 }
 0x641   : > { %v4129_v22 = vpop.f32.mrb[20].mxu1  ;;  %v4041_v4 = vpop.f32.mrb[20].mxu0 }
 0x642   : > { %v4130_v25 = vpop.f32.mrb[21].mxu1  ;;  %v4042_v60 = vpop.f32.mrb[21].mxu0 }
 0x643   : > { %v4131_v38 = vadd.f32 %v4130_v25, %v4129_v22  ;;  %v4132_v23 = vpop.f32.mrb[22].mxu1  ;;  %v6851_v27 = vadd.f32 %v4042_v60, %v4041_v4  ;;  %v4044_v10 = vpop.f32.mrb[22].mxu0  ;;  %v1972_v22 = vld [vmem:[#allocation3 + $0x420] sm:$0xff]  ;;  %v1965_v4 = vld [vmem:[#allocation3 + $0x3e8] sm:$0xff] }
 0x644   : > { %v4133_v9 = vpop.f32.mrb[23].mxu1  ;;  %v4045_v58 = vpop.f32.mrb[23].mxu0 }
 0x645   : > { %v6855_v56 = vadd.f32 %v4131_v38, %v2610_v54  ;;  %v4134_v21 = vadd.f32 %v4133_v9, %v4132_v23  ;;  %v6857_v26 = vadd.f32 %v4045_v58, %v4044_v10  ;;  %v1982_v54 = vld [vmem:[#allocation3 + $0x470] sm:$0xff]  ;;  %v2629_v23 = vadd.f32 %v6828_v0, %v6835_v57 }
 0x646   : > { %3179 = vmatmul.mubr.bf16.gmra.mrb[128].mxu1 %v1954_v15  ;;  %4592 = vmatmul.mubr.bf16.gmra.mrb[128].mxu0 %v1929_v53  ;;  %v1974_v38 = vld [vmem:[#allocation3 + $0x430] sm:$0xff] }
 0x647   : > { %v6859_v19 = vadd.f32 %v4134_v21, %v2613_v51  ;;  %3186 = vmatprep.mubr.bf16.mxu1 %v1964_v18  ;;  %4595 = vmatprep.mubr.bf16.mxu0 %v1938_v63  ;;  %v2634_v51 = vadd.f32 %v6839_v35, %v6835_v57 }
 0x649   : > { %v4135_v43 = vpop.f32.mrb[24].mxu1  ;;  %v4047_v17 = vpop.f32.mrb[24].mxu0 }
 0x64a   : > { %v4136_v45 = vpop.f32.mrb[25].mxu1  ;;  %v4048_v37 = vpop.f32.mrb[25].mxu0 }
 0x64b   : > { %v4137_v20 = vadd.f32 %v4136_v45, %v4135_v43  ;;  %v4138_v62 = vpop.f32.mrb[26].mxu1  ;;  %v6863_v41 = vadd.f32 %v4048_v37, %v4047_v17  ;;  %v4050_v14 = vpop.f32.mrb[26].mxu0  ;;  %v1981_v45 = vld [vmem:[#allocation3 + $0x468] sm:$0xff]  ;;  %v1983_v37 = vld [vmem:[#allocation3 + $0x478] sm:$0xff] }
 0x64c   : > { %v4139_v6 = vpop.f32.mrb[27].mxu1  ;;  %v4051_v59 = vpop.f32.mrb[27].mxu0 }
 0x64d   : > { %v6867_v52 = vadd.f32 %v4137_v20, %v2618_v3  ;;  %v4140_v55 = vadd.f32 %v4139_v6, %v4138_v62  ;;  %v6869_v12 = vadd.f32 %v4051_v59, %v4050_v14  ;;  %v2637_v62 = vadd.f32 %v6845_v44, %v6835_v57 }
 0x64e   : > { %3187 = vmatmul.mubr.bf16.gmra.mrb[132].mxu1 %v1963_v42  ;;  %4596 = vmatmul.mubr.bf16.gmra.mrb[132].mxu0 %v1947_v28 }
 0x64f   : > { %v6871_v2 = vadd.f32 %v4140_v55, %v2621_v36  ;;  %3194 = vmatprep.mubr.bf16.mxu1 %v1973_v33  ;;  %4599 = vmatprep.mubr.bf16.mxu0 %v1956_v49  ;;  %v2642_v36 = vadd.f32 %v6851_v27, %v6835_v57 }
 0x651   : > { %v4141_v48 = vpop.f32.mrb[28].mxu1  ;;  %v4053_v34 = vpop.f32.mrb[28].mxu0 }
 0x652   : > { %v4142_v50 = vpop.f32.mrb[29].mxu1  ;;  %v4054_v7 = vpop.f32.mrb[29].mxu0 }
 0x653   : > { %v4143_v13 = vadd.f32 %v4142_v50, %v4141_v48  ;;  %v4144_v31 = vpop.f32.mrb[30].mxu1  ;;  %v6875_v1 = vadd.f32 %v4054_v7, %v4053_v34  ;;  %v4056_v61 = vpop.f32.mrb[30].mxu0 }
 0x654   : > { %v4145_v25 = vpop.f32.mrb[31].mxu1  ;;  %v4057_v60 = vpop.f32.mrb[31].mxu0 }
 0x655   : > { %v6879_v10 = vadd.f32 %v4143_v13, %v2626_v32  ;;  %v4146_v15 = vadd.f32 %v4145_v25, %v4144_v31  ;;  %v6881_v53 = vadd.f32 %v4057_v60, %v4056_v61  ;;  %v2645_v32 = vadd.f32 %v6857_v26, %v6835_v57 }
 0x656   : > { %3195 = vmatmul.mubr.bf16.gmra.mrb[136].mxu1 %v1972_v22  ;;  %4600 = vmatmul.mubr.bf16.gmra.mrb[136].mxu0 %v1965_v4 }
 0x657   : > { %v6883_v16 = vadd.f32 %v4146_v15, %v2629_v23  ;;  %3202 = vmatprep.mubr.bf16.mxu1 %v1982_v54  ;;  %4603 = vmatprep.mubr.bf16.mxu0 %v1974_v38  ;;  %v2650_v54 = vadd.f32 %v6863_v41, %v6835_v57 }
 0x659   : > { %v4147_v9 = vpop.f32.mrb[32].mxu1  ;;  %v4059_v58 = vpop.f32.mrb[32].mxu0 }
 0x65a   : > { %v4148_v18 = vpop.f32.mrb[33].mxu1  ;;  %v4060_v63 = vpop.f32.mrb[33].mxu0 }
 0x65b   : > { %v4149_v21 = vadd.f32 %v4148_v18, %v4147_v9  ;;  %v4150_v0 = vpop.f32.mrb[34].mxu1  ;;  %v6887_v43 = vadd.f32 %v4060_v63, %v4059_v58  ;;  %v4062_v17 = vpop.f32.mrb[34].mxu0  ;;  %v2653_v18 = vadd.f32 %v6869_v12, %v6835_v57 }
 0x65c   : > { %v4151_v3 = vpop.f32.mrb[35].mxu1  ;;  %v4063_v20 = vpop.f32.mrb[35].mxu0 }
 0x65d   : > { %v6891_v14 = vadd.f32 %v4149_v21, %v2634_v51  ;;  %v4152_v42 = vadd.f32 %v4151_v3, %v4150_v0  ;;  %v4064_v28 = vadd.f32 %v4063_v20, %v4062_v17  ;;  %v2658_v3 = vadd.f32 %v6875_v1, %v6835_v57 }
 0x65e   : > { %3203 = vmatmul.mubr.bf16.gmra.mrb[140].mxu1 %v1981_v45  ;;  %4604 = vmatmul.mubr.bf16.gmra.mrb[140].mxu0 %v1983_v37 }
 0x65f   : > { %v6893_v6 = vadd.f32 %v4152_v42, %v2637_v62 }
 0x661   : > { %v4153_v35 = vpop.f32.mrb[36].mxu1  ;;  %v4065_v59 = vpop.f32.mrb[36].mxu0 }
 0x662   : > { %v4154_v33 = vpop.f32.mrb[37].mxu1  ;;  %v4066_v49 = vpop.f32.mrb[37].mxu0 }
 0x663   : > { %v4155_v55 = vadd.f32 %v4154_v33, %v4153_v35  ;;  %v4156_v48 = vpop.f32.mrb[38].mxu1  ;;  %v6897_v34 = vadd.f32 %v4066_v49, %v4065_v59  ;;  %v4068_v44 = vpop.f32.mrb[38].mxu0  ;;  %v2661_v33 = vadd.f32 %v6881_v53, %v6835_v57  ;;  %v2669_v53 = vadd.f32 %v4064_v28, %v6835_v57 }
 0x664   : > { %v4157_v50 = vpop.f32.mrb[39].mxu1  ;;  %v4069_v7 = vpop.f32.mrb[39].mxu0 }
 0x665   : > { %v6901_v13 = vadd.f32 %v4155_v55, %v2642_v36  ;;  %v4158_v31 = vadd.f32 %v4157_v50, %v4156_v48  ;;  %v4070_v61 = vadd.f32 %v4069_v7, %v4068_v44  ;;  %v2674_v28 = vadd.f32 %v6897_v34, %v6835_v57 }
 0x667   : > { %v6903_v22 = vadd.f32 %v4158_v31, %v2645_v32  ;;  %v2666_v32 = vadd.f32 %v6887_v43, %v6835_v57 }
 0x669   : > { %v4159_v4 = vpop.f32.mrb[40].mxu1  ;;  %v4071_v25 = vpop.f32.mrb[40].mxu0 }
 0x66a   : > { %v4160_v60 = vpop.f32.mrb[41].mxu1  ;;  %v4072_v27 = vpop.f32.mrb[41].mxu0 }
 0x66b   : > { %v4161_v38 = vadd.f32 %v4160_v60, %v4159_v4  ;;  %v4162_v23 = vpop.f32.mrb[42].mxu1  ;;  %v6907_v15 = vadd.f32 %v4072_v27, %v4071_v25  ;;  %v4074_v9 = vpop.f32.mrb[42].mxu0 }
 0x66c   : > { %v4163_v58 = vpop.f32.mrb[43].mxu1  ;;  %v4075_v26 = vpop.f32.mrb[43].mxu0 }
 0x66d   : > { %v6911_v63 = vadd.f32 %v4161_v38, %v2650_v54  ;;  %v4164_v51 = vadd.f32 %v4163_v58, %v4162_v23  ;;  %v6913_v21 = vadd.f32 %v4075_v26, %v4074_v9 }
 0x66f   : > { %v6915_v0 = vadd.f32 %v4164_v51, %v2653_v18 }
 0x671   : > { %v4165_v17 = vpop.f32.mrb[44].mxu1  ;;  %v4077_v45 = vpop.f32.mrb[44].mxu0 }
 0x672   : > { %v4166_v41 = vpop.f32.mrb[45].mxu1  ;;  %v4078_v37 = vpop.f32.mrb[45].mxu0 }
 0x673   : > { %v4167_v20 = vadd.f32 %v4166_v41, %v4165_v17  ;;  %v4168_v62 = vpop.f32.mrb[46].mxu1  ;;  %v6919_v42 = vadd.f32 %v4078_v37, %v4077_v45  ;;  %v4080_v35 = vpop.f32.mrb[46].mxu0 }
 0x674   : > { %v4169_v12 = vpop.f32.mrb[47].mxu1  ;;  %v4081_v59 = vpop.f32.mrb[47].mxu0 }
 0x675   : > { %v6923_v49 = vadd.f32 %v4167_v20, %v2658_v3  ;;  %v4170_v36 = vadd.f32 %v4169_v12, %v4168_v62  ;;  %v6925_v55 = vadd.f32 %v4081_v59, %v4080_v35 }
 0x677   : > { %v6927_v48 = vadd.f32 %v4170_v36, %v2661_v33 }
 0x679   : > { %v4171_v44 = vpop.f32.mrb[48].mxu1  ;;  %v4235_v50 = vpop.f32.mrb[48].mxu0 }
 0x67a   : > { %v4172_v1 = vpop.f32.mrb[49].mxu1  ;;  %v4236_v7 = vpop.f32.mrb[49].mxu0 }
 0x67b   : > { %v4173_v31 = vadd.f32 %v4172_v1, %v4171_v44  ;;  %v4237_v4 = vadd.f32 %v4236_v7, %v4235_v50  ;;  %v4174_v25 = vpop.f32.mrb[50].mxu1  ;;  %v4238_v60 = vpop.f32.mrb[50].mxu0 }
 0x67c   : > { %v4175_v27 = vpop.f32.mrb[51].mxu1  ;;  %v4239_v54 = vpop.f32.mrb[51].mxu0 }
 0x67d   : > { %v6932_v38 = vadd.f32 %v4173_v31, %v2666_v32  ;;  %v6935_v23 = vadd.f32 %v4237_v4, %v6843_v46  ;;  %v4176_v9 = vadd.f32 %v4175_v27, %v4174_v25  ;;  %v4240_v58 = vadd.f32 %v4239_v54, %v4238_v60 }
 0x67e   : > { %v2677_v46 = vadd.f32 %v4070_v61, %v6835_v57  ;;  %v2682_v61 = vadd.f32 %v6907_v15, %v6835_v57 }
 0x67f   : > { %v6937_v26 = vadd.f32 %v4176_v9, %v2669_v53  ;;  %v6940_v18 = vadd.f32 %v4240_v58, %v6847_v24 }
 0x681   : > { %v4177_v43 = vpop.f32.mrb[52].mxu1  ;;  %v4241_v51 = vpop.f32.mrb[52].mxu0 }
 0x682   : > { %v4178_v17 = vpop.f32.mrb[53].mxu1  ;;  %v4242_v45 = vpop.f32.mrb[53].mxu0 }
 0x683   : > { %v4179_v41 = vadd.f32 %v4178_v17, %v4177_v43  ;;  %v4243_v37 = vadd.f32 %v4242_v45, %v4241_v51  ;;  %v4180_v3 = vpop.f32.mrb[54].mxu1  ;;  %v4244_v20 = vpop.f32.mrb[54].mxu0 }
 0x684   : > { %v4181_v62 = vpop.f32.mrb[55].mxu1  ;;  %v4245_v35 = vpop.f32.mrb[55].mxu0 }
 0x685   : > { %v6945_v12 = vadd.f32 %v4179_v41, %v2674_v28  ;;  %v6948_v24 = vadd.f32 %v4243_v37, %v6855_v56  ;;  %v4182_v59 = vadd.f32 %v4181_v62, %v4180_v3  ;;  %v4246_v33 = vadd.f32 %v4245_v35, %v4244_v20 }
 0x686   : > { %v2685_v56 = vadd.f32 %v6913_v21, %v6835_v57  ;;  %v2690_v21 = vadd.f32 %v6919_v42, %v6835_v57 }
 0x687   : > { %v6950_v36 = vadd.f32 %v4182_v59, %v2677_v46  ;;  %v6953_v44 = vadd.f32 %v4246_v33, %v6859_v19 }
 0x689   : > { %v4183_v34 = vpop.f32.mrb[56].mxu1  ;;  %v4247_v50 = vpop.f32.mrb[56].mxu0 }
 0x68a   : > { %v4184_v1 = vpop.f32.mrb[57].mxu1  ;;  %v4248_v7 = vpop.f32.mrb[57].mxu0 }
 0x68b   : > { %v4185_v32 = vadd.f32 %v4184_v1, %v4183_v34  ;;  %v4249_v31 = vadd.f32 %v4248_v7, %v4247_v50  ;;  %v4186_v4 = vpop.f32.mrb[58].mxu1  ;;  %v4250_v25 = vpop.f32.mrb[58].mxu0 }
 0x68c   : > { %v4187_v60 = vpop.f32.mrb[59].mxu1  ;;  %v4251_v53 = vpop.f32.mrb[59].mxu0 }
 0x68d   : > { %v6959_v27 = vadd.f32 %v4185_v32, %v2682_v61  ;;  %v6962_v19 = vadd.f32 %v4249_v31, %v6867_v52  ;;  %v4188_v54 = vadd.f32 %v4187_v60, %v4186_v4  ;;  %v4252_v9 = vadd.f32 %v4251_v53, %v4250_v25 }
 0x68e   : > { %v2693_v52 = vadd.f32 %v6925_v55, %v6835_v57  ;;  %v2698_v55 = vadd.f32 %v6798_v8, %v6835_v57 }
 0x68f   : > { %v6964_v58 = vadd.f32 %v4188_v54, %v2685_v56  ;;  %v6967_v15 = vadd.f32 %v4252_v9, %v6871_v2 }
 0x691   : > { %v4189_v43 = vpop.f32.mrb[60].mxu1  ;;  %v4253_v51 = vpop.f32.mrb[60].mxu0 }
 0x692   : > { %v4190_v17 = vpop.f32.mrb[61].mxu1  ;;  %v4254_v45 = vpop.f32.mrb[61].mxu0 }
 0x693   : > { %v4191_v28 = vadd.f32 %v4190_v17, %v4189_v43  ;;  %v4255_v41 = vadd.f32 %v4254_v45, %v4253_v51  ;;  %v4192_v37 = vpop.f32.mrb[62].mxu1  ;;  %v4256_v3 = vpop.f32.mrb[62].mxu0 }
 0x694   : > { %v4193_v20 = vpop.f32.mrb[63].mxu1  ;;  %v4257_v46 = vpop.f32.mrb[63].mxu0 }
 0x695   : > { %v6973_v62 = vadd.f32 %v4191_v28, %v2690_v21  ;;  %v6976_v2 = vadd.f32 %v4255_v41, %v6879_v10  ;;  %v4194_v35 = vadd.f32 %v4193_v20, %v4192_v37  ;;  %v4258_v59 = vadd.f32 %v4257_v46, %v4256_v3 }
 0x696   : > { %v2701_v10 = vadd.f32 %v6802_v30, %v6835_v57  ;;  %v2706_v30 = vadd.f32 %v6806_v5, %v6835_v57 }
 0x697   : > { %v6978_v33 = vadd.f32 %v4194_v35, %v2693_v52  ;;  %v6981_v42 = vadd.f32 %v4258_v59, %v6883_v16 }
 0x699   : > { %v4195_v34 = vpop.f32.mrb[64].mxu1  ;;  %v4259_v50 = vpop.f32.mrb[64].mxu0 }
 0x69a   : > { %v4196_v1 = vpop.f32.mrb[65].mxu1  ;;  %v4260_v7 = vpop.f32.mrb[65].mxu0 }
 0x69b   : > { %v4197_v61 = vadd.f32 %v4196_v1, %v4195_v34  ;;  %v4261_v32 = vadd.f32 %v4260_v7, %v4259_v50  ;;  %v4198_v31 = vpop.f32.mrb[66].mxu1  ;;  %v4262_v4 = vpop.f32.mrb[66].mxu0 }
 0x69c   : > { %v4199_v25 = vpop.f32.mrb[67].mxu1  ;;  %v4263_v56 = vpop.f32.mrb[67].mxu0 }
 0x69d   : > { %v6987_v60 = vadd.f32 %v4197_v61, %v2698_v55  ;;  %v6990_v16 = vadd.f32 %v4261_v32, %v6891_v14  ;;  %v4200_v53 = vadd.f32 %v4199_v25, %v4198_v31  ;;  %v4264_v54 = vadd.f32 %v4263_v56, %v4262_v4 }
 0x69e   : > { %v2709_v14 = vadd.f32 %v6810_v39, %v6835_v57  ;;  %v2714_v39 = vadd.f32 %v6814_v40, %v6835_v57 }
 0x69f   : > { %v6992_v9 = vadd.f32 %v4200_v53, %v2701_v10  ;;  %v6995_v8 = vadd.f32 %v4264_v54, %v6893_v6 }
 0x6a1   : > { %v4201_v43 = vpop.f32.mrb[68].mxu1  ;;  %v4265_v51 = vpop.f32.mrb[68].mxu0 }
 0x6a2   : > { %v4202_v17 = vpop.f32.mrb[69].mxu1  ;;  %v4266_v45 = vpop.f32.mrb[69].mxu0 }
 0x6a3   : > { %v4203_v21 = vadd.f32 %v4202_v17, %v4201_v43  ;;  %v4267_v28 = vadd.f32 %v4266_v45, %v4265_v51  ;;  %v4204_v41 = vpop.f32.mrb[70].mxu1  ;;  %v4268_v37 = vpop.f32.mrb[70].mxu0 }
 0x6a4   : > { %v4205_v3 = vpop.f32.mrb[71].mxu1  ;;  %v4269_v52 = vpop.f32.mrb[71].mxu0 }
 0x6a5   : > { %v7001_v20 = vadd.f32 %v4203_v21, %v2706_v30  ;;  %v7004_v6 = vadd.f32 %v4267_v28, %v6901_v13  ;;  %v4206_v46 = vadd.f32 %v4205_v3, %v4204_v41  ;;  %v4270_v35 = vadd.f32 %v4269_v52, %v4268_v37 }
 0x6a6   : > { %v2717_v13 = vadd.f32 %v6818_v29, %v6835_v57  ;;  %v2722_v29 = vadd.f32 %v6822_v47, %v6835_v57 }
 0x6a7   : > { %v7006_v59 = vadd.f32 %v4206_v46, %v2709_v14  ;;  %v7009_v5 = vadd.f32 %v4270_v35, %v6903_v22 }
 0x6a9   : > { %v4207_v34 = vpop.f32.mrb[72].mxu1  ;;  %v4271_v50 = vpop.f32.mrb[72].mxu0 }
 0x6aa   : > { %v4208_v1 = vpop.f32.mrb[73].mxu1  ;;  %v4272_v7 = vpop.f32.mrb[73].mxu0 }
 0x6ab   : > { %v4209_v55 = vadd.f32 %v4208_v1, %v4207_v34  ;;  %v4273_v61 = vadd.f32 %v4272_v7, %v4271_v50  ;;  %v4210_v32 = vpop.f32.mrb[74].mxu1  ;;  %v4274_v31 = vpop.f32.mrb[74].mxu0 }
 0x6ac   : > { %v4211_v4 = vpop.f32.mrb[75].mxu1  ;;  %v4275_v10 = vpop.f32.mrb[75].mxu0 }
 0x6ad   : > { %v7015_v25 = vadd.f32 %v4209_v55, %v2714_v39  ;;  %v7018_v22 = vadd.f32 %v4273_v61, %v6911_v63  ;;  %v4212_v56 = vadd.f32 %v4211_v4, %v4210_v32  ;;  %v4276_v53 = vadd.f32 %v4275_v10, %v4274_v31 }
 0x6ae   : > { %v2725_v63 = vadd.f32 %v6826_v11, %v6835_v57 }
 0x6af   : > { %v7020_v54 = vadd.f32 %v4212_v56, %v2717_v13  ;;  %v7023_v40 = vadd.f32 %v4276_v53, %v6915_v0 }
 0x6b1   : > { %v4213_v43 = vpop.f32.mrb[76].mxu1  ;;  %v4277_v51 = vpop.f32.mrb[76].mxu0 }
 0x6b2   : > { %v4214_v17 = vpop.f32.mrb[77].mxu1  ;;  %v4278_v45 = vpop.f32.mrb[77].mxu0 }
 0x6b3   : > { %v4215_v30 = vadd.f32 %v4214_v17, %v4213_v43  ;;  %v4279_v21 = vadd.f32 %v4278_v45, %v4277_v51  ;;  %v4216_v28 = vpop.f32.mrb[78].mxu1  ;;  %v4280_v41 = vpop.f32.mrb[78].mxu0 }
 0x6b4   : > { %v4217_v37 = vpop.f32.mrb[79].mxu1  ;;  %v4281_v14 = vpop.f32.mrb[79].mxu0 }
 0x6b5   : > { %v7029_v3 = vadd.f32 %v4215_v30, %v2722_v29  ;;  %v7032_v0 = vadd.f32 %v4279_v21, %v6923_v49  ;;  %v4218_v52 = vadd.f32 %v4217_v37, %v4216_v28  ;;  %v4282_v46 = vadd.f32 %v4281_v14, %v4280_v41 }
 0x6b7   : > { %v7034_v35 = vadd.f32 %v4218_v52, %v2725_v63  ;;  %v7037_v47 = vadd.f32 %v4282_v46, %v6927_v48 }
 0x6b9   : > { %v4283_v34 = vpop.f32.mrb[80].mxu0  ;;  %v4347_v50 = vpop.f32.mrb[80].mxu1 }
 0x6ba   : > { %v4284_v1 = vpop.f32.mrb[81].mxu0  ;;  %v4348_v7 = vpop.f32.mrb[81].mxu1 }
 0x6bb   : > { %v4285_v39 = vadd.f32 %v4284_v1, %v4283_v34  ;;  %v4349_v11 = vadd.f32 %v4348_v7, %v4347_v50  ;;  %v4286_v57 = vpop.f32.mrb[82].mxu0  ;;  %v4350_v55 = vpop.f32.mrb[82].mxu1 }
 0x6bc   : > { %v4287_v61 = vpop.f32.mrb[83].mxu0  ;;  %v4351_v32 = vpop.f32.mrb[83].mxu1 }
 0x6bd   : > { %v7040_v49 = vadd.f32 %v4285_v39, %v6932_v38  ;;  %v4288_v31 = vadd.f32 %v4287_v61, %v4286_v57  ;;  %v4352_v13 = vadd.f32 %v4351_v32, %v4350_v55  ;;  %v7043_v4 = vadd.f32 %v4349_v11, %v6935_v23 }
 0x6bf   : > { %v7046_v48 = vadd.f32 %v4288_v31, %v6937_v26  ;;  %v7049_v10 = vadd.f32 %v4352_v13, %v6940_v18 }
 0x6c1   : > { %v4289_v56 = vpop.f32.mrb[84].mxu0  ;;  %v4353_v53 = vpop.f32.mrb[84].mxu1 }
 0x6c2   : > { %v4290_v43 = vpop.f32.mrb[85].mxu0  ;;  %v4354_v51 = vpop.f32.mrb[85].mxu1 }
 0x6c3   : > { %v4291_v17 = vadd.f32 %v4290_v43, %v4289_v56  ;;  %v4355_v45 = vadd.f32 %v4354_v51, %v4353_v53  ;;  %v4292_v29 = vpop.f32.mrb[86].mxu0  ;;  %v4356_v38 = vpop.f32.mrb[86].mxu1 }
 0x6c4   : > { %v4293_v30 = vpop.f32.mrb[87].mxu0  ;;  %v4357_v21 = vpop.f32.mrb[87].mxu1 }
 0x6c5   : > { %v7052_v28 = vadd.f32 %v4291_v17, %v6945_v12  ;;  %v4294_v23 = vadd.f32 %v4293_v30, %v4292_v29  ;;  %v4358_v41 = vadd.f32 %v4357_v21, %v4356_v38  ;;  %v7055_v26 = vadd.f32 %v4355_v45, %v6948_v24 }
 0x6c7   : > { %v7058_v18 = vadd.f32 %v4294_v23, %v6950_v36  ;;  %v7061_v63 = vadd.f32 %v4358_v41, %v6953_v44 }
 0x6c9   : > { %v4295_v37 = vpop.f32.mrb[88].mxu0  ;;  %v4359_v14 = vpop.f32.mrb[88].mxu1 }
 0x6ca   : > { %v4296_v52 = vpop.f32.mrb[89].mxu0  ;;  %v4360_v46 = vpop.f32.mrb[89].mxu1 }
 0x6cb   : > { %v4297_v34 = vadd.f32 %v4296_v52, %v4295_v37  ;;  %v4361_v50 = vadd.f32 %v4360_v46, %v4359_v14  ;;  %v4298_v1 = vpop.f32.mrb[90].mxu0  ;;  %v4362_v12 = vpop.f32.mrb[90].mxu1 }
 0x6cc   : > { %v4299_v7 = vpop.f32.mrb[91].mxu0  ;;  %v4363_v39 = vpop.f32.mrb[91].mxu1 }
 0x6cd   : > { %v7064_v11 = vadd.f32 %v4297_v34, %v6959_v27  ;;  %v4300_v24 = vadd.f32 %v4299_v7, %v4298_v1  ;;  %v4364_v57 = vadd.f32 %v4363_v39, %v4362_v12  ;;  %v7067_v36 = vadd.f32 %v4361_v50, %v6962_v19 }
 0x6cf   : > { %v7070_v44 = vadd.f32 %v4300_v24, %v6964_v58  ;;  %v7073_v55 = vadd.f32 %v4364_v57, %v6967_v15 }
 0x6d1   : > { %v4301_v61 = vpop.f32.mrb[92].mxu0  ;;  %v4365_v32 = vpop.f32.mrb[92].mxu1 }
 0x6d2   : > { %v4302_v31 = vpop.f32.mrb[93].mxu0  ;;  %v4366_v13 = vpop.f32.mrb[93].mxu1 }
 0x6d3   : > { %v4303_v56 = vadd.f32 %v4302_v31, %v4301_v61  ;;  %v4367_v53 = vadd.f32 %v4366_v13, %v4365_v32  ;;  %v4304_v43 = vpop.f32.mrb[94].mxu0  ;;  %v4368_v27 = vpop.f32.mrb[94].mxu1 }
 0x6d4   : > { %v4305_v51 = vpop.f32.mrb[95].mxu0  ;;  %v4369_v17 = vpop.f32.mrb[95].mxu1 }
 0x6d5   : > { %v7076_v45 = vadd.f32 %v4303_v56, %v6973_v62  ;;  %v4306_v19 = vadd.f32 %v4305_v51, %v4304_v43  ;;  %v4370_v29 = vadd.f32 %v4369_v17, %v4368_v27  ;;  %v7079_v58 = vadd.f32 %v4367_v53, %v6976_v2 }
 0x6d7   : > { %v7082_v15 = vadd.f32 %v4306_v19, %v6978_v33  ;;  %v7085_v38 = vadd.f32 %v4370_v29, %v6981_v42 }
 0x6d9   : > { %v4307_v30 = vpop.f32.mrb[96].mxu0  ;;  %v4371_v21 = vpop.f32.mrb[96].mxu1 }
 0x6da   : > { %v4308_v23 = vpop.f32.mrb[97].mxu0  ;;  %v4372_v41 = vpop.f32.mrb[97].mxu1 }
 0x6db   : > { %v4309_v37 = vadd.f32 %v4308_v23, %v4307_v30  ;;  %v4373_v14 = vadd.f32 %v4372_v41, %v4371_v21  ;;  %v4310_v52 = vpop.f32.mrb[98].mxu0  ;;  %v4374_v62 = vpop.f32.mrb[98].mxu1 }
 0x6dc   : > { %v4311_v46 = vpop.f32.mrb[99].mxu0  ;;  %v4375_v34 = vpop.f32.mrb[99].mxu1 }
 0x6dd   : > { %v7088_v50 = vadd.f32 %v4309_v37, %v6987_v60  ;;  %v4312_v2 = vadd.f32 %v4311_v46, %v4310_v52  ;;  %v4376_v1 = vadd.f32 %v4375_v34, %v4374_v62  ;;  %v7091_v33 = vadd.f32 %v4373_v14, %v6990_v16 }
 0x6df   : > { %v7094_v42 = vadd.f32 %v4312_v2, %v6992_v9  ;;  %v7097_v12 = vadd.f32 %v4376_v1, %v6995_v8 }
 0x6e1   : > { %v4313_v7 = vpop.f32.mrb[100].mxu0  ;;  %v4377_v39 = vpop.f32.mrb[100].mxu1 }
 0x6e2   : > { %v4314_v24 = vpop.f32.mrb[101].mxu0  ;;  %v4378_v57 = vpop.f32.mrb[101].mxu1 }
 0x6e3   : > { %v4315_v61 = vadd.f32 %v4314_v24, %v4313_v7  ;;  %v4379_v32 = vadd.f32 %v4378_v57, %v4377_v39  ;;  %v4316_v31 = vpop.f32.mrb[102].mxu0  ;;  %v4380_v60 = vpop.f32.mrb[102].mxu1 }
 0x6e4   : > { %v4317_v13 = vpop.f32.mrb[103].mxu0  ;;  %v4381_v56 = vpop.f32.mrb[103].mxu1 }
 0x6e5   : > { %v7100_v53 = vadd.f32 %v4315_v61, %v7001_v20  ;;  %v4318_v16 = vadd.f32 %v4317_v13, %v4316_v31  ;;  %v4382_v43 = vadd.f32 %v4381_v56, %v4380_v60  ;;  %v7103_v9 = vadd.f32 %v4379_v32, %v7004_v6 }
 0x6e7   : > { %v7106_v8 = vadd.f32 %v4318_v16, %v7006_v59  ;;  %v7109_v27 = vadd.f32 %v4382_v43, %v7009_v5 }
 0x6e9   : > { %v4319_v51 = vpop.f32.mrb[104].mxu0  ;;  %v4383_v17 = vpop.f32.mrb[104].mxu1 }
 0x6ea   : > { %v4320_v19 = vpop.f32.mrb[105].mxu0  ;;  %v4384_v29 = vpop.f32.mrb[105].mxu1 }
 0x6eb   : > { %v4321_v30 = vadd.f32 %v4320_v19, %v4319_v51  ;;  %v4385_v21 = vadd.f32 %v4384_v29, %v4383_v17  ;;  %v4322_v23 = vpop.f32.mrb[106].mxu0  ;;  %v4386_v20 = vpop.f32.mrb[106].mxu1 }
 0x6ec   : > { %v4323_v41 = vpop.f32.mrb[107].mxu0  ;;  %v4387_v37 = vpop.f32.mrb[107].mxu1 }
 0x6ed   : > { %v7112_v14 = vadd.f32 %v4321_v30, %v7015_v25  ;;  %v4324_v6 = vadd.f32 %v4323_v41, %v4322_v23  ;;  %v4388_v52 = vadd.f32 %v4387_v37, %v4386_v20  ;;  %v7115_v59 = vadd.f32 %v4385_v21, %v7018_v22 }
 0x6ef   : > { %v7118_v5 = vadd.f32 %v4324_v6, %v7020_v54  ;;  %v7121_v62 = vadd.f32 %v4388_v52, %v7023_v40 }
 0x6f1   : > { %v4325_v46 = vpop.f32.mrb[108].mxu0  ;;  %v4389_v34 = vpop.f32.mrb[108].mxu1 }
 0x6f2   : > { %v4326_v2 = vpop.f32.mrb[109].mxu0  ;;  %v4390_v1 = vpop.f32.mrb[109].mxu1 }
 0x6f3   : > { %v4327_v7 = vadd.f32 %v4326_v2, %v4325_v46  ;;  %v4391_v39 = vadd.f32 %v4390_v1, %v4389_v34  ;;  %v4328_v24 = vpop.f32.mrb[110].mxu0  ;;  %v4392_v25 = vpop.f32.mrb[110].mxu1 }
 0x6f4   : > { %v4329_v57 = vpop.f32.mrb[111].mxu0  ;;  %v4393_v61 = vpop.f32.mrb[111].mxu1 }
 0x6f5   : > { %v7124_v32 = vadd.f32 %v4327_v7, %v7029_v3  ;;  %v4330_v22 = vadd.f32 %v4329_v57, %v4328_v24  ;;  %v4394_v31 = vadd.f32 %v4393_v61, %v4392_v25  ;;  %v7127_v54 = vadd.f32 %v4391_v39, %v7032_v0 }
 0x6f7   : > { %v7130_v40 = vadd.f32 %v4330_v22, %v7034_v35  ;;  %v7133_v60 = vadd.f32 %v4394_v31, %v7037_v47 }
 0x6f9   : > { %v4395_v13 = vpop.f32.mrb[112].mxu1  ;;  %v4577_v56 = vpop.f32.mrb[112].mxu0 }
 0x6fa   : > { %v3254_v16 = vadd.f32 %v4577_v56, %v7055_v26  ;;  %v4396_v43 = vpop.f32.mrb[113].mxu1  ;;  %v3245_v3 = vpop.f32.mrb[113].mxu0 }
 0x6fb   : > { %v4397_v51 = vadd.f32 %v4396_v43, %v4395_v13  ;;  %v3246_v17 = vadd.f32 %v3245_v3, %v7043_v4  ;;  %v4398_v19 = vpop.f32.mrb[114].mxu1  ;;  %v4578_v0 = vpop.f32.mrb[114].mxu0 }
 0x6fc   : > { %v3257_v29 = vadd.f32 %v4578_v0, %v7061_v63  ;;  %v4399_v35 = vpop.f32.mrb[115].mxu1  ;;  %v3248_v30 = vpop.f32.mrb[115].mxu0 }
 0x6fd   : > { %v4400_v21 = vadd.f32 %v4399_v35, %v4398_v19  ;;  %v3249_v47 = vadd.f32 %v3248_v30, %v7049_v10  ;;  %v7140_v23 = vadd.f32 %v4397_v51, %v7040_v49 }
 0x6fe   : > { %v3864_v26 = vpack.c.bf16 %v3257_v29, %v3254_v16 }
 0x6ff   : > { %v3859_v20 = vpack.c.bf16 %v3249_v47, %v3246_v17  ;;  %v7143_v41 = vadd.f32 %v4400_v21, %v7046_v48 }
 0x700   : > { %3936 = vst [vmem:[%s5565_s16 + $0x8] sm:$0xff] %v3864_v26  }
 0x701   : > { %3860 = vst [vmem:[%s5565_s16] sm:$0xff] %v3859_v20   ;;  %v4401_v4 = vpop.f32.mrb[116].mxu1  ;;  %v4581_v37 = vpop.f32.mrb[116].mxu0 }
 0x702   : > { %v3270_v6 = vadd.f32 %v4581_v37, %v7079_v58  ;;  %v4402_v63 = vpop.f32.mrb[117].mxu1  ;;  %v3261_v52 = vpop.f32.mrb[117].mxu0 }
 0x703   : > { %v4403_v46 = vadd.f32 %v4402_v63, %v4401_v4  ;;  %v3262_v10 = vadd.f32 %v3261_v52, %v7067_v36  ;;  %v4404_v49 = vpop.f32.mrb[118].mxu1  ;;  %v4582_v34 = vpop.f32.mrb[118].mxu0 }
 0x704   : > { %v3273_v2 = vadd.f32 %v4582_v34, %v7085_v38  ;;  %v4405_v1 = vpop.f32.mrb[119].mxu1  ;;  %v3264_v48 = vpop.f32.mrb[119].mxu0 }
 0x705   : > { %v4406_v7 = vadd.f32 %v4405_v1, %v4404_v49  ;;  %v3265_v39 = vadd.f32 %v3264_v48, %v7073_v55  ;;  %v3157_v24 = vadd.f32 %v4403_v46, %v7052_v28 }
 0x706   : > { %v3874_v25 = vpack.c.bf16 %v3273_v2, %v3270_v6 }
 0x707   : > { %v3869_v58 = vpack.c.bf16 %v3265_v39, %v3262_v10  ;;  %v3160_v57 = vadd.f32 %v4406_v7, %v7058_v18 }
 0x708   : > { %3938 = vst [vmem:[%s5565_s16 + $0x18] sm:$0xff] %v3874_v25  }
 0x709   : > { %3937 = vst [vmem:[%s5565_s16 + $0x10] sm:$0xff] %v3869_v58   ;;  %v4407_v61 = vpop.f32.mrb[120].mxu1  ;;  %v4585_v22 = vpop.f32.mrb[120].mxu0 }
 0x70a   : > { %v3286_v36 = vadd.f32 %v4585_v22, %v7103_v9  ;;  %v4408_v31 = vpop.f32.mrb[121].mxu1  ;;  %v3277_v38 = vpop.f32.mrb[121].mxu0 }
 0x70b   : > { %v4409_v13 = vadd.f32 %v4408_v31, %v4407_v61  ;;  %v3278_v56 = vadd.f32 %v3277_v38, %v7091_v33  ;;  %v4410_v55 = vpop.f32.mrb[122].mxu1  ;;  %v4586_v16 = vpop.f32.mrb[122].mxu0 }
 0x70c   : > { %v3289_v28 = vadd.f32 %v4586_v16, %v7109_v27  ;;  %v4411_v43 = vpop.f32.mrb[123].mxu1  ;;  %v3280_v3 = vpop.f32.mrb[123].mxu0 }
 0x70d   : > { %v4412_v18 = vadd.f32 %v4411_v43, %v4410_v55  ;;  %v3281_v51 = vadd.f32 %v3280_v3, %v7097_v12  ;;  %v3165_v17 = vadd.f32 %v4409_v13, %v7064_v11 }
 0x70e   : > { %v3884_v19 = vpack.c.bf16 %v3289_v28, %v3286_v36 }
 0x70f   : > { %v3879_v9 = vpack.c.bf16 %v3281_v51, %v3278_v56  ;;  %v3168_v0 = vadd.f32 %v4412_v18, %v7070_v44 }
 0x710   : > { %3940 = vst [vmem:[%s5565_s16 + $0x28] sm:$0xff] %v3884_v19  }
 0x711   : > { %3939 = vst [vmem:[%s5565_s16 + $0x20] sm:$0xff] %v3879_v9   ;;  %v4413_v29 = vpop.f32.mrb[124].mxu1  ;;  %v4589_v35 = vpop.f32.mrb[124].mxu0 }
 0x712   : > { %v3302_v33 = vadd.f32 %v4589_v35, %v7127_v54  ;;  %v4414_v30 = vpop.f32.mrb[125].mxu1  ;;  %v3293_v27 = vpop.f32.mrb[125].mxu0 }
 0x713   : > { %v4415_v21 = vadd.f32 %v4414_v30, %v4413_v29  ;;  %v3294_v47 = vadd.f32 %v3293_v27, %v7115_v59  ;;  %v4416_v12 = vpop.f32.mrb[126].mxu1  ;;  %v4590_v26 = vpop.f32.mrb[126].mxu0 }
 0x714   : > { %v3305_v11 = vadd.f32 %v4590_v26, %v7133_v60  ;;  %v4417_v20 = vpop.f32.mrb[127].mxu1  ;;  %v3296_v4 = vpop.f32.mrb[127].mxu0 }
 0x715   : > { %v4418_v44 = vadd.f32 %v4417_v20, %v4416_v12  ;;  %v3297_v37 = vadd.f32 %v3296_v4, %v7121_v62  ;;  %v3173_v6 = vadd.f32 %v4415_v21, %v7076_v45 }
 0x716   : > { %v3894_v63 = vpack.c.bf16 %v3305_v11, %v3302_v33 }
 0x717   : > { %v3889_v54 = vpack.c.bf16 %v3297_v37, %v3294_v47  ;;  %v3176_v52 = vadd.f32 %v4418_v44, %v7082_v15 }
 0x718   : > { %3942 = vst [vmem:[%s5565_s16 + $0x38] sm:$0xff] %v3894_v63  }
 0x719   : > { %3941 = vst [vmem:[%s5565_s16 + $0x30] sm:$0xff] %v3889_v54   ;;  %v4419_v46 = vpop.f32.mrb[128].mxu1  ;;  %v4593_v10 = vpop.f32.mrb[128].mxu0 }
 0x71a   : > { %v3318_v59 = vadd.f32 %v4593_v10, %v3157_v24  ;;  %v4420_v49 = vpop.f32.mrb[129].mxu1  ;;  %v3309_v60 = vpop.f32.mrb[129].mxu0 }
 0x71b   : > { %v4421_v34 = vadd.f32 %v4420_v49, %v4419_v46  ;;  %v3310_v2 = vadd.f32 %v3309_v60, %v7140_v23  ;;  %v4422_v1 = vpop.f32.mrb[130].mxu1  ;;  %v4594_v62 = vpop.f32.mrb[130].mxu0 }
 0x71c   : > { %v3321_v48 = vadd.f32 %v4594_v62, %v3160_v57  ;;  %v4423_v45 = vpop.f32.mrb[131].mxu1  ;;  %v3312_v7 = vpop.f32.mrb[131].mxu0 }
 0x71d   : > { %v4424_v39 = vadd.f32 %v4423_v45, %v4422_v1  ;;  %v3313_v15 = vadd.f32 %v3312_v7, %v7143_v41  ;;  %v3181_v25 = vadd.f32 %v4421_v34, %v7088_v50 }
 0x71e   : > { %v3904_v58 = vpack.c.bf16 %v3321_v48, %v3318_v59 }
 0x71f   : > { %v3899_v61 = vpack.c.bf16 %v3313_v15, %v3310_v2  ;;  %v3184_v24 = vadd.f32 %v4424_v39, %v7094_v42 }
 0x720   : > { %3944 = vst [vmem:[%s5565_s16 + $0x48] sm:$0xff] %v3904_v58  }
 0x721   : > { %3943 = vst [vmem:[%s5565_s16 + $0x40] sm:$0xff] %v3899_v61   ;;  %v4425_v22 = vpop.f32.mrb[132].mxu1  ;;  %v4597_v36 = vpop.f32.mrb[132].mxu0 }
 0x722   : > { %v3334_v31 = vadd.f32 %v4597_v36, %v3173_v6  ;;  %v4426_v23 = vpop.f32.mrb[133].mxu1  ;;  %v3325_v57 = vpop.f32.mrb[133].mxu0 }
 0x723   : > { %v4427_v38 = vadd.f32 %v4426_v23, %v4425_v22  ;;  %v3326_v13 = vadd.f32 %v3325_v57, %v3165_v17  ;;  %v4428_v56 = vpop.f32.mrb[134].mxu1  ;;  %v4598_v55 = vpop.f32.mrb[134].mxu0 }
 0x724   : > { %v3337_v41 = vadd.f32 %v4598_v55, %v3176_v52  ;;  %v4429_v16 = vpop.f32.mrb[135].mxu1  ;;  %v3328_v50 = vpop.f32.mrb[135].mxu0 }
 0x725   : > { %v4430_v28 = vadd.f32 %v4429_v16, %v4428_v56  ;;  %v3329_v43 = vadd.f32 %v3328_v50, %v3168_v0  ;;  %v3189_v42 = vadd.f32 %v4427_v38, %v7100_v53 }
 0x726   : > { %v3914_v3 = vpack.c.bf16 %v3337_v41, %v3334_v31 }
 0x727   : > { %v3909_v18 = vpack.c.bf16 %v3329_v43, %v3326_v13  ;;  %v3192_v51 = vadd.f32 %v4430_v28, %v7106_v8 }
 0x728   : > { %3946 = vst [vmem:[%s5565_s16 + $0x58] sm:$0xff] %v3914_v3  }
 0x729   : > { %3945 = vst [vmem:[%s5565_s16 + $0x50] sm:$0xff] %v3909_v18   ;;  %v4431_v19 = vpop.f32.mrb[136].mxu1  ;;  %v4601_v9 = vpop.f32.mrb[136].mxu0 }
 0x72a   : > { %v3350_v29 = vadd.f32 %v4601_v9, %v3189_v42  ;;  %v4432_v17 = vpop.f32.mrb[137].mxu1  ;;  %v3341_v35 = vpop.f32.mrb[137].mxu0 }
 0x72b   : > { %v4433_v33 = vadd.f32 %v4432_v17, %v4431_v19  ;;  %v3342_v30 = vadd.f32 %v3341_v35, %v3181_v25  ;;  %v4434_v27 = vpop.f32.mrb[138].mxu1  ;;  %v4602_v0 = vpop.f32.mrb[138].mxu0 }
 0x72c   : > { %v3353_v21 = vadd.f32 %v4602_v0, %v3192_v51  ;;  %v4435_v53 = vpop.f32.mrb[139].mxu1  ;;  %v3344_v47 = vpop.f32.mrb[139].mxu0 }
 0x72d   : > { %v4436_v12 = vadd.f32 %v4435_v53, %v4434_v27  ;;  %v3345_v26 = vadd.f32 %v3344_v47, %v3184_v24  ;;  %v3197_v8 = vadd.f32 %v4433_v33, %v7112_v14 }
 0x72e   : > { %v3924_v11 = vpack.c.bf16 %v3353_v21, %v3350_v29 }
 0x72f   : > { %v3919_v20 = vpack.c.bf16 %v3345_v26, %v3342_v30  ;;  %v3200_v4 = vadd.f32 %v4436_v12, %v7118_v5 }
 0x730   : > { %3948 = vst [vmem:[%s5565_s16 + $0x68] sm:$0xff] %v3924_v11  }
 0x731   : > { %3947 = vst [vmem:[%s5565_s16 + $0x60] sm:$0xff] %v3919_v20   ;;  %v4437_v44 = vpop.f32.mrb[140].mxu1  ;;  %v4605_v37 = vpop.f32.mrb[140].mxu0 }
 0x732   : > { %v4438_v6 = vpop.f32.mrb[141].mxu1  ;;  %v3357_v63 = vpop.f32.mrb[141].mxu0 }
 0x733   : > { %v4439_v54 = vadd.f32 %v4438_v6, %v4437_v44  ;;  %v3358_v52 = vadd.f32 %v3357_v63, %v3197_v8  ;;  %v4440_v46 = vpop.f32.mrb[142].mxu1  ;;  %v4606_v10 = vpop.f32.mrb[142].mxu0 }
 0x734   : > { %v4441_v14 = vpop.f32.mrb[143].mxu1  ;;  %v3360_v59 = vpop.f32.mrb[143].mxu0 }
 0x735   : > { %v3205_v5 = vadd.f32 %v4439_v54, %v7124_v32  ;;  %v4442_v49 = vadd.f32 %v4441_v14, %v4440_v46  ;;  %v3361_v60 = vadd.f32 %v3360_v59, %v3200_v4 }
 0x737   : > { %v3366_v34 = vadd.f32 %v4605_v37, %v3205_v5  ;;  %v3208_v2 = vadd.f32 %v4442_v49, %v7130_v40  ;;  %v3929_v1 = vpack.c.bf16 %v3361_v60, %v3358_v52 }
 0x739   : > { %v3369_v62 = vadd.f32 %v4606_v10, %v3208_v2  ;;  %3949 = vst [vmem:[%s5565_s16 + $0x70] sm:$0xff] %v3929_v1  }
 0x73b   : > { %v3934_v32 = vpack.c.bf16 %v3369_v62, %v3366_v34 }
 0x73d   : > { %3950 = vst [vmem:[%s5565_s16 + $0x78] sm:$0xff] %v3934_v32  }
 0x73e   : > { %5101 = shalt.err (!%p5098_p5)
}
 0x73f   : > { %s5102_s16 = scalar_lea.hbm %s7194_s17, 2048  ;;  %s5106_s21 = scalar_lea.hbm %s7418_s0, 8192 }
 0x740   : > { %p5103_p3 = scmp.ne.s32.totalorder %s7194_s17, %s5102_s16  ;;  %p5107_p6 = scmp.lt.u32.totalorder %s7194_s17, %s7418_s0 }
 0x741   : > { %p5108_p1 = scmp.lt.u32.totalorder %s5106_s21, %s5102_s16  ;;  %p5110_p9 = scmp.lt.u32.totalorder %s5102_s16, %s7194_s17 }
 0x742   : > { %p5104_p7 = pnand %p5103_p3, %p7420_p0 }
 0x743   : > { %p5109_p12 = por %p5108_p1, %p5107_p6 }
 0x744   : > { %p5105_p13 = pneg %p5104_p7 }
 0x745   : > { %p5111_p4 = por %p5110_p9, %p5109_p12 }
 0x747   : > { %p5112_p10 = pnand %p5111_p4, %p5105_p13 }
 0x749   : > { %5115 = shalt.err (!%p5112_p10)
}
 0x74a   : > { %s5250_s23 = smov 64   ;;  %s5251_s7 = smov 128  }
 0x74b   : > { %s5252_s2 = smov 4  }
 0x74c   : > { %4689 = dma.vmem_to_hbm [thread:$0]  (%p7420_p0), %s7196_s1, 2048, %s7194_s17, %s7201_s11, %s5250_s23, %s5251_s7, %s5252_s2  }
 0x74d PF: > { %p4703_p8 = scmp.ge.s32.totalorder %s5238_s14, 2  ;;  %s3562_s15 = sand.u32 1, %s5186_s24  }
 0x74e   : > { %p7421_p11 = scmp.ne.s32.totalorder %s7351_s19, 0  ;;  %s3563_s16 = scalar_lea.sflag [#allocation6], %s3562_s15 }
 0x750   : > { %p4699_p2 = pnand %p4703_p8, %p7421_p11 }
 0x752   : > { %5181 = dma.done.wait (!%p4699_p2), %s3563_s16, 2048  }
 0x753   : > { %5183 = vsyncadd (!%p4699_p2), %s3563_s16, 4294965248  ;;  %s26_s14 = sadd.s32 1, %s5238_s14   ;;  %s7423_s3 = sld [smem:[#allocation17_spill]] }
 0x754   : > { %p7230_p5 = scmp.ge.s32.totalorder %s26_s14, 6   ;;  %s7424_s11 = sld [smem:[#allocation14_spill]] }
 0x755   : > { %s7425_s19 = sld [smem:[#allocation15_spill]]  ;;  %s7426_s13 = sld [smem:[#allocation16_spill]] }
 0x756   : > { %s7428_s24 = smov %s5190_s25  ;;  %s7429_s25 = smov %s5194_s26 }
 0x757   : > { %s7430_s26 = smov %s5486_s4  ;;  %s7431_s27 = smov %s5202_s28 }
 0x758   : > { %s7432_s28 = smov %s5206_s29  ;;  %s7434_s30 = smov %s5214_s8 }
 0x759   : > { %s7433_s29 = smov %s7423_s3  ;;  %s7435_s8 = smov %s5218_s9 }
 0x75a   : > { %s7436_s9 = smov %s5483_s22  ;;  %s7437_s10 = smov %s5230_s12 }
 0x75b   : > { %s7438_s12 = smov %s7425_s19  ;;  %25 = sbr.rel (!%p7230_p5) target bundleno = 19 (0x13), region = 114 }
 0x762   :  { %3568 = vsyncpa [#allocation5], 1 }
 0x763   :  { %3570 = vsyncpa [#allocation5 + $0x1], 1 }
 0x764   :  { %3571 = vsyncpa [#allocation8], 1 }
 0x765   :  { %3573 = vsyncpa [#allocation8 + $0x1], 1 }
 0x766   :  { %3574 = vsyncpa [#allocation6], 1 }
 0x767   :  { %3576 = vsyncpa [#allocation6 + $0x1], 1 }

</bundles_post_ra>
